<compile_context>
chip_gen: v5e
topology: v5e:2x2
jax: 0.10.0
libtpu: 0.0.40
codegen_flags: <defaults>
</compile_context>

<pallas_src>
import functools

import numpy as np
import jax
import jax.numpy as jnp
from jax.experimental import pallas as pl
from jax.experimental.pallas import tpu as pltpu

# ----------------------------- problem sizes --------------------------------
B = 2          # batch
C = 4          # channels
H = 16         # height
W = 16         # width
HW = H * W     # 256
PAD_C = 8      # channel axis padded 4 -> 8 (vreg sublane granularity)

# ----------------------------- DEQ / anderson hyper-params ------------------
F_THRES = 40       # DEQ(f_thres=40)
M_AND = 5          # anderson history size m
LAM_AND = 1e-4     # anderson Tikhonov regularizer
BETA = 1.0         # anderson mixing beta
assert BETA == 1.0  # X-history mixing dropped (see TODO above)


def _make_mix_matrix_np():
    # deterministic, row-normalized channel-mixing matrix (spectral radius <=1),
    # zero-padded to (8, 8) so padded sublanes stay exactly zero.
    idx = np.arange(C, dtype=np.float32)
    m = np.exp(-np.abs(idx[:, None] - idx[None, :]))
    m = m / m.sum(axis=1, keepdims=True)
    mp = np.zeros((PAD_C, PAD_C), dtype=np.float32)
    mp[:C, :C] = m
    return mp


M_PAD_NP = _make_mix_matrix_np()
EYE_PAD_NP = np.zeros((PAD_C, PAD_C), dtype=np.float32)
EYE_PAD_NP[np.arange(C), np.arange(C)] = 1.0          # identity on real channels only


# ----------------------------- fused Pallas kernel ---------------------------
def _deq_kernel(x_ref, m_ref, a_ref, o_ref, f_stk, g_stk, *, bb):
    # x_ref : (bb, PAD_C, HW) VMEM  observation x (rows C..7 zero)
    # m_ref : (PAD_C, PAD_C)  VMEM  M_eff = (rho*I - lam*M_c)/(1+rho)  (pad rows 0)
    # a_ref : (1,)            SMEM  a = 1/(1+rho)
    # o_ref : (bb, PAD_C, HW) VMEM  z_star (lowest-residual iterate, padded)
    # f_stk, g_stk : (M_AND, bb, PAD_C, HW) VMEM scratch  anderson F / G history
    a = a_ref[0]
    x0 = x_ref[...]                       # (bb, PAD_C, HW), resident all solve
    m_eff = m_ref[...]                    # (PAD_C, PAD_C)
    ax0 = a * x0                          # hoisted once (only use of `a`)

    def apply_f(z):
        # internal-algorithm iteration:  f(z) = x/(1+rho) + M_eff @ z   (MXU)
        mixed = jnp.stack(
            [jnp.dot(m_eff, z[b], preferred_element_type=jnp.float32)
             for b in range(bb)], axis=0)
        return ax0 + mixed

    def bdot(u, v):
        # per-batch-element inner product -> (bb, 1, 1)
        return jnp.sum(u * v, axis=(1, 2), keepdims=True)

    def recip(v):
        # EUP approx reciprocal + one Newton step (pivots can shrink to ~lam)
        r = pl.reciprocal(v, approx=True)
        return r * (2.0 - v * r)

    # ---- bootstrap: X0 = x0, F0 = f(x0);  X1 = F0, F1 = f(F0) ---------------
    z0 = x0
    f0 = apply_f(z0)
    g0 = f0 - z0
    f1 = apply_f(f0)
    g1 = f1 - f0
    f_stk[0] = f0
    g_stk[0] = g0
    f_stk[1] = f1
    g_stk[1] = g1

    # persistent 5x5 gram <G_i, G_j>: carried in registers, updated incrementally
    gram = [[None] * M_AND for _ in range(M_AND)]
    gram[0][0] = bdot(g0, g0)
    g01 = bdot(g0, g1)
    gram[0][1] = g01
    gram[1][0] = g01
    gram[1][1] = bdot(g1, g1)

    best_rel = jnp.full((bb, 1, 1), 1e8, dtype=jnp.float32)
    best_z = z0

    def anderson_step(n, idx, gram, best_rel, best_z):
        """One Anderson iteration: static history size n, static write slot idx."""
        # -- alpha solve:  (G G^T + lam I) w = 1,  alpha = w / sum(w) ---------
        # (the bordered (n+1)x(n+1) system reduced analytically; unrolled
        #  Gaussian elimination on per-batch scalars, EUP reciprocals)
        A = [[gram[i][j] for j in range(n)] for i in range(n)]
        for i in range(n):
            A[i][i] = A[i][i] + LAM_AND
        rhs = [1.0] * n
        piv = [None] * n
        for i in range(n):
            piv[i] = recip(A[i][i])
            for r in range(i + 1, n):
                fct = A[r][i] * piv[i]
                for c in range(i + 1, n):
                    A[r][c] = A[r][c] - fct * A[i][c]
                rhs[r] = rhs[r] - fct * rhs[i]
        w = [None] * n
        for i in reversed(range(n)):
            acc = rhs[i]
            for c in range(i + 1, n):
                acc = acc - A[i][c] * w[c]
            w[i] = acc * piv[i]            # reuse pivot reciprocal (no divide)
        wsum = w[0]
        for i in range(1, n):
            wsum = wsum + w[i]
        inv_wsum = recip(wsum)
        alpha = [w[i] * inv_wsum for i in range(n)]

        # -- anderson mixing (beta == 1):  z_new = sum_i alpha_i * F_i --------
        z_new = alpha[0] * f_stk[0]
        for i in range(1, n):
            z_new = z_new + alpha[i] * f_stk[i]

        # -- fixed-point map + residual ---------------------------------------
        f_new = apply_f(z_new)
        g_new = f_new - z_new
        gsq = bdot(g_new, g_new)

        # -- incremental gram update: only row/col `idx` changes ---------------
        live = min(n + 1, M_AND)           # history size seen by the next step
        new_gram = [row[:] for row in gram]
        for j in range(live):
            v = gsq if j == idx else bdot(g_new, g_stk[j])
            new_gram[idx][j] = v
            new_gram[j][idx] = v

        f_stk[idx] = f_new
        g_stk[idx] = g_new

        # -- lowest-residual tracking ('rel' mode, like the torch anderson) ----
        fsq = bdot(f_new, f_new)
        rel = jnp.sqrt(gsq) * pl.reciprocal(1e-5 + jnp.sqrt(fsq), approx=True)
        better = rel < best_rel
        best_rel = jnp.where(better, rel, best_rel)
        best_z = jnp.where(better, z_new, best_z)
        return new_gram, best_rel, best_z

    # ---- warm-up k = 2..m-1: static history size n = k, write slot idx = k --
    for k in range(2, min(M_AND, F_THRES)):
        gram, best_rel, best_z = anderson_step(k, k, gram, best_rel, best_z)

    # ---- steady state k = m..threshold-1: n == m, slot = k % m --------------
    # unrolled in groups of m so every slot index is static (static VMEM
    # slices, no validity masking); gram + best iterate ride the fori carry.
    def _flat(g):
        return tuple(g[i][j] for i in range(M_AND) for j in range(i, M_AND))

    def _unflat(flat):
        g = [[None] * M_AND for _ in range(M_AND)]
        it = iter(flat)
        for i in range(M_AND):
            for j in range(i, M_AND):
                v = next(it)
                g[i][j] = v
                g[j][i] = v
        return g

    n_steady = max(F_THRES - M_AND, 0)
    n_groups, n_rem = divmod(n_steady, M_AND)

    if n_groups > 0:
        def group_body(_, carry):
            gflat, brel, bz = carry
            g = _unflat(gflat)
            for idx in range(M_AND):
                g, brel, bz = anderson_step(M_AND, idx, g, brel, bz)
            return (_flat(g), brel, bz)

        gflat, best_rel, best_z = jax.lax.fori_loop(
            0, n_groups, group_body, (_flat(gram), best_rel, best_z))
        gram = _unflat(gflat)

    for idx in range(n_rem):
        gram, best_rel, best_z = anderson_step(M_AND, idx, gram, best_rel, best_z)

    o_ref[...] = best_z


# ----------------------------- wrapper ---------------------------------------
def _pick_batch_block(bsz):
    """Fuse the whole batch into one kernel body on single-TensorCore chips
    (v5e / v6e) so the independent Anderson chains fill idle VLIW slots; keep
    one element per grid step elsewhere (v7x / megacore parts shard the
    'parallel' batch axis across TensorCores instead)."""
    try:
        kind = jax.devices()[0].device_kind.lower()
    except Exception:
        return 1
    single_core_chips = ("v5 lite", "v5e", "v5litepod", "v6 lite", "v6e")
    if any(tag in kind for tag in single_core_chips):
        return bsz
    return 1


def anderson_deq(x_pad, m_eff, a_arr, batch_block=None):
    """Run the full fused Anderson/DEQ solve.  x_pad: (B, PAD_C, HW)."""
    bsz = x_pad.shape[0]
    bb = _pick_batch_block(bsz) if batch_block is None else int(batch_block)
    bb = max(1, min(bb, bsz))
    while bsz % bb:
        bb -= 1
    grid = (bsz // bb,)

    steps = F_THRES
    per_elem = (2 * PAD_C * PAD_C * HW                 # MXU channel mix
                + (2 * 6 + 2 * M_AND + 6) * PAD_C * HW  # reductions + mixing
                + 400)                                  # alpha-solve scalars
    cost = pl.CostEstimate(
        flops=int(bsz * steps * per_elem),
        transcendentals=int(bsz * steps * 9),
        bytes_accessed=int(2 * bsz * PAD_C * HW * 4 + PAD_C * PAD_C * 4 + 4))

    kernel = functools.partial(_deq_kernel, bb=bb)
    return pl.pallas_call(
        kernel,
        out_shape=jax.ShapeDtypeStruct((bsz, PAD_C, HW), jnp.float32),
        grid=grid,
        in_specs=[pl.BlockSpec((bb, PAD_C, HW), lambda i: (i, 0, 0)),
                  pl.BlockSpec((PAD_C, PAD_C), lambda i: (0, 0)),
                  pl.BlockSpec(memory_space=pltpu.MemorySpace.SMEM)],
        out_specs=pl.BlockSpec((bb, PAD_C, HW), lambda i: (i, 0, 0)),
        scratch_shapes=[pltpu.VMEM((M_AND, bb, PAD_C, HW), jnp.float32),
                        pltpu.VMEM((M_AND, bb, PAD_C, HW), jnp.float32)],
        compiler_params=pltpu.CompilerParams(
            dimension_semantics=("parallel",)),
        cost_estimate=cost,
    )(x_pad, m_eff, a_arr)


# ----------------------------- plain-JAX glue --------------------------------
def deq_solver_solve(x0_img, rho=1.0, lam=0.1, learned_params=False):
    """DEQSolver.solve: initialize -> pack -> DEQ(anderson) -> unpack -> state[0]."""
    bsz = x0_img.shape[0]
    x_obs = x0_img.reshape(bsz, C, HW).astype(jnp.float32)
    x_pad = jnp.pad(x_obs, ((0, 0), (0, PAD_C - C), (0, 0)))      # (B, 8, HW)

    rho = jnp.asarray(rho, jnp.float32)
    lam = jnp.asarray(lam, jnp.float32)
    if learned_params:
        rho = jnp.asarray(1.0, jnp.float32) * rho   # nn.Parameter r = 1.0
        lam = jnp.asarray(1.0, jnp.float32) * lam   # nn.Parameter l = 1.0

    a = 1.0 / (1.0 + rho)
    # fold rho/lam/(1+rho) into one effective mixing matrix on the host:
    #   f(z) = a*x + M_eff @ z,    M_eff = a * (rho*I - lam*M_c)   (pad rows 0)
    m_eff = (a * (rho * jnp.asarray(EYE_PAD_NP) - lam * jnp.asarray(M_PAD_NP))
             ).astype(jnp.float32)
    a_arr = jnp.reshape(a, (1,)).astype(jnp.float32)

    z_pad = anderson_deq(x_pad, m_eff, a_arr)                     # (B, 8, HW)
    return z_pad[:, :C, :].reshape(bsz, C, H, W)


# ----------------------------- main -------------------------------------------
if __name__ == "__main__":
    key = jax.random.PRNGKey(0)
    x0 = jax.random.normal(key, (B, C, H, W), dtype=jnp.float32)

    solver = jax.jit(functools.partial(deq_solver_solve, rho=1.0, lam=0.1))
    out = solver(x0)
    out = jax.block_until_ready(out)

    assert out.shape == (B, C, H, W)
    assert bool(jnp.all(jnp.isfinite(out)))
    print("KERNEL_OK")
</pallas_src>

<mosaic_0001>
module attributes {stable_mosaic.version = 11 : i64} {
  func.func @_deq_kernel(%arg0: i32, %arg1: memref<1x8x256xf32, #tpu.memory_space<vmem>>, %arg2: memref<8x8xf32, #tpu.memory_space<vmem>>, %arg3: memref<1xf32, #tpu.memory_space<smem>>, %arg4: memref<1x8x256xf32, #tpu.memory_space<vmem>>, %arg5: memref<5x1x8x256xf32, #tpu.memory_space<vmem>>, %arg6: memref<5x1x8x256xf32, #tpu.memory_space<vmem>>) attributes {dimension_semantics = [#tpu.dimension_semantics<parallel>], iteration_bounds = array<i64: 2>, scalar_prefetch = 0 : i64, scratch_operands = 2 : i64, tpu.core_type = #tpu.core_type<tc>, window_params = [{transform_indices = @transform_0, window_bounds = array<i64: 1, 8, 256>}, {pipeline_mode = #tpu.pipeline_mode<synchronous>, transform_indices = @transform_1, window_bounds = array<i64: 8, 8>}, {transform_indices = @transform_2, window_bounds = array<i64: 1>}, {transform_indices = @transform_3, window_bounds = array<i64: 1, 8, 256>}]} {
    %c0 = arith.constant 0 : index
    %0 = memref.load %arg3[%c0] : memref<1xf32, #tpu.memory_space<smem>>
    %c0_0 = arith.constant 0 : index
    %c0_1 = arith.constant 0 : index
    %c0_2 = arith.constant 0 : index
    %1 = vector.load %arg1[%c0_0, %c0_1, %c0_2] : memref<1x8x256xf32, #tpu.memory_space<vmem>>, vector<1x8x256xf32>
    %c0_3 = arith.constant 0 : index
    %c0_4 = arith.constant 0 : index
    %2 = vector.load %arg2[%c0_3, %c0_4] : memref<8x8xf32, #tpu.memory_space<vmem>>, vector<8x8xf32>
    %3 = vector.broadcast %0 : f32 to vector<1x8x256xf32>
    %4 = arith.mulf %3, %1 : vector<1x8x256xf32>
    %5 = vector.shape_cast %1 : vector<1x8x256xf32> to vector<8x256xf32>
    %cst = arith.constant dense<0.000000e+00> : vector<8x256xf32>
    %6 = tpu.matmul %2, %5, %cst {dimension_numbers = #tpu.dot_dimension_numbers<[1], [0], [0], [1], [0, 0, 1, 1], [], []>} : vector<8x8xf32>, vector<8x256xf32>, vector<8x256xf32> -> vector<8x256xf32>
    %7 = vector.shape_cast %6 : vector<8x256xf32> to vector<1x8x256xf32>
    %8 = arith.addf %4, %7 : vector<1x8x256xf32>
    %9 = arith.subf %8, %1 : vector<1x8x256xf32>
    %10 = vector.shape_cast %8 : vector<1x8x256xf32> to vector<8x256xf32>
    %cst_5 = arith.constant dense<0.000000e+00> : vector<8x256xf32>
    %11 = tpu.matmul %2, %10, %cst_5 {dimension_numbers = #tpu.dot_dimension_numbers<[1], [0], [0], [1], [0, 0, 1, 1], [], []>} : vector<8x8xf32>, vector<8x256xf32>, vector<8x256xf32> -> vector<8x256xf32>
    %12 = vector.shape_cast %11 : vector<8x256xf32> to vector<1x8x256xf32>
    %13 = arith.addf %4, %12 : vector<1x8x256xf32>
    %14 = arith.subf %13, %8 : vector<1x8x256xf32>
    %c0_6 = arith.constant 0 : index
    %c0_7 = arith.constant 0 : index
    %c0_8 = arith.constant 0 : index
    %c0_9 = arith.constant 0 : index
    %15 = vector.load %arg5[%c0_6, %c0_7, %c0_8, %c0_9] : memref<5x1x8x256xf32, #tpu.memory_space<vmem>>, vector<1x1x8x256xf32>
    %16 = vector.shape_cast %15 : vector<1x1x8x256xf32> to vector<1x8x256xf32>
    %17 = vector.shape_cast %8 : vector<1x8x256xf32> to vector<1x1x8x256xf32>
    tpu.vector_store %arg5[%c0_6, %c0_7, %c0_8, %c0_9], %17 {strides = array<i32>} : memref<5x1x8x256xf32, #tpu.memory_space<vmem>>, vector<1x1x8x256xf32>,
    %c0_10 = arith.constant 0 : index
    %c0_11 = arith.constant 0 : index
    %c0_12 = arith.constant 0 : index
    %c0_13 = arith.constant 0 : index
    %18 = vector.load %arg6[%c0_10, %c0_11, %c0_12, %c0_13] : memref<5x1x8x256xf32, #tpu.memory_space<vmem>>, vector<1x1x8x256xf32>
    %19 = vector.shape_cast %18 : vector<1x1x8x256xf32> to vector<1x8x256xf32>
    %20 = vector.shape_cast %9 : vector<1x8x256xf32> to vector<1x1x8x256xf32>
    tpu.vector_store %arg6[%c0_10, %c0_11, %c0_12, %c0_13], %20 {strides = array<i32>} : memref<5x1x8x256xf32, #tpu.memory_space<vmem>>, vector<1x1x8x256xf32>,
    %c1 = arith.constant 1 : index
    %c0_14 = arith.constant 0 : index
    %c0_15 = arith.constant 0 : index
    %c0_16 = arith.constant 0 : index
    %21 = vector.load %arg5[%c1, %c0_14, %c0_15, %c0_16] : memref<5x1x8x256xf32, #tpu.memory_space<vmem>>, vector<1x1x8x256xf32>
    %22 = vector.shape_cast %21 : vector<1x1x8x256xf32> to vector<1x8x256xf32>
    %23 = vector.shape_cast %13 : vector<1x8x256xf32> to vector<1x1x8x256xf32>
    tpu.vector_store %arg5[%c1, %c0_14, %c0_15, %c0_16], %23 {strides = array<i32>} : memref<5x1x8x256xf32, #tpu.memory_space<vmem>>, vector<1x1x8x256xf32>,
    %c1_17 = arith.constant 1 : index
    %c0_18 = arith.constant 0 : index
    %c0_19 = arith.constant 0 : index
    %c0_20 = arith.constant 0 : index
    %24 = vector.load %arg6[%c1_17, %c0_18, %c0_19, %c0_20] : memref<5x1x8x256xf32, #tpu.memory_space<vmem>>, vector<1x1x8x256xf32>
    %25 = vector.shape_cast %24 : vector<1x1x8x256xf32> to vector<1x8x256xf32>
    %26 = vector.shape_cast %14 : vector<1x8x256xf32> to vector<1x1x8x256xf32>
    tpu.vector_store %arg6[%c1_17, %c0_18, %c0_19, %c0_20], %26 {strides = array<i32>} : memref<5x1x8x256xf32, #tpu.memory_space<vmem>>, vector<1x1x8x256xf32>,
    %27 = arith.mulf %9, %9 : vector<1x8x256xf32>
    %cst_21 = arith.constant dense<0.000000e+00> : vector<1xf32>
    %28 = vector.multi_reduction <add>, %27, %cst_21 [1, 2] : vector<1x8x256xf32> to vector<1xf32>
    %29 = vector.shape_cast %28 : vector<1xf32> to vector<1x1x1xf32>
    %30 = arith.mulf %9, %14 : vector<1x8x256xf32>
    %cst_22 = arith.constant dense<0.000000e+00> : vector<1xf32>
    %31 = vector.multi_reduction <add>, %30, %cst_22 [1, 2] : vector<1x8x256xf32> to vector<1xf32>
    %32 = vector.shape_cast %31 : vector<1xf32> to vector<1x1x1xf32>
    %33 = arith.mulf %14, %14 : vector<1x8x256xf32>
    %cst_23 = arith.constant dense<0.000000e+00> : vector<1xf32>
    %34 = vector.multi_reduction <add>, %33, %cst_23 [1, 2] : vector<1x8x256xf32> to vector<1xf32>
    %35 = vector.shape_cast %34 : vector<1xf32> to vector<1x1x1xf32>
    %cst_24 = arith.constant 1.000000e+08 : f32
    %36 = vector.broadcast %cst_24 : f32 to vector<1x1x1xf32>
    %cst_25 = arith.constant 9.99999974E-5 : f32
    %37 = vector.broadcast %cst_25 : f32 to vector<1x1x1xf32>
    %38 = arith.addf %29, %37 : vector<1x1x1xf32>
    %cst_26 = arith.constant 9.99999974E-5 : f32
    %39 = vector.broadcast %cst_26 : f32 to vector<1x1x1xf32>
    %40 = arith.addf %35, %39 : vector<1x1x1xf32>
    %41 = tpu.reciprocal %38 {approx = true} : vector<1x1x1xf32> -> vector<1x1x1xf32>
    %42 = arith.mulf %38, %41 : vector<1x1x1xf32>
    %cst_27 = arith.constant 2.000000e+00 : f32
    %43 = vector.broadcast %cst_27 : f32 to vector<1x1x1xf32>
    %44 = arith.subf %43, %42 : vector<1x1x1xf32>
    %45 = arith.mulf %41, %44 : vector<1x1x1xf32>
    %46 = arith.mulf %32, %45 : vector<1x1x1xf32>
    %47 = arith.mulf %46, %32 : vector<1x1x1xf32>
    %48 = arith.subf %40, %47 : vector<1x1x1xf32>
    %cst_28 = arith.constant 1.000000e+00 : f32
    %49 = vector.broadcast %cst_28 : f32 to vector<1x1x1xf32>
    %50 = arith.mulf %46, %49 : vector<1x1x1xf32>
    %cst_29 = arith.constant 1.000000e+00 : f32
    %51 = vector.broadcast %cst_29 : f32 to vector<1x1x1xf32>
    %52 = arith.subf %51, %50 : vector<1x1x1xf32>
    %53 = tpu.reciprocal %48 {approx = true} : vector<1x1x1xf32> -> vector<1x1x1xf32>
    %54 = arith.mulf %48, %53 : vector<1x1x1xf32>
    %cst_30 = arith.constant 2.000000e+00 : f32
    %55 = vector.broadcast %cst_30 : f32 to vector<1x1x1xf32>
    %56 = arith.subf %55, %54 : vector<1x1x1xf32>
    %57 = arith.mulf %53, %56 : vector<1x1x1xf32>
    %58 = arith.mulf %52, %57 : vector<1x1x1xf32>
    %59 = arith.mulf %32, %58 : vector<1x1x1xf32>
    %cst_31 = arith.constant 1.000000e+00 : f32
    %60 = vector.broadcast %cst_31 : f32 to vector<1x1x1xf32>
    %61 = arith.subf %60, %59 : vector<1x1x1xf32>
    %62 = arith.mulf %61, %45 : vector<1x1x1xf32>
    %63 = arith.addf %62, %58 : vector<1x1x1xf32>
    %64 = tpu.reciprocal %63 {approx = true} : vector<1x1x1xf32> -> vector<1x1x1xf32>
    %65 = arith.mulf %63, %64 : vector<1x1x1xf32>
    %cst_32 = arith.constant 2.000000e+00 : f32
    %66 = vector.broadcast %cst_32 : f32 to vector<1x1x1xf32>
    %67 = arith.subf %66, %65 : vector<1x1x1xf32>
    %68 = arith.mulf %64, %67 : vector<1x1x1xf32>
    %69 = arith.mulf %62, %68 : vector<1x1x1xf32>
    %70 = arith.mulf %58, %68 : vector<1x1x1xf32>
    %c0_33 = arith.constant 0 : index
    %c0_34 = arith.constant 0 : index
    %c0_35 = arith.constant 0 : index
    %c0_36 = arith.constant 0 : index
    %71 = vector.load %arg5[%c0_33, %c0_34, %c0_35, %c0_36] : memref<5x1x8x256xf32, #tpu.memory_space<vmem>>, vector<1x1x8x256xf32>
    %72 = vector.shape_cast %71 : vector<1x1x8x256xf32> to vector<1x8x256xf32>
    %73 = vector.broadcast %69 : vector<1x1x1xf32> to vector<1x8x256xf32>
    %74 = arith.mulf %73, %72 : vector<1x8x256xf32>
    %c1_37 = arith.constant 1 : index
    %c0_38 = arith.constant 0 : index
    %c0_39 = arith.constant 0 : index
    %c0_40 = arith.constant 0 : index
    %75 = vector.load %arg5[%c1_37, %c0_38, %c0_39, %c0_40] : memref<5x1x8x256xf32, #tpu.memory_space<vmem>>, vector<1x1x8x256xf32>
    %76 = vector.shape_cast %75 : vector<1x1x8x256xf32> to vector<1x8x256xf32>
    %77 = vector.broadcast %70 : vector<1x1x1xf32> to vector<1x8x256xf32>
    %78 = arith.mulf %77, %76 : vector<1x8x256xf32>
    %79 = arith.addf %74, %78 : vector<1x8x256xf32>
    %80 = vector.shape_cast %79 : vector<1x8x256xf32> to vector<8x256xf32>
    %cst_41 = arith.constant dense<0.000000e+00> : vector<8x256xf32>
    %81 = tpu.matmul %2, %80, %cst_41 {dimension_numbers = #tpu.dot_dimension_numbers<[1], [0], [0], [1], [0, 0, 1, 1], [], []>} : vector<8x8xf32>, vector<8x256xf32>, vector<8x256xf32> -> vector<8x256xf32>
    %82 = vector.shape_cast %81 : vector<8x256xf32> to vector<1x8x256xf32>
    %83 = arith.addf %4, %82 : vector<1x8x256xf32>
    %84 = arith.subf %83, %79 : vector<1x8x256xf32>
    %85 = arith.mulf %84, %84 : vector<1x8x256xf32>
    %cst_42 = arith.constant dense<0.000000e+00> : vector<1xf32>
    %86 = vector.multi_reduction <add>, %85, %cst_42 [1, 2] : vector<1x8x256xf32> to vector<1xf32>
    %87 = vector.shape_cast %86 : vector<1xf32> to vector<1x1x1xf32>
    %c0_43 = arith.constant 0 : index
    %c0_44 = arith.constant 0 : index
    %c0_45 = arith.constant 0 : index
    %c0_46 = arith.constant 0 : index
    %88 = vector.load %arg6[%c0_43, %c0_44, %c0_45, %c0_46] : memref<5x1x8x256xf32, #tpu.memory_space<vmem>>, vector<1x1x8x256xf32>
    %89 = vector.shape_cast %88 : vector<1x1x8x256xf32> to vector<1x8x256xf32>
    %90 = arith.mulf %84, %89 : vector<1x8x256xf32>
    %cst_47 = arith.constant dense<0.000000e+00> : vector<1xf32>
    %91 = vector.multi_reduction <add>, %90, %cst_47 [1, 2] : vector<1x8x256xf32> to vector<1xf32>
    %92 = vector.shape_cast %91 : vector<1xf32> to vector<1x1x1xf32>
    %c1_48 = arith.constant 1 : index
    %c0_49 = arith.constant 0 : index
    %c0_50 = arith.constant 0 : index
    %c0_51 = arith.constant 0 : index
    %93 = vector.load %arg6[%c1_48, %c0_49, %c0_50, %c0_51] : memref<5x1x8x256xf32, #tpu.memory_space<vmem>>, vector<1x1x8x256xf32>
    %94 = vector.shape_cast %93 : vector<1x1x8x256xf32> to vector<1x8x256xf32>
    %95 = arith.mulf %84, %94 : vector<1x8x256xf32>
    %cst_52 = arith.constant dense<0.000000e+00> : vector<1xf32>
    %96 = vector.multi_reduction <add>, %95, %cst_52 [1, 2] : vector<1x8x256xf32> to vector<1xf32>
    %97 = vector.shape_cast %96 : vector<1xf32> to vector<1x1x1xf32>
    %c2 = arith.constant 2 : index
    %c0_53 = arith.constant 0 : index
    %c0_54 = arith.constant 0 : index
    %c0_55 = arith.constant 0 : index
    %98 = vector.load %arg5[%c2, %c0_53, %c0_54, %c0_55] : memref<5x1x8x256xf32, #tpu.memory_space<vmem>>, vector<1x1x8x256xf32>
    %99 = vector.shape_cast %98 : vector<1x1x8x256xf32> to vector<1x8x256xf32>
    %100 = vector.shape_cast %83 : vector<1x8x256xf32> to vector<1x1x8x256xf32>
    tpu.vector_store %arg5[%c2, %c0_53, %c0_54, %c0_55], %100 {strides = array<i32>} : memref<5x1x8x256xf32, #tpu.memory_space<vmem>>, vector<1x1x8x256xf32>,
    %c2_56 = arith.constant 2 : index
    %c0_57 = arith.constant 0 : index
    %c0_58 = arith.constant 0 : index
    %c0_59 = arith.constant 0 : index
    %101 = vector.load %arg6[%c2_56, %c0_57, %c0_58, %c0_59] : memref<5x1x8x256xf32, #tpu.memory_space<vmem>>, vector<1x1x8x256xf32>
    %102 = vector.shape_cast %101 : vector<1x1x8x256xf32> to vector<1x8x256xf32>
    %103 = vector.shape_cast %84 : vector<1x8x256xf32> to vector<1x1x8x256xf32>
    tpu.vector_store %arg6[%c2_56, %c0_57, %c0_58, %c0_59], %103 {strides = array<i32>} : memref<5x1x8x256xf32, #tpu.memory_space<vmem>>, vector<1x1x8x256xf32>,
    %104 = arith.mulf %83, %83 : vector<1x8x256xf32>
    %cst_60 = arith.constant dense<0.000000e+00> : vector<1xf32>
    %105 = vector.multi_reduction <add>, %104, %cst_60 [1, 2] : vector<1x8x256xf32> to vector<1xf32>
    %106 = vector.shape_cast %105 : vector<1xf32> to vector<1x1x1xf32>
    %107 = math.sqrt %87 : vector<1x1x1xf32>
    %108 = math.sqrt %106 : vector<1x1x1xf32>
    %cst_61 = arith.constant 9.99999974E-6 : f32
    %109 = vector.broadcast %cst_61 : f32 to vector<1x1x1xf32>
    %110 = arith.addf %109, %108 : vector<1x1x1xf32>
    %111 = tpu.reciprocal %110 {approx = true} : vector<1x1x1xf32> -> vector<1x1x1xf32>
    %112 = arith.mulf %107, %111 : vector<1x1x1xf32>
    %113 = arith.cmpf olt, %112, %36 : vector<1x1x1xf32>
    %114 = arith.select %113, %112, %36 : vector<1x1x1xi1>, vector<1x1x1xf32>
    %115 = vector.shape_cast %113 : vector<1x1x1xi1> to vector<1x1x1xi1>
    %116 = vector.broadcast %115 : vector<1x1x1xi1> to vector<1x8x256xi1>
    %117 = arith.select %116, %79, %1 : vector<1x8x256xi1>, vector<1x8x256xf32>
    %cst_62 = arith.constant 9.99999974E-5 : f32
    %118 = vector.broadcast %cst_62 : f32 to vector<1x1x1xf32>
    %119 = arith.addf %29, %118 : vector<1x1x1xf32>
    %cst_63 = arith.constant 9.99999974E-5 : f32
    %120 = vector.broadcast %cst_63 : f32 to vector<1x1x1xf32>
    %121 = arith.addf %35, %120 : vector<1x1x1xf32>
    %cst_64 = arith.constant 9.99999974E-5 : f32
    %122 = vector.broadcast %cst_64 : f32 to vector<1x1x1xf32>
    %123 = arith.addf %87, %122 : vector<1x1x1xf32>
    %124 = tpu.reciprocal %119 {approx = true} : vector<1x1x1xf32> -> vector<1x1x1xf32>
    %125 = arith.mulf %119, %124 : vector<1x1x1xf32>
    %cst_65 = arith.constant 2.000000e+00 : f32
    %126 = vector.broadcast %cst_65 : f32 to vector<1x1x1xf32>
    %127 = arith.subf %126, %125 : vector<1x1x1xf32>
    %128 = arith.mulf %124, %127 : vector<1x1x1xf32>
    %129 = arith.mulf %32, %128 : vector<1x1x1xf32>
    %130 = arith.mulf %129, %32 : vector<1x1x1xf32>
    %131 = arith.subf %121, %130 : vector<1x1x1xf32>
    %132 = arith.mulf %129, %92 : vector<1x1x1xf32>
    %133 = arith.subf %97, %132 : vector<1x1x1xf32>
    %cst_66 = arith.constant 1.000000e+00 : f32
    %134 = vector.broadcast %cst_66 : f32 to vector<1x1x1xf32>
    %135 = arith.mulf %129, %134 : vector<1x1x1xf32>
    %cst_67 = arith.constant 1.000000e+00 : f32
    %136 = vector.broadcast %cst_67 : f32 to vector<1x1x1xf32>
    %137 = arith.subf %136, %135 : vector<1x1x1xf32>
    %138 = arith.mulf %92, %128 : vector<1x1x1xf32>
    %139 = arith.mulf %138, %32 : vector<1x1x1xf32>
    %140 = arith.subf %97, %139 : vector<1x1x1xf32>
    %141 = arith.mulf %138, %92 : vector<1x1x1xf32>
    %142 = arith.subf %123, %141 : vector<1x1x1xf32>
    %cst_68 = arith.constant 1.000000e+00 : f32
    %143 = vector.broadcast %cst_68 : f32 to vector<1x1x1xf32>
    %144 = arith.mulf %138, %143 : vector<1x1x1xf32>
    %cst_69 = arith.constant 1.000000e+00 : f32
    %145 = vector.broadcast %cst_69 : f32 to vector<1x1x1xf32>
    %146 = arith.subf %145, %144 : vector<1x1x1xf32>
    %147 = tpu.reciprocal %131 {approx = true} : vector<1x1x1xf32> -> vector<1x1x1xf32>
    %148 = arith.mulf %131, %147 : vector<1x1x1xf32>
    %cst_70 = arith.constant 2.000000e+00 : f32
    %149 = vector.broadcast %cst_70 : f32 to vector<1x1x1xf32>
    %150 = arith.subf %149, %148 : vector<1x1x1xf32>
    %151 = arith.mulf %147, %150 : vector<1x1x1xf32>
    %152 = arith.mulf %140, %151 : vector<1x1x1xf32>
    %153 = arith.mulf %152, %133 : vector<1x1x1xf32>
    %154 = arith.subf %142, %153 : vector<1x1x1xf32>
    %155 = arith.mulf %152, %137 : vector<1x1x1xf32>
    %156 = arith.subf %146, %155 : vector<1x1x1xf32>
    %157 = tpu.reciprocal %154 {approx = true} : vector<1x1x1xf32> -> vector<1x1x1xf32>
    %158 = arith.mulf %154, %157 : vector<1x1x1xf32>
    %cst_71 = arith.constant 2.000000e+00 : f32
    %159 = vector.broadcast %cst_71 : f32 to vector<1x1x1xf32>
    %160 = arith.subf %159, %158 : vector<1x1x1xf32>
    %161 = arith.mulf %157, %160 : vector<1x1x1xf32>
    %162 = arith.mulf %156, %161 : vector<1x1x1xf32>
    %163 = arith.mulf %133, %162 : vector<1x1x1xf32>
    %164 = arith.subf %137, %163 : vector<1x1x1xf32>
    %165 = arith.mulf %164, %151 : vector<1x1x1xf32>
    %166 = arith.mulf %32, %165 : vector<1x1x1xf32>
    %cst_72 = arith.constant 1.000000e+00 : f32
    %167 = vector.broadcast %cst_72 : f32 to vector<1x1x1xf32>
    %168 = arith.subf %167, %166 : vector<1x1x1xf32>
    %169 = arith.mulf %92, %162 : vector<1x1x1xf32>
    %170 = arith.subf %168, %169 : vector<1x1x1xf32>
    %171 = arith.mulf %170, %128 : vector<1x1x1xf32>
    %172 = arith.addf %171, %165 : vector<1x1x1xf32>
    %173 = arith.addf %172, %162 : vector<1x1x1xf32>
    %174 = tpu.reciprocal %173 {approx = true} : vector<1x1x1xf32> -> vector<1x1x1xf32>
    %175 = arith.mulf %173, %174 : vector<1x1x1xf32>
    %cst_73 = arith.constant 2.000000e+00 : f32
    %176 = vector.broadcast %cst_73 : f32 to vector<1x1x1xf32>
    %177 = arith.subf %176, %175 : vector<1x1x1xf32>
    %178 = arith.mulf %174, %177 : vector<1x1x1xf32>
    %179 = arith.mulf %171, %178 : vector<1x1x1xf32>
    %180 = arith.mulf %165, %178 : vector<1x1x1xf32>
    %181 = arith.mulf %162, %178 : vector<1x1x1xf32>
    %c0_74 = arith.constant 0 : index
    %c0_75 = arith.constant 0 : index
    %c0_76 = arith.constant 0 : index
    %c0_77 = arith.constant 0 : index
    %182 = vector.load %arg5[%c0_74, %c0_75, %c0_76, %c0_77] : memref<5x1x8x256xf32, #tpu.memory_space<vmem>>, vector<1x1x8x256xf32>
    %183 = vector.shape_cast %182 : vector<1x1x8x256xf32> to vector<1x8x256xf32>
    %184 = vector.broadcast %179 : vector<1x1x1xf32> to vector<1x8x256xf32>
    %185 = arith.mulf %184, %183 : vector<1x8x256xf32>
    %c1_78 = arith.constant 1 : index
    %c0_79 = arith.constant 0 : index
    %c0_80 = arith.constant 0 : index
    %c0_81 = arith.constant 0 : index
    %186 = vector.load %arg5[%c1_78, %c0_79, %c0_80, %c0_81] : memref<5x1x8x256xf32, #tpu.memory_space<vmem>>, vector<1x1x8x256xf32>
    %187 = vector.shape_cast %186 : vector<1x1x8x256xf32> to vector<1x8x256xf32>
    %188 = vector.broadcast %180 : vector<1x1x1xf32> to vector<1x8x256xf32>
    %189 = arith.mulf %188, %187 : vector<1x8x256xf32>
    %190 = arith.addf %185, %189 : vector<1x8x256xf32>
    %c2_82 = arith.constant 2 : index
    %c0_83 = arith.constant 0 : index
    %c0_84 = arith.constant 0 : index
    %c0_85 = arith.constant 0 : index
    %191 = vector.load %arg5[%c2_82, %c0_83, %c0_84, %c0_85] : memref<5x1x8x256xf32, #tpu.memory_space<vmem>>, vector<1x1x8x256xf32>
    %192 = vector.shape_cast %191 : vector<1x1x8x256xf32> to vector<1x8x256xf32>
    %193 = vector.broadcast %181 : vector<1x1x1xf32> to vector<1x8x256xf32>
    %194 = arith.mulf %193, %192 : vector<1x8x256xf32>
    %195 = arith.addf %190, %194 : vector<1x8x256xf32>
    %196 = vector.shape_cast %195 : vector<1x8x256xf32> to vector<8x256xf32>
    %cst_86 = arith.constant dense<0.000000e+00> : vector<8x256xf32>
    %197 = tpu.matmul %2, %196, %cst_86 {dimension_numbers = #tpu.dot_dimension_numbers<[1], [0], [0], [1], [0, 0, 1, 1], [], []>} : vector<8x8xf32>, vector<8x256xf32>, vector<8x256xf32> -> vector<8x256xf32>
    %198 = vector.shape_cast %197 : vector<8x256xf32> to vector<1x8x256xf32>
    %199 = arith.addf %4, %198 : vector<1x8x256xf32>
    %200 = arith.subf %199, %195 : vector<1x8x256xf32>
    %201 = arith.mulf %200, %200 : vector<1x8x256xf32>
    %cst_87 = arith.constant dense<0.000000e+00> : vector<1xf32>
    %202 = vector.multi_reduction <add>, %201, %cst_87 [1, 2] : vector<1x8x256xf32> to vector<1xf32>
    %203 = vector.shape_cast %202 : vector<1xf32> to vector<1x1x1xf32>
    %c0_88 = arith.constant 0 : index
    %c0_89 = arith.constant 0 : index
    %c0_90 = arith.constant 0 : index
    %c0_91 = arith.constant 0 : index
    %204 = vector.load %arg6[%c0_88, %c0_89, %c0_90, %c0_91] : memref<5x1x8x256xf32, #tpu.memory_space<vmem>>, vector<1x1x8x256xf32>
    %205 = vector.shape_cast %204 : vector<1x1x8x256xf32> to vector<1x8x256xf32>
    %206 = arith.mulf %200, %205 : vector<1x8x256xf32>
    %cst_92 = arith.constant dense<0.000000e+00> : vector<1xf32>
    %207 = vector.multi_reduction <add>, %206, %cst_92 [1, 2] : vector<1x8x256xf32> to vector<1xf32>
    %208 = vector.shape_cast %207 : vector<1xf32> to vector<1x1x1xf32>
    %c1_93 = arith.constant 1 : index
    %c0_94 = arith.constant 0 : index
    %c0_95 = arith.constant 0 : index
    %c0_96 = arith.constant 0 : index
    %209 = vector.load %arg6[%c1_93, %c0_94, %c0_95, %c0_96] : memref<5x1x8x256xf32, #tpu.memory_space<vmem>>, vector<1x1x8x256xf32>
    %210 = vector.shape_cast %209 : vector<1x1x8x256xf32> to vector<1x8x256xf32>
    %211 = arith.mulf %200, %210 : vector<1x8x256xf32>
    %cst_97 = arith.constant dense<0.000000e+00> : vector<1xf32>
    %212 = vector.multi_reduction <add>, %211, %cst_97 [1, 2] : vector<1x8x256xf32> to vector<1xf32>
    %213 = vector.shape_cast %212 : vector<1xf32> to vector<1x1x1xf32>
    %c2_98 = arith.constant 2 : index
    %c0_99 = arith.constant 0 : index
    %c0_100 = arith.constant 0 : index
    %c0_101 = arith.constant 0 : index
    %214 = vector.load %arg6[%c2_98, %c0_99, %c0_100, %c0_101] : memref<5x1x8x256xf32, #tpu.memory_space<vmem>>, vector<1x1x8x256xf32>
    %215 = vector.shape_cast %214 : vector<1x1x8x256xf32> to vector<1x8x256xf32>
    %216 = arith.mulf %200, %215 : vector<1x8x256xf32>
    %cst_102 = arith.constant dense<0.000000e+00> : vector<1xf32>
    %217 = vector.multi_reduction <add>, %216, %cst_102 [1, 2] : vector<1x8x256xf32> to vector<1xf32>
    %218 = vector.shape_cast %217 : vector<1xf32> to vector<1x1x1xf32>
    %c3 = arith.constant 3 : index
    %c0_103 = arith.constant 0 : index
    %c0_104 = arith.constant 0 : index
    %c0_105 = arith.constant 0 : index
    %219 = vector.load %arg5[%c3, %c0_103, %c0_104, %c0_105] : memref<5x1x8x256xf32, #tpu.memory_space<vmem>>, vector<1x1x8x256xf32>
    %220 = vector.shape_cast %219 : vector<1x1x8x256xf32> to vector<1x8x256xf32>
    %221 = vector.shape_cast %199 : vector<1x8x256xf32> to vector<1x1x8x256xf32>
    tpu.vector_store %arg5[%c3, %c0_103, %c0_104, %c0_105], %221 {strides = array<i32>} : memref<5x1x8x256xf32, #tpu.memory_space<vmem>>, vector<1x1x8x256xf32>,
    %c3_106 = arith.constant 3 : index
    %c0_107 = arith.constant 0 : index
    %c0_108 = arith.constant 0 : index
    %c0_109 = arith.constant 0 : index
    %222 = vector.load %arg6[%c3_106, %c0_107, %c0_108, %c0_109] : memref<5x1x8x256xf32, #tpu.memory_space<vmem>>, vector<1x1x8x256xf32>
    %223 = vector.shape_cast %222 : vector<1x1x8x256xf32> to vector<1x8x256xf32>
    %224 = vector.shape_cast %200 : vector<1x8x256xf32> to vector<1x1x8x256xf32>
    tpu.vector_store %arg6[%c3_106, %c0_107, %c0_108, %c0_109], %224 {strides = array<i32>} : memref<5x1x8x256xf32, #tpu.memory_space<vmem>>, vector<1x1x8x256xf32>,
    %225 = arith.mulf %199, %199 : vector<1x8x256xf32>
    %cst_110 = arith.constant dense<0.000000e+00> : vector<1xf32>
    %226 = vector.multi_reduction <add>, %225, %cst_110 [1, 2] : vector<1x8x256xf32> to vector<1xf32>
    %227 = vector.shape_cast %226 : vector<1xf32> to vector<1x1x1xf32>
    %228 = math.sqrt %203 : vector<1x1x1xf32>
    %229 = math.sqrt %227 : vector<1x1x1xf32>
    %cst_111 = arith.constant 9.99999974E-6 : f32
    %230 = vector.broadcast %cst_111 : f32 to vector<1x1x1xf32>
    %231 = arith.addf %230, %229 : vector<1x1x1xf32>
    %232 = tpu.reciprocal %231 {approx = true} : vector<1x1x1xf32> -> vector<1x1x1xf32>
    %233 = arith.mulf %228, %232 : vector<1x1x1xf32>
    %234 = arith.cmpf olt, %233, %114 : vector<1x1x1xf32>
    %235 = arith.select %234, %233, %114 : vector<1x1x1xi1>, vector<1x1x1xf32>
    %236 = vector.shape_cast %234 : vector<1x1x1xi1> to vector<1x1x1xi1>
    %237 = vector.broadcast %236 : vector<1x1x1xi1> to vector<1x8x256xi1>
    %238 = arith.select %237, %195, %117 : vector<1x8x256xi1>, vector<1x8x256xf32>
    %cst_112 = arith.constant 9.99999974E-5 : f32
    %239 = vector.broadcast %cst_112 : f32 to vector<1x1x1xf32>
    %240 = arith.addf %29, %239 : vector<1x1x1xf32>
    %cst_113 = arith.constant 9.99999974E-5 : f32
    %241 = vector.broadcast %cst_113 : f32 to vector<1x1x1xf32>
    %242 = arith.addf %35, %241 : vector<1x1x1xf32>
    %cst_114 = arith.constant 9.99999974E-5 : f32
    %243 = vector.broadcast %cst_114 : f32 to vector<1x1x1xf32>
    %244 = arith.addf %87, %243 : vector<1x1x1xf32>
    %cst_115 = arith.constant 9.99999974E-5 : f32
    %245 = vector.broadcast %cst_115 : f32 to vector<1x1x1xf32>
    %246 = arith.addf %203, %245 : vector<1x1x1xf32>
    %247 = tpu.reciprocal %240 {approx = true} : vector<1x1x1xf32> -> vector<1x1x1xf32>
    %248 = arith.mulf %240, %247 : vector<1x1x1xf32>
    %cst_116 = arith.constant 2.000000e+00 : f32
    %249 = vector.broadcast %cst_116 : f32 to vector<1x1x1xf32>
    %250 = arith.subf %249, %248 : vector<1x1x1xf32>
    %251 = arith.mulf %247, %250 : vector<1x1x1xf32>
    %252 = arith.mulf %32, %251 : vector<1x1x1xf32>
    %253 = arith.mulf %252, %32 : vector<1x1x1xf32>
    %254 = arith.subf %242, %253 : vector<1x1x1xf32>
    %255 = arith.mulf %252, %92 : vector<1x1x1xf32>
    %256 = arith.subf %97, %255 : vector<1x1x1xf32>
    %257 = arith.mulf %252, %208 : vector<1x1x1xf32>
    %258 = arith.subf %213, %257 : vector<1x1x1xf32>
    %cst_117 = arith.constant 1.000000e+00 : f32
    %259 = vector.broadcast %cst_117 : f32 to vector<1x1x1xf32>
    %260 = arith.mulf %252, %259 : vector<1x1x1xf32>
    %cst_118 = arith.constant 1.000000e+00 : f32
    %261 = vector.broadcast %cst_118 : f32 to vector<1x1x1xf32>
    %262 = arith.subf %261, %260 : vector<1x1x1xf32>
    %263 = arith.mulf %92, %251 : vector<1x1x1xf32>
    %264 = arith.mulf %263, %32 : vector<1x1x1xf32>
    %265 = arith.subf %97, %264 : vector<1x1x1xf32>
    %266 = arith.mulf %263, %92 : vector<1x1x1xf32>
    %267 = arith.subf %244, %266 : vector<1x1x1xf32>
    %268 = arith.mulf %263, %208 : vector<1x1x1xf32>
    %269 = arith.subf %218, %268 : vector<1x1x1xf32>
    %cst_119 = arith.constant 1.000000e+00 : f32
    %270 = vector.broadcast %cst_119 : f32 to vector<1x1x1xf32>
    %271 = arith.mulf %263, %270 : vector<1x1x1xf32>
    %cst_120 = arith.constant 1.000000e+00 : f32
    %272 = vector.broadcast %cst_120 : f32 to vector<1x1x1xf32>
    %273 = arith.subf %272, %271 : vector<1x1x1xf32>
    %274 = arith.mulf %208, %251 : vector<1x1x1xf32>
    %275 = arith.mulf %274, %32 : vector<1x1x1xf32>
    %276 = arith.subf %213, %275 : vector<1x1x1xf32>
    %277 = arith.mulf %274, %92 : vector<1x1x1xf32>
    %278 = arith.subf %218, %277 : vector<1x1x1xf32>
    %279 = arith.mulf %274, %208 : vector<1x1x1xf32>
    %280 = arith.subf %246, %279 : vector<1x1x1xf32>
    %cst_121 = arith.constant 1.000000e+00 : f32
    %281 = vector.broadcast %cst_121 : f32 to vector<1x1x1xf32>
    %282 = arith.mulf %274, %281 : vector<1x1x1xf32>
    %cst_122 = arith.constant 1.000000e+00 : f32
    %283 = vector.broadcast %cst_122 : f32 to vector<1x1x1xf32>
    %284 = arith.subf %283, %282 : vector<1x1x1xf32>
    %285 = tpu.reciprocal %254 {approx = true} : vector<1x1x1xf32> -> vector<1x1x1xf32>
    %286 = arith.mulf %254, %285 : vector<1x1x1xf32>
    %cst_123 = arith.constant 2.000000e+00 : f32
    %287 = vector.broadcast %cst_123 : f32 to vector<1x1x1xf32>
    %288 = arith.subf %287, %286 : vector<1x1x1xf32>
    %289 = arith.mulf %285, %288 : vector<1x1x1xf32>
    %290 = arith.mulf %265, %289 : vector<1x1x1xf32>
    %291 = arith.mulf %290, %256 : vector<1x1x1xf32>
    %292 = arith.subf %267, %291 : vector<1x1x1xf32>
    %293 = arith.mulf %290, %258 : vector<1x1x1xf32>
    %294 = arith.subf %269, %293 : vector<1x1x1xf32>
    %295 = arith.mulf %290, %262 : vector<1x1x1xf32>
    %296 = arith.subf %273, %295 : vector<1x1x1xf32>
    %297 = arith.mulf %276, %289 : vector<1x1x1xf32>
    %298 = arith.mulf %297, %256 : vector<1x1x1xf32>
    %299 = arith.subf %278, %298 : vector<1x1x1xf32>
    %300 = arith.mulf %297, %258 : vector<1x1x1xf32>
    %301 = arith.subf %280, %300 : vector<1x1x1xf32>
    %302 = arith.mulf %297, %262 : vector<1x1x1xf32>
    %303 = arith.subf %284, %302 : vector<1x1x1xf32>
    %304 = tpu.reciprocal %292 {approx = true} : vector<1x1x1xf32> -> vector<1x1x1xf32>
    %305 = arith.mulf %292, %304 : vector<1x1x1xf32>
    %cst_124 = arith.constant 2.000000e+00 : f32
    %306 = vector.broadcast %cst_124 : f32 to vector<1x1x1xf32>
    %307 = arith.subf %306, %305 : vector<1x1x1xf32>
    %308 = arith.mulf %304, %307 : vector<1x1x1xf32>
    %309 = arith.mulf %299, %308 : vector<1x1x1xf32>
    %310 = arith.mulf %309, %294 : vector<1x1x1xf32>
    %311 = arith.subf %301, %310 : vector<1x1x1xf32>
    %312 = arith.mulf %309, %296 : vector<1x1x1xf32>
    %313 = arith.subf %303, %312 : vector<1x1x1xf32>
    %314 = tpu.reciprocal %311 {approx = true} : vector<1x1x1xf32> -> vector<1x1x1xf32>
    %315 = arith.mulf %311, %314 : vector<1x1x1xf32>
    %cst_125 = arith.constant 2.000000e+00 : f32
    %316 = vector.broadcast %cst_125 : f32 to vector<1x1x1xf32>
    %317 = arith.subf %316, %315 : vector<1x1x1xf32>
    %318 = arith.mulf %314, %317 : vector<1x1x1xf32>
    %319 = arith.mulf %313, %318 : vector<1x1x1xf32>
    %320 = arith.mulf %294, %319 : vector<1x1x1xf32>
    %321 = arith.subf %296, %320 : vector<1x1x1xf32>
    %322 = arith.mulf %321, %308 : vector<1x1x1xf32>
    %323 = arith.mulf %256, %322 : vector<1x1x1xf32>
    %324 = arith.subf %262, %323 : vector<1x1x1xf32>
    %325 = arith.mulf %258, %319 : vector<1x1x1xf32>
    %326 = arith.subf %324, %325 : vector<1x1x1xf32>
    %327 = arith.mulf %326, %289 : vector<1x1x1xf32>
    %328 = arith.mulf %32, %327 : vector<1x1x1xf32>
    %cst_126 = arith.constant 1.000000e+00 : f32
    %329 = vector.broadcast %cst_126 : f32 to vector<1x1x1xf32>
    %330 = arith.subf %329, %328 : vector<1x1x1xf32>
    %331 = arith.mulf %92, %322 : vector<1x1x1xf32>
    %332 = arith.subf %330, %331 : vector<1x1x1xf32>
    %333 = arith.mulf %208, %319 : vector<1x1x1xf32>
    %334 = arith.subf %332, %333 : vector<1x1x1xf32>
    %335 = arith.mulf %334, %251 : vector<1x1x1xf32>
    %336 = arith.addf %335, %327 : vector<1x1x1xf32>
    %337 = arith.addf %336, %322 : vector<1x1x1xf32>
    %338 = arith.addf %337, %319 : vector<1x1x1xf32>
    %339 = tpu.reciprocal %338 {approx = true} : vector<1x1x1xf32> -> vector<1x1x1xf32>
    %340 = arith.mulf %338, %339 : vector<1x1x1xf32>
    %cst_127 = arith.constant 2.000000e+00 : f32
    %341 = vector.broadcast %cst_127 : f32 to vector<1x1x1xf32>
    %342 = arith.subf %341, %340 : vector<1x1x1xf32>
    %343 = arith.mulf %339, %342 : vector<1x1x1xf32>
    %344 = arith.mulf %335, %343 : vector<1x1x1xf32>
    %345 = arith.mulf %327, %343 : vector<1x1x1xf32>
    %346 = arith.mulf %322, %343 : vector<1x1x1xf32>
    %347 = arith.mulf %319, %343 : vector<1x1x1xf32>
    %c0_128 = arith.constant 0 : index
    %c0_129 = arith.constant 0 : index
    %c0_130 = arith.constant 0 : index
    %c0_131 = arith.constant 0 : index
    %348 = vector.load %arg5[%c0_128, %c0_129, %c0_130, %c0_131] : memref<5x1x8x256xf32, #tpu.memory_space<vmem>>, vector<1x1x8x256xf32>
    %349 = vector.shape_cast %348 : vector<1x1x8x256xf32> to vector<1x8x256xf32>
    %350 = vector.broadcast %344 : vector<1x1x1xf32> to vector<1x8x256xf32>
    %351 = arith.mulf %350, %349 : vector<1x8x256xf32>
    %c1_132 = arith.constant 1 : index
    %c0_133 = arith.constant 0 : index
    %c0_134 = arith.constant 0 : index
    %c0_135 = arith.constant 0 : index
    %352 = vector.load %arg5[%c1_132, %c0_133, %c0_134, %c0_135] : memref<5x1x8x256xf32, #tpu.memory_space<vmem>>, vector<1x1x8x256xf32>
    %353 = vector.shape_cast %352 : vector<1x1x8x256xf32> to vector<1x8x256xf32>
    %354 = vector.broadcast %345 : vector<1x1x1xf32> to vector<1x8x256xf32>
    %355 = arith.mulf %354, %353 : vector<1x8x256xf32>
    %356 = arith.addf %351, %355 : vector<1x8x256xf32>
    %c2_136 = arith.constant 2 : index
    %c0_137 = arith.constant 0 : index
    %c0_138 = arith.constant 0 : index
    %c0_139 = arith.constant 0 : index
    %357 = vector.load %arg5[%c2_136, %c0_137, %c0_138, %c0_139] : memref<5x1x8x256xf32, #tpu.memory_space<vmem>>, vector<1x1x8x256xf32>
    %358 = vector.shape_cast %357 : vector<1x1x8x256xf32> to vector<1x8x256xf32>
    %359 = vector.broadcast %346 : vector<1x1x1xf32> to vector<1x8x256xf32>
    %360 = arith.mulf %359, %358 : vector<1x8x256xf32>
    %361 = arith.addf %356, %360 : vector<1x8x256xf32>
    %c3_140 = arith.constant 3 : index
    %c0_141 = arith.constant 0 : index
    %c0_142 = arith.constant 0 : index
    %c0_143 = arith.constant 0 : index
    %362 = vector.load %arg5[%c3_140, %c0_141, %c0_142, %c0_143] : memref<5x1x8x256xf32, #tpu.memory_space<vmem>>, vector<1x1x8x256xf32>
    %363 = vector.shape_cast %362 : vector<1x1x8x256xf32> to vector<1x8x256xf32>
    %364 = vector.broadcast %347 : vector<1x1x1xf32> to vector<1x8x256xf32>
    %365 = arith.mulf %364, %363 : vector<1x8x256xf32>
    %366 = arith.addf %361, %365 : vector<1x8x256xf32>
    %367 = vector.shape_cast %366 : vector<1x8x256xf32> to vector<8x256xf32>
    %cst_144 = arith.constant dense<0.000000e+00> : vector<8x256xf32>
    %368 = tpu.matmul %2, %367, %cst_144 {dimension_numbers = #tpu.dot_dimension_numbers<[1], [0], [0], [1], [0, 0, 1, 1], [], []>} : vector<8x8xf32>, vector<8x256xf32>, vector<8x256xf32> -> vector<8x256xf32>
    %369 = vector.shape_cast %368 : vector<8x256xf32> to vector<1x8x256xf32>
    %370 = arith.addf %4, %369 : vector<1x8x256xf32>
    %371 = arith.subf %370, %366 : vector<1x8x256xf32>
    %372 = arith.mulf %371, %371 : vector<1x8x256xf32>
    %cst_145 = arith.constant dense<0.000000e+00> : vector<1xf32>
    %373 = vector.multi_reduction <add>, %372, %cst_145 [1, 2] : vector<1x8x256xf32> to vector<1xf32>
    %374 = vector.shape_cast %373 : vector<1xf32> to vector<1x1x1xf32>
    %c0_146 = arith.constant 0 : index
    %c0_147 = arith.constant 0 : index
    %c0_148 = arith.constant 0 : index
    %c0_149 = arith.constant 0 : index
    %375 = vector.load %arg6[%c0_146, %c0_147, %c0_148, %c0_149] : memref<5x1x8x256xf32, #tpu.memory_space<vmem>>, vector<1x1x8x256xf32>
    %376 = vector.shape_cast %375 : vector<1x1x8x256xf32> to vector<1x8x256xf32>
    %377 = arith.mulf %371, %376 : vector<1x8x256xf32>
    %cst_150 = arith.constant dense<0.000000e+00> : vector<1xf32>
    %378 = vector.multi_reduction <add>, %377, %cst_150 [1, 2] : vector<1x8x256xf32> to vector<1xf32>
    %379 = vector.shape_cast %378 : vector<1xf32> to vector<1x1x1xf32>
    %c1_151 = arith.constant 1 : index
    %c0_152 = arith.constant 0 : index
    %c0_153 = arith.constant 0 : index
    %c0_154 = arith.constant 0 : index
    %380 = vector.load %arg6[%c1_151, %c0_152, %c0_153, %c0_154] : memref<5x1x8x256xf32, #tpu.memory_space<vmem>>, vector<1x1x8x256xf32>
    %381 = vector.shape_cast %380 : vector<1x1x8x256xf32> to vector<1x8x256xf32>
    %382 = arith.mulf %371, %381 : vector<1x8x256xf32>
    %cst_155 = arith.constant dense<0.000000e+00> : vector<1xf32>
    %383 = vector.multi_reduction <add>, %382, %cst_155 [1, 2] : vector<1x8x256xf32> to vector<1xf32>
    %384 = vector.shape_cast %383 : vector<1xf32> to vector<1x1x1xf32>
    %c2_156 = arith.constant 2 : index
    %c0_157 = arith.constant 0 : index
    %c0_158 = arith.constant 0 : index
    %c0_159 = arith.constant 0 : index
    %385 = vector.load %arg6[%c2_156, %c0_157, %c0_158, %c0_159] : memref<5x1x8x256xf32, #tpu.memory_space<vmem>>, vector<1x1x8x256xf32>
    %386 = vector.shape_cast %385 : vector<1x1x8x256xf32> to vector<1x8x256xf32>
    %387 = arith.mulf %371, %386 : vector<1x8x256xf32>
    %cst_160 = arith.constant dense<0.000000e+00> : vector<1xf32>
    %388 = vector.multi_reduction <add>, %387, %cst_160 [1, 2] : vector<1x8x256xf32> to vector<1xf32>
    %389 = vector.shape_cast %388 : vector<1xf32> to vector<1x1x1xf32>
    %c3_161 = arith.constant 3 : index
    %c0_162 = arith.constant 0 : index
    %c0_163 = arith.constant 0 : index
    %c0_164 = arith.constant 0 : index
    %390 = vector.load %arg6[%c3_161, %c0_162, %c0_163, %c0_164] : memref<5x1x8x256xf32, #tpu.memory_space<vmem>>, vector<1x1x8x256xf32>
    %391 = vector.shape_cast %390 : vector<1x1x8x256xf32> to vector<1x8x256xf32>
    %392 = arith.mulf %371, %391 : vector<1x8x256xf32>
    %cst_165 = arith.constant dense<0.000000e+00> : vector<1xf32>
    %393 = vector.multi_reduction <add>, %392, %cst_165 [1, 2] : vector<1x8x256xf32> to vector<1xf32>
    %394 = vector.shape_cast %393 : vector<1xf32> to vector<1x1x1xf32>
    %c4 = arith.constant 4 : index
    %c0_166 = arith.constant 0 : index
    %c0_167 = arith.constant 0 : index
    %c0_168 = arith.constant 0 : index
    %395 = vector.load %arg5[%c4, %c0_166, %c0_167, %c0_168] : memref<5x1x8x256xf32, #tpu.memory_space<vmem>>, vector<1x1x8x256xf32>
    %396 = vector.shape_cast %395 : vector<1x1x8x256xf32> to vector<1x8x256xf32>
    %397 = vector.shape_cast %370 : vector<1x8x256xf32> to vector<1x1x8x256xf32>
    tpu.vector_store %arg5[%c4, %c0_166, %c0_167, %c0_168], %397 {strides = array<i32>} : memref<5x1x8x256xf32, #tpu.memory_space<vmem>>, vector<1x1x8x256xf32>,
    %c4_169 = arith.constant 4 : index
    %c0_170 = arith.constant 0 : index
    %c0_171 = arith.constant 0 : index
    %c0_172 = arith.constant 0 : index
    %398 = vector.load %arg6[%c4_169, %c0_170, %c0_171, %c0_172] : memref<5x1x8x256xf32, #tpu.memory_space<vmem>>, vector<1x1x8x256xf32>
    %399 = vector.shape_cast %398 : vector<1x1x8x256xf32> to vector<1x8x256xf32>
    %400 = vector.shape_cast %371 : vector<1x8x256xf32> to vector<1x1x8x256xf32>
    tpu.vector_store %arg6[%c4_169, %c0_170, %c0_171, %c0_172], %400 {strides = array<i32>} : memref<5x1x8x256xf32, #tpu.memory_space<vmem>>, vector<1x1x8x256xf32>,
    %401 = arith.mulf %370, %370 : vector<1x8x256xf32>
    %cst_173 = arith.constant dense<0.000000e+00> : vector<1xf32>
    %402 = vector.multi_reduction <add>, %401, %cst_173 [1, 2] : vector<1x8x256xf32> to vector<1xf32>
    %403 = vector.shape_cast %402 : vector<1xf32> to vector<1x1x1xf32>
    %404 = math.sqrt %374 : vector<1x1x1xf32>
    %405 = math.sqrt %403 : vector<1x1x1xf32>
    %cst_174 = arith.constant 9.99999974E-6 : f32
    %406 = vector.broadcast %cst_174 : f32 to vector<1x1x1xf32>
    %407 = arith.addf %406, %405 : vector<1x1x1xf32>
    %408 = tpu.reciprocal %407 {approx = true} : vector<1x1x1xf32> -> vector<1x1x1xf32>
    %409 = arith.mulf %404, %408 : vector<1x1x1xf32>
    %410 = arith.cmpf olt, %409, %235 : vector<1x1x1xf32>
    %411 = arith.select %410, %409, %235 : vector<1x1x1xi1>, vector<1x1x1xf32>
    %412 = vector.shape_cast %410 : vector<1x1x1xi1> to vector<1x1x1xi1>
    %413 = vector.broadcast %412 : vector<1x1x1xi1> to vector<1x8x256xi1>
    %414 = arith.select %413, %366, %238 : vector<1x8x256xi1>, vector<1x8x256xf32>
    %c0_i32 = arith.constant 0 : i32
    %c7_i32 = arith.constant 7 : i32
    %415 = arith.addi %c0_i32, %c7_i32 : i32
    %c1_i32 = arith.constant 1 : i32
    %416:17 = scf.for %arg7 = %c0_i32 to %415 step %c1_i32 iter_args(%arg8 = %29, %arg9 = %32, %arg10 = %92, %arg11 = %208, %arg12 = %379, %arg13 = %35, %arg14 = %97, %arg15 = %213, %arg16 = %384, %arg17 = %87, %arg18 = %218, %arg19 = %389, %arg20 = %203, %arg21 = %394, %arg22 = %374, %arg23 = %411, %arg24 = %414) -> (vector<1x1x1xf32>, vector<1x1x1xf32>, vector<1x1x1xf32>, vector<1x1x1xf32>, vector<1x1x1xf32>, vector<1x1x1xf32>, vector<1x1x1xf32>, vector<1x1x1xf32>, vector<1x1x1xf32>, vector<1x1x1xf32>, vector<1x1x1xf32>, vector<1x1x1xf32>, vector<1x1x1xf32>, vector<1x1x1xf32>, vector<1x1x1xf32>, vector<1x1x1xf32>, vector<1x8x256xf32>)  : i32 {
      %cst_178 = arith.constant 9.99999974E-5 : f32
      %418 = vector.broadcast %cst_178 : f32 to vector<1x1x1xf32>
      %419 = arith.addf %arg8, %418 : vector<1x1x1xf32>
      %cst_179 = arith.constant 9.99999974E-5 : f32
      %420 = vector.broadcast %cst_179 : f32 to vector<1x1x1xf32>
      %421 = arith.addf %arg13, %420 : vector<1x1x1xf32>
      %cst_180 = arith.constant 9.99999974E-5 : f32
      %422 = vector.broadcast %cst_180 : f32 to vector<1x1x1xf32>
      %423 = arith.addf %arg17, %422 : vector<1x1x1xf32>
      %cst_181 = arith.constant 9.99999974E-5 : f32
      %424 = vector.broadcast %cst_181 : f32 to vector<1x1x1xf32>
      %425 = arith.addf %arg20, %424 : vector<1x1x1xf32>
      %cst_182 = arith.constant 9.99999974E-5 : f32
      %426 = vector.broadcast %cst_182 : f32 to vector<1x1x1xf32>
      %427 = arith.addf %arg22, %426 : vector<1x1x1xf32>
      %428 = tpu.reciprocal %419 {approx = true} : vector<1x1x1xf32> -> vector<1x1x1xf32>
      %429 = arith.mulf %419, %428 : vector<1x1x1xf32>
      %cst_183 = arith.constant 2.000000e+00 : f32
      %430 = vector.broadcast %cst_183 : f32 to vector<1x1x1xf32>
      %431 = arith.subf %430, %429 : vector<1x1x1xf32>
      %432 = arith.mulf %428, %431 : vector<1x1x1xf32>
      %433 = arith.mulf %arg9, %432 : vector<1x1x1xf32>
      %434 = arith.mulf %433, %arg9 : vector<1x1x1xf32>
      %435 = arith.subf %421, %434 : vector<1x1x1xf32>
      %436 = arith.mulf %433, %arg10 : vector<1x1x1xf32>
      %437 = arith.subf %arg14, %436 : vector<1x1x1xf32>
      %438 = arith.mulf %433, %arg11 : vector<1x1x1xf32>
      %439 = arith.subf %arg15, %438 : vector<1x1x1xf32>
      %440 = arith.mulf %433, %arg12 : vector<1x1x1xf32>
      %441 = arith.subf %arg16, %440 : vector<1x1x1xf32>
      %cst_184 = arith.constant 1.000000e+00 : f32
      %442 = vector.broadcast %cst_184 : f32 to vector<1x1x1xf32>
      %443 = arith.mulf %433, %442 : vector<1x1x1xf32>
      %cst_185 = arith.constant 1.000000e+00 : f32
      %444 = vector.broadcast %cst_185 : f32 to vector<1x1x1xf32>
      %445 = arith.subf %444, %443 : vector<1x1x1xf32>
      %446 = arith.mulf %arg10, %432 : vector<1x1x1xf32>
      %447 = arith.mulf %446, %arg9 : vector<1x1x1xf32>
      %448 = arith.subf %arg14, %447 : vector<1x1x1xf32>
      %449 = arith.mulf %446, %arg10 : vector<1x1x1xf32>
      %450 = arith.subf %423, %449 : vector<1x1x1xf32>
      %451 = arith.mulf %446, %arg11 : vector<1x1x1xf32>
      %452 = arith.subf %arg18, %451 : vector<1x1x1xf32>
      %453 = arith.mulf %446, %arg12 : vector<1x1x1xf32>
      %454 = arith.subf %arg19, %453 : vector<1x1x1xf32>
      %cst_186 = arith.constant 1.000000e+00 : f32
      %455 = vector.broadcast %cst_186 : f32 to vector<1x1x1xf32>
      %456 = arith.mulf %446, %455 : vector<1x1x1xf32>
      %cst_187 = arith.constant 1.000000e+00 : f32
      %457 = vector.broadcast %cst_187 : f32 to vector<1x1x1xf32>
      %458 = arith.subf %457, %456 : vector<1x1x1xf32>
      %459 = arith.mulf %arg11, %432 : vector<1x1x1xf32>
      %460 = arith.mulf %459, %arg9 : vector<1x1x1xf32>
      %461 = arith.subf %arg15, %460 : vector<1x1x1xf32>
      %462 = arith.mulf %459, %arg10 : vector<1x1x1xf32>
      %463 = arith.subf %arg18, %462 : vector<1x1x1xf32>
      %464 = arith.mulf %459, %arg11 : vector<1x1x1xf32>
      %465 = arith.subf %425, %464 : vector<1x1x1xf32>
      %466 = arith.mulf %459, %arg12 : vector<1x1x1xf32>
      %467 = arith.subf %arg21, %466 : vector<1x1x1xf32>
      %cst_188 = arith.constant 1.000000e+00 : f32
      %468 = vector.broadcast %cst_188 : f32 to vector<1x1x1xf32>
      %469 = arith.mulf %459, %468 : vector<1x1x1xf32>
      %cst_189 = arith.constant 1.000000e+00 : f32
      %470 = vector.broadcast %cst_189 : f32 to vector<1x1x1xf32>
      %471 = arith.subf %470, %469 : vector<1x1x1xf32>
      %472 = arith.mulf %arg12, %432 : vector<1x1x1xf32>
      %473 = arith.mulf %472, %arg9 : vector<1x1x1xf32>
      %474 = arith.subf %arg16, %473 : vector<1x1x1xf32>
      %475 = arith.mulf %472, %arg10 : vector<1x1x1xf32>
      %476 = arith.subf %arg19, %475 : vector<1x1x1xf32>
      %477 = arith.mulf %472, %arg11 : vector<1x1x1xf32>
      %478 = arith.subf %arg21, %477 : vector<1x1x1xf32>
      %479 = arith.mulf %472, %arg12 : vector<1x1x1xf32>
      %480 = arith.subf %427, %479 : vector<1x1x1xf32>
      %cst_190 = arith.constant 1.000000e+00 : f32
      %481 = vector.broadcast %cst_190 : f32 to vector<1x1x1xf32>
      %482 = arith.mulf %472, %481 : vector<1x1x1xf32>
      %cst_191 = arith.constant 1.000000e+00 : f32
      %483 = vector.broadcast %cst_191 : f32 to vector<1x1x1xf32>
      %484 = arith.subf %483, %482 : vector<1x1x1xf32>
      %485 = tpu.reciprocal %435 {approx = true} : vector<1x1x1xf32> -> vector<1x1x1xf32>
      %486 = arith.mulf %435, %485 : vector<1x1x1xf32>
      %cst_192 = arith.constant 2.000000e+00 : f32
      %487 = vector.broadcast %cst_192 : f32 to vector<1x1x1xf32>
      %488 = arith.subf %487, %486 : vector<1x1x1xf32>
      %489 = arith.mulf %485, %488 : vector<1x1x1xf32>
      %490 = arith.mulf %448, %489 : vector<1x1x1xf32>
      %491 = arith.mulf %490, %437 : vector<1x1x1xf32>
      %492 = arith.subf %450, %491 : vector<1x1x1xf32>
      %493 = arith.mulf %490, %439 : vector<1x1x1xf32>
      %494 = arith.subf %452, %493 : vector<1x1x1xf32>
      %495 = arith.mulf %490, %441 : vector<1x1x1xf32>
      %496 = arith.subf %454, %495 : vector<1x1x1xf32>
      %497 = arith.mulf %490, %445 : vector<1x1x1xf32>
      %498 = arith.subf %458, %497 : vector<1x1x1xf32>
      %499 = arith.mulf %461, %489 : vector<1x1x1xf32>
      %500 = arith.mulf %499, %437 : vector<1x1x1xf32>
      %501 = arith.subf %463, %500 : vector<1x1x1xf32>
      %502 = arith.mulf %499, %439 : vector<1x1x1xf32>
      %503 = arith.subf %465, %502 : vector<1x1x1xf32>
      %504 = arith.mulf %499, %441 : vector<1x1x1xf32>
      %505 = arith.subf %467, %504 : vector<1x1x1xf32>
      %506 = arith.mulf %499, %445 : vector<1x1x1xf32>
      %507 = arith.subf %471, %506 : vector<1x1x1xf32>
      %508 = arith.mulf %474, %489 : vector<1x1x1xf32>
      %509 = arith.mulf %508, %437 : vector<1x1x1xf32>
      %510 = arith.subf %476, %509 : vector<1x1x1xf32>
      %511 = arith.mulf %508, %439 : vector<1x1x1xf32>
      %512 = arith.subf %478, %511 : vector<1x1x1xf32>
      %513 = arith.mulf %508, %441 : vector<1x1x1xf32>
      %514 = arith.subf %480, %513 : vector<1x1x1xf32>
      %515 = arith.mulf %508, %445 : vector<1x1x1xf32>
      %516 = arith.subf %484, %515 : vector<1x1x1xf32>
      %517 = tpu.reciprocal %492 {approx = true} : vector<1x1x1xf32> -> vector<1x1x1xf32>
      %518 = arith.mulf %492, %517 : vector<1x1x1xf32>
      %cst_193 = arith.constant 2.000000e+00 : f32
      %519 = vector.broadcast %cst_193 : f32 to vector<1x1x1xf32>
      %520 = arith.subf %519, %518 : vector<1x1x1xf32>
      %521 = arith.mulf %517, %520 : vector<1x1x1xf32>
      %522 = arith.mulf %501, %521 : vector<1x1x1xf32>
      %523 = arith.mulf %522, %494 : vector<1x1x1xf32>
      %524 = arith.subf %503, %523 : vector<1x1x1xf32>
      %525 = arith.mulf %522, %496 : vector<1x1x1xf32>
      %526 = arith.subf %505, %525 : vector<1x1x1xf32>
      %527 = arith.mulf %522, %498 : vector<1x1x1xf32>
      %528 = arith.subf %507, %527 : vector<1x1x1xf32>
      %529 = arith.mulf %510, %521 : vector<1x1x1xf32>
      %530 = arith.mulf %529, %494 : vector<1x1x1xf32>
      %531 = arith.subf %512, %530 : vector<1x1x1xf32>
      %532 = arith.mulf %529, %496 : vector<1x1x1xf32>
      %533 = arith.subf %514, %532 : vector<1x1x1xf32>
      %534 = arith.mulf %529, %498 : vector<1x1x1xf32>
      %535 = arith.subf %516, %534 : vector<1x1x1xf32>
      %536 = tpu.reciprocal %524 {approx = true} : vector<1x1x1xf32> -> vector<1x1x1xf32>
      %537 = arith.mulf %524, %536 : vector<1x1x1xf32>
      %cst_194 = arith.constant 2.000000e+00 : f32
      %538 = vector.broadcast %cst_194 : f32 to vector<1x1x1xf32>
      %539 = arith.subf %538, %537 : vector<1x1x1xf32>
      %540 = arith.mulf %536, %539 : vector<1x1x1xf32>
      %541 = arith.mulf %531, %540 : vector<1x1x1xf32>
      %542 = arith.mulf %541, %526 : vector<1x1x1xf32>
      %543 = arith.subf %533, %542 : vector<1x1x1xf32>
      %544 = arith.mulf %541, %528 : vector<1x1x1xf32>
      %545 = arith.subf %535, %544 : vector<1x1x1xf32>
      %546 = tpu.reciprocal %543 {approx = true} : vector<1x1x1xf32> -> vector<1x1x1xf32>
      %547 = arith.mulf %543, %546 : vector<1x1x1xf32>
      %cst_195 = arith.constant 2.000000e+00 : f32
      %548 = vector.broadcast %cst_195 : f32 to vector<1x1x1xf32>
      %549 = arith.subf %548, %547 : vector<1x1x1xf32>
      %550 = arith.mulf %546, %549 : vector<1x1x1xf32>
      %551 = arith.mulf %545, %550 : vector<1x1x1xf32>
      %552 = arith.mulf %526, %551 : vector<1x1x1xf32>
      %553 = arith.subf %528, %552 : vector<1x1x1xf32>
      %554 = arith.mulf %553, %540 : vector<1x1x1xf32>
      %555 = arith.mulf %494, %554 : vector<1x1x1xf32>
      %556 = arith.subf %498, %555 : vector<1x1x1xf32>
      %557 = arith.mulf %496, %551 : vector<1x1x1xf32>
      %558 = arith.subf %556, %557 : vector<1x1x1xf32>
      %559 = arith.mulf %558, %521 : vector<1x1x1xf32>
      %560 = arith.mulf %437, %559 : vector<1x1x1xf32>
      %561 = arith.subf %445, %560 : vector<1x1x1xf32>
      %562 = arith.mulf %439, %554 : vector<1x1x1xf32>
      %563 = arith.subf %561, %562 : vector<1x1x1xf32>
      %564 = arith.mulf %441, %551 : vector<1x1x1xf32>
      %565 = arith.subf %563, %564 : vector<1x1x1xf32>
      %566 = arith.mulf %565, %489 : vector<1x1x1xf32>
      %567 = arith.mulf %arg9, %566 : vector<1x1x1xf32>
      %cst_196 = arith.constant 1.000000e+00 : f32
      %568 = vector.broadcast %cst_196 : f32 to vector<1x1x1xf32>
      %569 = arith.subf %568, %567 : vector<1x1x1xf32>
      %570 = arith.mulf %arg10, %559 : vector<1x1x1xf32>
      %571 = arith.subf %569, %570 : vector<1x1x1xf32>
      %572 = arith.mulf %arg11, %554 : vector<1x1x1xf32>
      %573 = arith.subf %571, %572 : vector<1x1x1xf32>
      %574 = arith.mulf %arg12, %551 : vector<1x1x1xf32>
      %575 = arith.subf %573, %574 : vector<1x1x1xf32>
      %576 = arith.mulf %575, %432 : vector<1x1x1xf32>
      %577 = arith.addf %576, %566 : vector<1x1x1xf32>
      %578 = arith.addf %577, %559 : vector<1x1x1xf32>
      %579 = arith.addf %578, %554 : vector<1x1x1xf32>
      %580 = arith.addf %579, %551 : vector<1x1x1xf32>
      %581 = tpu.reciprocal %580 {approx = true} : vector<1x1x1xf32> -> vector<1x1x1xf32>
      %582 = arith.mulf %580, %581 : vector<1x1x1xf32>
      %cst_197 = arith.constant 2.000000e+00 : f32
      %583 = vector.broadcast %cst_197 : f32 to vector<1x1x1xf32>
      %584 = arith.subf %583, %582 : vector<1x1x1xf32>
      %585 = arith.mulf %581, %584 : vector<1x1x1xf32>
      %586 = arith.mulf %576, %585 : vector<1x1x1xf32>
      %587 = arith.mulf %566, %585 : vector<1x1x1xf32>
      %588 = arith.mulf %559, %585 : vector<1x1x1xf32>
      %589 = arith.mulf %554, %585 : vector<1x1x1xf32>
      %590 = arith.mulf %551, %585 : vector<1x1x1xf32>
      %c0_198 = arith.constant 0 : index
      %c0_199 = arith.constant 0 : index
      %c0_200 = arith.constant 0 : index
      %c0_201 = arith.constant 0 : index
      %591 = vector.load %arg5[%c0_198, %c0_199, %c0_200, %c0_201] : memref<5x1x8x256xf32, #tpu.memory_space<vmem>>, vector<1x1x8x256xf32>
      %592 = vector.shape_cast %591 : vector<1x1x8x256xf32> to vector<1x8x256xf32>
      %593 = vector.broadcast %586 : vector<1x1x1xf32> to vector<1x8x256xf32>
      %594 = arith.mulf %593, %592 : vector<1x8x256xf32>
      %c1_202 = arith.constant 1 : index
      %c0_203 = arith.constant 0 : index
      %c0_204 = arith.constant 0 : index
      %c0_205 = arith.constant 0 : index
      %595 = vector.load %arg5[%c1_202, %c0_203, %c0_204, %c0_205] : memref<5x1x8x256xf32, #tpu.memory_space<vmem>>, vector<1x1x8x256xf32>
      %596 = vector.shape_cast %595 : vector<1x1x8x256xf32> to vector<1x8x256xf32>
      %597 = vector.broadcast %587 : vector<1x1x1xf32> to vector<1x8x256xf32>
      %598 = arith.mulf %597, %596 : vector<1x8x256xf32>
      %599 = arith.addf %594, %598 : vector<1x8x256xf32>
      %c2_206 = arith.constant 2 : index
      %c0_207 = arith.constant 0 : index
      %c0_208 = arith.constant 0 : index
      %c0_209 = arith.constant 0 : index
      %600 = vector.load %arg5[%c2_206, %c0_207, %c0_208, %c0_209] : memref<5x1x8x256xf32, #tpu.memory_space<vmem>>, vector<1x1x8x256xf32>
      %601 = vector.shape_cast %600 : vector<1x1x8x256xf32> to vector<1x8x256xf32>
      %602 = vector.broadcast %588 : vector<1x1x1xf32> to vector<1x8x256xf32>
      %603 = arith.mulf %602, %601 : vector<1x8x256xf32>
      %604 = arith.addf %599, %603 : vector<1x8x256xf32>
      %c3_210 = arith.constant 3 : index
      %c0_211 = arith.constant 0 : index
      %c0_212 = arith.constant 0 : index
      %c0_213 = arith.constant 0 : index
      %605 = vector.load %arg5[%c3_210, %c0_211, %c0_212, %c0_213] : memref<5x1x8x256xf32, #tpu.memory_space<vmem>>, vector<1x1x8x256xf32>
      %606 = vector.shape_cast %605 : vector<1x1x8x256xf32> to vector<1x8x256xf32>
      %607 = vector.broadcast %589 : vector<1x1x1xf32> to vector<1x8x256xf32>
      %608 = arith.mulf %607, %606 : vector<1x8x256xf32>
      %609 = arith.addf %604, %608 : vector<1x8x256xf32>
      %c4_214 = arith.constant 4 : index
      %c0_215 = arith.constant 0 : index
      %c0_216 = arith.constant 0 : index
      %c0_217 = arith.constant 0 : index
      %610 = vector.load %arg5[%c4_214, %c0_215, %c0_216, %c0_217] : memref<5x1x8x256xf32, #tpu.memory_space<vmem>>, vector<1x1x8x256xf32>
      %611 = vector.shape_cast %610 : vector<1x1x8x256xf32> to vector<1x8x256xf32>
      %612 = vector.broadcast %590 : vector<1x1x1xf32> to vector<1x8x256xf32>
      %613 = arith.mulf %612, %611 : vector<1x8x256xf32>
      %614 = arith.addf %609, %613 : vector<1x8x256xf32>
      %615 = vector.shape_cast %614 : vector<1x8x256xf32> to vector<8x256xf32>
      %cst_218 = arith.constant dense<0.000000e+00> : vector<8x256xf32>
      %616 = tpu.matmul %2, %615, %cst_218 {dimension_numbers = #tpu.dot_dimension_numbers<[1], [0], [0], [1], [0, 0, 1, 1], [], []>} : vector<8x8xf32>, vector<8x256xf32>, vector<8x256xf32> -> vector<8x256xf32>
      %617 = vector.shape_cast %616 : vector<8x256xf32> to vector<1x8x256xf32>
      %618 = arith.addf %4, %617 : vector<1x8x256xf32>
      %619 = arith.subf %618, %614 : vector<1x8x256xf32>
      %620 = arith.mulf %619, %619 : vector<1x8x256xf32>
      %cst_219 = arith.constant dense<0.000000e+00> : vector<1xf32>
      %621 = vector.multi_reduction <add>, %620, %cst_219 [1, 2] : vector<1x8x256xf32> to vector<1xf32>
      %622 = vector.shape_cast %621 : vector<1xf32> to vector<1x1x1xf32>
      %c1_220 = arith.constant 1 : index
      %c0_221 = arith.constant 0 : index
      %c0_222 = arith.constant 0 : index
      %c0_223 = arith.constant 0 : index
      %623 = vector.load %arg6[%c1_220, %c0_221, %c0_222, %c0_223] : memref<5x1x8x256xf32, #tpu.memory_space<vmem>>, vector<1x1x8x256xf32>
      %624 = vector.shape_cast %623 : vector<1x1x8x256xf32> to vector<1x8x256xf32>
      %625 = arith.mulf %619, %624 : vector<1x8x256xf32>
      %cst_224 = arith.constant dense<0.000000e+00> : vector<1xf32>
      %626 = vector.multi_reduction <add>, %625, %cst_224 [1, 2] : vector<1x8x256xf32> to vector<1xf32>
      %627 = vector.shape_cast %626 : vector<1xf32> to vector<1x1x1xf32>
      %c2_225 = arith.constant 2 : index
      %c0_226 = arith.constant 0 : index
      %c0_227 = arith.constant 0 : index
      %c0_228 = arith.constant 0 : index
      %628 = vector.load %arg6[%c2_225, %c0_226, %c0_227, %c0_228] : memref<5x1x8x256xf32, #tpu.memory_space<vmem>>, vector<1x1x8x256xf32>
      %629 = vector.shape_cast %628 : vector<1x1x8x256xf32> to vector<1x8x256xf32>
      %630 = arith.mulf %619, %629 : vector<1x8x256xf32>
      %cst_229 = arith.constant dense<0.000000e+00> : vector<1xf32>
      %631 = vector.multi_reduction <add>, %630, %cst_229 [1, 2] : vector<1x8x256xf32> to vector<1xf32>
      %632 = vector.shape_cast %631 : vector<1xf32> to vector<1x1x1xf32>
      %c3_230 = arith.constant 3 : index
      %c0_231 = arith.constant 0 : index
      %c0_232 = arith.constant 0 : index
      %c0_233 = arith.constant 0 : index
      %633 = vector.load %arg6[%c3_230, %c0_231, %c0_232, %c0_233] : memref<5x1x8x256xf32, #tpu.memory_space<vmem>>, vector<1x1x8x256xf32>
      %634 = vector.shape_cast %633 : vector<1x1x8x256xf32> to vector<1x8x256xf32>
      %635 = arith.mulf %619, %634 : vector<1x8x256xf32>
      %cst_234 = arith.constant dense<0.000000e+00> : vector<1xf32>
      %636 = vector.multi_reduction <add>, %635, %cst_234 [1, 2] : vector<1x8x256xf32> to vector<1xf32>
      %637 = vector.shape_cast %636 : vector<1xf32> to vector<1x1x1xf32>
      %c4_235 = arith.constant 4 : index
      %c0_236 = arith.constant 0 : index
      %c0_237 = arith.constant 0 : index
      %c0_238 = arith.constant 0 : index
      %638 = vector.load %arg6[%c4_235, %c0_236, %c0_237, %c0_238] : memref<5x1x8x256xf32, #tpu.memory_space<vmem>>, vector<1x1x8x256xf32>
      %639 = vector.shape_cast %638 : vector<1x1x8x256xf32> to vector<1x8x256xf32>
      %640 = arith.mulf %619, %639 : vector<1x8x256xf32>
      %cst_239 = arith.constant dense<0.000000e+00> : vector<1xf32>
      %641 = vector.multi_reduction <add>, %640, %cst_239 [1, 2] : vector<1x8x256xf32> to vector<1xf32>
      %642 = vector.shape_cast %641 : vector<1xf32> to vector<1x1x1xf32>
      %c0_240 = arith.constant 0 : index
      %c0_241 = arith.constant 0 : index
      %c0_242 = arith.constant 0 : index
      %c0_243 = arith.constant 0 : index
      %643 = vector.load %arg5[%c0_240, %c0_241, %c0_242, %c0_243] : memref<5x1x8x256xf32, #tpu.memory_space<vmem>>, vector<1x1x8x256xf32>
      %644 = vector.shape_cast %643 : vector<1x1x8x256xf32> to vector<1x8x256xf32>
      %645 = vector.shape_cast %618 : vector<1x8x256xf32> to vector<1x1x8x256xf32>
      tpu.vector_store %arg5[%c0_240, %c0_241, %c0_242, %c0_243], %645 {strides = array<i32>} : memref<5x1x8x256xf32, #tpu.memory_space<vmem>>, vector<1x1x8x256xf32>,
      %c0_244 = arith.constant 0 : index
      %c0_245 = arith.constant 0 : index
      %c0_246 = arith.constant 0 : index
      %c0_247 = arith.constant 0 : index
      %646 = vector.load %arg6[%c0_244, %c0_245, %c0_246, %c0_247] : memref<5x1x8x256xf32, #tpu.memory_space<vmem>>, vector<1x1x8x256xf32>
      %647 = vector.shape_cast %646 : vector<1x1x8x256xf32> to vector<1x8x256xf32>
      %648 = vector.shape_cast %619 : vector<1x8x256xf32> to vector<1x1x8x256xf32>
      tpu.vector_store %arg6[%c0_244, %c0_245, %c0_246, %c0_247], %648 {strides = array<i32>} : memref<5x1x8x256xf32, #tpu.memory_space<vmem>>, vector<1x1x8x256xf32>,
      %649 = arith.mulf %618, %618 : vector<1x8x256xf32>
      %cst_248 = arith.constant dense<0.000000e+00> : vector<1xf32>
      %650 = vector.multi_reduction <add>, %649, %cst_248 [1, 2] : vector<1x8x256xf32> to vector<1xf32>
      %651 = vector.shape_cast %650 : vector<1xf32> to vector<1x1x1xf32>
      %652 = math.sqrt %622 : vector<1x1x1xf32>
      %653 = math.sqrt %651 : vector<1x1x1xf32>
      %cst_249 = arith.constant 9.99999974E-6 : f32
      %654 = vector.broadcast %cst_249 : f32 to vector<1x1x1xf32>
      %655 = arith.addf %654, %653 : vector<1x1x1xf32>
      %656 = tpu.reciprocal %655 {approx = true} : vector<1x1x1xf32> -> vector<1x1x1xf32>
      %657 = arith.mulf %652, %656 : vector<1x1x1xf32>
      %658 = arith.cmpf olt, %657, %arg23 : vector<1x1x1xf32>
      %659 = arith.select %658, %657, %arg23 : vector<1x1x1xi1>, vector<1x1x1xf32>
      %660 = vector.shape_cast %658 : vector<1x1x1xi1> to vector<1x1x1xi1>
      %661 = vector.broadcast %660 : vector<1x1x1xi1> to vector<1x8x256xi1>
      %662 = arith.select %661, %614, %arg24 : vector<1x8x256xi1>, vector<1x8x256xf32>
      %cst_250 = arith.constant 9.99999974E-5 : f32
      %663 = vector.broadcast %cst_250 : f32 to vector<1x1x1xf32>
      %664 = arith.addf %622, %663 : vector<1x1x1xf32>
      %cst_251 = arith.constant 9.99999974E-5 : f32
      %665 = vector.broadcast %cst_251 : f32 to vector<1x1x1xf32>
      %666 = arith.addf %arg13, %665 : vector<1x1x1xf32>
      %cst_252 = arith.constant 9.99999974E-5 : f32
      %667 = vector.broadcast %cst_252 : f32 to vector<1x1x1xf32>
      %668 = arith.addf %arg17, %667 : vector<1x1x1xf32>
      %cst_253 = arith.constant 9.99999974E-5 : f32
      %669 = vector.broadcast %cst_253 : f32 to vector<1x1x1xf32>
      %670 = arith.addf %arg20, %669 : vector<1x1x1xf32>
      %cst_254 = arith.constant 9.99999974E-5 : f32
      %671 = vector.broadcast %cst_254 : f32 to vector<1x1x1xf32>
      %672 = arith.addf %arg22, %671 : vector<1x1x1xf32>
      %673 = tpu.reciprocal %664 {approx = true} : vector<1x1x1xf32> -> vector<1x1x1xf32>
      %674 = arith.mulf %664, %673 : vector<1x1x1xf32>
      %cst_255 = arith.constant 2.000000e+00 : f32
      %675 = vector.broadcast %cst_255 : f32 to vector<1x1x1xf32>
      %676 = arith.subf %675, %674 : vector<1x1x1xf32>
      %677 = arith.mulf %673, %676 : vector<1x1x1xf32>
      %678 = arith.mulf %627, %677 : vector<1x1x1xf32>
      %679 = arith.mulf %678, %627 : vector<1x1x1xf32>
      %680 = arith.subf %666, %679 : vector<1x1x1xf32>
      %681 = arith.mulf %678, %632 : vector<1x1x1xf32>
      %682 = arith.subf %arg14, %681 : vector<1x1x1xf32>
      %683 = arith.mulf %678, %637 : vector<1x1x1xf32>
      %684 = arith.subf %arg15, %683 : vector<1x1x1xf32>
      %685 = arith.mulf %678, %642 : vector<1x1x1xf32>
      %686 = arith.subf %arg16, %685 : vector<1x1x1xf32>
      %cst_256 = arith.constant 1.000000e+00 : f32
      %687 = vector.broadcast %cst_256 : f32 to vector<1x1x1xf32>
      %688 = arith.mulf %678, %687 : vector<1x1x1xf32>
      %cst_257 = arith.constant 1.000000e+00 : f32
      %689 = vector.broadcast %cst_257 : f32 to vector<1x1x1xf32>
      %690 = arith.subf %689, %688 : vector<1x1x1xf32>
      %691 = arith.mulf %632, %677 : vector<1x1x1xf32>
      %692 = arith.mulf %691, %627 : vector<1x1x1xf32>
      %693 = arith.subf %arg14, %692 : vector<1x1x1xf32>
      %694 = arith.mulf %691, %632 : vector<1x1x1xf32>
      %695 = arith.subf %668, %694 : vector<1x1x1xf32>
      %696 = arith.mulf %691, %637 : vector<1x1x1xf32>
      %697 = arith.subf %arg18, %696 : vector<1x1x1xf32>
      %698 = arith.mulf %691, %642 : vector<1x1x1xf32>
      %699 = arith.subf %arg19, %698 : vector<1x1x1xf32>
      %cst_258 = arith.constant 1.000000e+00 : f32
      %700 = vector.broadcast %cst_258 : f32 to vector<1x1x1xf32>
      %701 = arith.mulf %691, %700 : vector<1x1x1xf32>
      %cst_259 = arith.constant 1.000000e+00 : f32
      %702 = vector.broadcast %cst_259 : f32 to vector<1x1x1xf32>
      %703 = arith.subf %702, %701 : vector<1x1x1xf32>
      %704 = arith.mulf %637, %677 : vector<1x1x1xf32>
      %705 = arith.mulf %704, %627 : vector<1x1x1xf32>
      %706 = arith.subf %arg15, %705 : vector<1x1x1xf32>
      %707 = arith.mulf %704, %632 : vector<1x1x1xf32>
      %708 = arith.subf %arg18, %707 : vector<1x1x1xf32>
      %709 = arith.mulf %704, %637 : vector<1x1x1xf32>
      %710 = arith.subf %670, %709 : vector<1x1x1xf32>
      %711 = arith.mulf %704, %642 : vector<1x1x1xf32>
      %712 = arith.subf %arg21, %711 : vector<1x1x1xf32>
      %cst_260 = arith.constant 1.000000e+00 : f32
      %713 = vector.broadcast %cst_260 : f32 to vector<1x1x1xf32>
      %714 = arith.mulf %704, %713 : vector<1x1x1xf32>
      %cst_261 = arith.constant 1.000000e+00 : f32
      %715 = vector.broadcast %cst_261 : f32 to vector<1x1x1xf32>
      %716 = arith.subf %715, %714 : vector<1x1x1xf32>
      %717 = arith.mulf %642, %677 : vector<1x1x1xf32>
      %718 = arith.mulf %717, %627 : vector<1x1x1xf32>
      %719 = arith.subf %arg16, %718 : vector<1x1x1xf32>
      %720 = arith.mulf %717, %632 : vector<1x1x1xf32>
      %721 = arith.subf %arg19, %720 : vector<1x1x1xf32>
      %722 = arith.mulf %717, %637 : vector<1x1x1xf32>
      %723 = arith.subf %arg21, %722 : vector<1x1x1xf32>
      %724 = arith.mulf %717, %642 : vector<1x1x1xf32>
      %725 = arith.subf %672, %724 : vector<1x1x1xf32>
      %cst_262 = arith.constant 1.000000e+00 : f32
      %726 = vector.broadcast %cst_262 : f32 to vector<1x1x1xf32>
      %727 = arith.mulf %717, %726 : vector<1x1x1xf32>
      %cst_263 = arith.constant 1.000000e+00 : f32
      %728 = vector.broadcast %cst_263 : f32 to vector<1x1x1xf32>
      %729 = arith.subf %728, %727 : vector<1x1x1xf32>
      %730 = tpu.reciprocal %680 {approx = true} : vector<1x1x1xf32> -> vector<1x1x1xf32>
      %731 = arith.mulf %680, %730 : vector<1x1x1xf32>
      %cst_264 = arith.constant 2.000000e+00 : f32
      %732 = vector.broadcast %cst_264 : f32 to vector<1x1x1xf32>
      %733 = arith.subf %732, %731 : vector<1x1x1xf32>
      %734 = arith.mulf %730, %733 : vector<1x1x1xf32>
      %735 = arith.mulf %693, %734 : vector<1x1x1xf32>
      %736 = arith.mulf %735, %682 : vector<1x1x1xf32>
      %737 = arith.subf %695, %736 : vector<1x1x1xf32>
      %738 = arith.mulf %735, %684 : vector<1x1x1xf32>
      %739 = arith.subf %697, %738 : vector<1x1x1xf32>
      %740 = arith.mulf %735, %686 : vector<1x1x1xf32>
      %741 = arith.subf %699, %740 : vector<1x1x1xf32>
      %742 = arith.mulf %735, %690 : vector<1x1x1xf32>
      %743 = arith.subf %703, %742 : vector<1x1x1xf32>
      %744 = arith.mulf %706, %734 : vector<1x1x1xf32>
      %745 = arith.mulf %744, %682 : vector<1x1x1xf32>
      %746 = arith.subf %708, %745 : vector<1x1x1xf32>
      %747 = arith.mulf %744, %684 : vector<1x1x1xf32>
      %748 = arith.subf %710, %747 : vector<1x1x1xf32>
      %749 = arith.mulf %744, %686 : vector<1x1x1xf32>
      %750 = arith.subf %712, %749 : vector<1x1x1xf32>
      %751 = arith.mulf %744, %690 : vector<1x1x1xf32>
      %752 = arith.subf %716, %751 : vector<1x1x1xf32>
      %753 = arith.mulf %719, %734 : vector<1x1x1xf32>
      %754 = arith.mulf %753, %682 : vector<1x1x1xf32>
      %755 = arith.subf %721, %754 : vector<1x1x1xf32>
      %756 = arith.mulf %753, %684 : vector<1x1x1xf32>
      %757 = arith.subf %723, %756 : vector<1x1x1xf32>
      %758 = arith.mulf %753, %686 : vector<1x1x1xf32>
      %759 = arith.subf %725, %758 : vector<1x1x1xf32>
      %760 = arith.mulf %753, %690 : vector<1x1x1xf32>
      %761 = arith.subf %729, %760 : vector<1x1x1xf32>
      %762 = tpu.reciprocal %737 {approx = true} : vector<1x1x1xf32> -> vector<1x1x1xf32>
      %763 = arith.mulf %737, %762 : vector<1x1x1xf32>
      %cst_265 = arith.constant 2.000000e+00 : f32
      %764 = vector.broadcast %cst_265 : f32 to vector<1x1x1xf32>
      %765 = arith.subf %764, %763 : vector<1x1x1xf32>
      %766 = arith.mulf %762, %765 : vector<1x1x1xf32>
      %767 = arith.mulf %746, %766 : vector<1x1x1xf32>
      %768 = arith.mulf %767, %739 : vector<1x1x1xf32>
      %769 = arith.subf %748, %768 : vector<1x1x1xf32>
      %770 = arith.mulf %767, %741 : vector<1x1x1xf32>
      %771 = arith.subf %750, %770 : vector<1x1x1xf32>
      %772 = arith.mulf %767, %743 : vector<1x1x1xf32>
      %773 = arith.subf %752, %772 : vector<1x1x1xf32>
      %774 = arith.mulf %755, %766 : vector<1x1x1xf32>
      %775 = arith.mulf %774, %739 : vector<1x1x1xf32>
      %776 = arith.subf %757, %775 : vector<1x1x1xf32>
      %777 = arith.mulf %774, %741 : vector<1x1x1xf32>
      %778 = arith.subf %759, %777 : vector<1x1x1xf32>
      %779 = arith.mulf %774, %743 : vector<1x1x1xf32>
      %780 = arith.subf %761, %779 : vector<1x1x1xf32>
      %781 = tpu.reciprocal %769 {approx = true} : vector<1x1x1xf32> -> vector<1x1x1xf32>
      %782 = arith.mulf %769, %781 : vector<1x1x1xf32>
      %cst_266 = arith.constant 2.000000e+00 : f32
      %783 = vector.broadcast %cst_266 : f32 to vector<1x1x1xf32>
      %784 = arith.subf %783, %782 : vector<1x1x1xf32>
      %785 = arith.mulf %781, %784 : vector<1x1x1xf32>
      %786 = arith.mulf %776, %785 : vector<1x1x1xf32>
      %787 = arith.mulf %786, %771 : vector<1x1x1xf32>
      %788 = arith.subf %778, %787 : vector<1x1x1xf32>
      %789 = arith.mulf %786, %773 : vector<1x1x1xf32>
      %790 = arith.subf %780, %789 : vector<1x1x1xf32>
      %791 = tpu.reciprocal %788 {approx = true} : vector<1x1x1xf32> -> vector<1x1x1xf32>
      %792 = arith.mulf %788, %791 : vector<1x1x1xf32>
      %cst_267 = arith.constant 2.000000e+00 : f32
      %793 = vector.broadcast %cst_267 : f32 to vector<1x1x1xf32>
      %794 = arith.subf %793, %792 : vector<1x1x1xf32>
      %795 = arith.mulf %791, %794 : vector<1x1x1xf32>
      %796 = arith.mulf %790, %795 : vector<1x1x1xf32>
      %797 = arith.mulf %771, %796 : vector<1x1x1xf32>
      %798 = arith.subf %773, %797 : vector<1x1x1xf32>
      %799 = arith.mulf %798, %785 : vector<1x1x1xf32>
      %800 = arith.mulf %739, %799 : vector<1x1x1xf32>
      %801 = arith.subf %743, %800 : vector<1x1x1xf32>
      %802 = arith.mulf %741, %796 : vector<1x1x1xf32>
      %803 = arith.subf %801, %802 : vector<1x1x1xf32>
      %804 = arith.mulf %803, %766 : vector<1x1x1xf32>
      %805 = arith.mulf %682, %804 : vector<1x1x1xf32>
      %806 = arith.subf %690, %805 : vector<1x1x1xf32>
      %807 = arith.mulf %684, %799 : vector<1x1x1xf32>
      %808 = arith.subf %806, %807 : vector<1x1x1xf32>
      %809 = arith.mulf %686, %796 : vector<1x1x1xf32>
      %810 = arith.subf %808, %809 : vector<1x1x1xf32>
      %811 = arith.mulf %810, %734 : vector<1x1x1xf32>
      %812 = arith.mulf %627, %811 : vector<1x1x1xf32>
      %cst_268 = arith.constant 1.000000e+00 : f32
      %813 = vector.broadcast %cst_268 : f32 to vector<1x1x1xf32>
      %814 = arith.subf %813, %812 : vector<1x1x1xf32>
      %815 = arith.mulf %632, %804 : vector<1x1x1xf32>
      %816 = arith.subf %814, %815 : vector<1x1x1xf32>
      %817 = arith.mulf %637, %799 : vector<1x1x1xf32>
      %818 = arith.subf %816, %817 : vector<1x1x1xf32>
      %819 = arith.mulf %642, %796 : vector<1x1x1xf32>
      %820 = arith.subf %818, %819 : vector<1x1x1xf32>
      %821 = arith.mulf %820, %677 : vector<1x1x1xf32>
      %822 = arith.addf %821, %811 : vector<1x1x1xf32>
      %823 = arith.addf %822, %804 : vector<1x1x1xf32>
      %824 = arith.addf %823, %799 : vector<1x1x1xf32>
      %825 = arith.addf %824, %796 : vector<1x1x1xf32>
      %826 = tpu.reciprocal %825 {approx = true} : vector<1x1x1xf32> -> vector<1x1x1xf32>
      %827 = arith.mulf %825, %826 : vector<1x1x1xf32>
      %cst_269 = arith.constant 2.000000e+00 : f32
      %828 = vector.broadcast %cst_269 : f32 to vector<1x1x1xf32>
      %829 = arith.subf %828, %827 : vector<1x1x1xf32>
      %830 = arith.mulf %826, %829 : vector<1x1x1xf32>
      %831 = arith.mulf %821, %830 : vector<1x1x1xf32>
      %832 = arith.mulf %811, %830 : vector<1x1x1xf32>
      %833 = arith.mulf %804, %830 : vector<1x1x1xf32>
      %834 = arith.mulf %799, %830 : vector<1x1x1xf32>
      %835 = arith.mulf %796, %830 : vector<1x1x1xf32>
      %c0_270 = arith.constant 0 : index
      %c0_271 = arith.constant 0 : index
      %c0_272 = arith.constant 0 : index
      %c0_273 = arith.constant 0 : index
      %836 = vector.load %arg5[%c0_270, %c0_271, %c0_272, %c0_273] : memref<5x1x8x256xf32, #tpu.memory_space<vmem>>, vector<1x1x8x256xf32>
      %837 = vector.shape_cast %836 : vector<1x1x8x256xf32> to vector<1x8x256xf32>
      %838 = vector.broadcast %831 : vector<1x1x1xf32> to vector<1x8x256xf32>
      %839 = arith.mulf %838, %837 : vector<1x8x256xf32>
      %c1_274 = arith.constant 1 : index
      %c0_275 = arith.constant 0 : index
      %c0_276 = arith.constant 0 : index
      %c0_277 = arith.constant 0 : index
      %840 = vector.load %arg5[%c1_274, %c0_275, %c0_276, %c0_277] : memref<5x1x8x256xf32, #tpu.memory_space<vmem>>, vector<1x1x8x256xf32>
      %841 = vector.shape_cast %840 : vector<1x1x8x256xf32> to vector<1x8x256xf32>
      %842 = vector.broadcast %832 : vector<1x1x1xf32> to vector<1x8x256xf32>
      %843 = arith.mulf %842, %841 : vector<1x8x256xf32>
      %844 = arith.addf %839, %843 : vector<1x8x256xf32>
      %c2_278 = arith.constant 2 : index
      %c0_279 = arith.constant 0 : index
      %c0_280 = arith.constant 0 : index
      %c0_281 = arith.constant 0 : index
      %845 = vector.load %arg5[%c2_278, %c0_279, %c0_280, %c0_281] : memref<5x1x8x256xf32, #tpu.memory_space<vmem>>, vector<1x1x8x256xf32>
      %846 = vector.shape_cast %845 : vector<1x1x8x256xf32> to vector<1x8x256xf32>
      %847 = vector.broadcast %833 : vector<1x1x1xf32> to vector<1x8x256xf32>
      %848 = arith.mulf %847, %846 : vector<1x8x256xf32>
      %849 = arith.addf %844, %848 : vector<1x8x256xf32>
      %c3_282 = arith.constant 3 : index
      %c0_283 = arith.constant 0 : index
      %c0_284 = arith.constant 0 : index
      %c0_285 = arith.constant 0 : index
      %850 = vector.load %arg5[%c3_282, %c0_283, %c0_284, %c0_285] : memref<5x1x8x256xf32, #tpu.memory_space<vmem>>, vector<1x1x8x256xf32>
      %851 = vector.shape_cast %850 : vector<1x1x8x256xf32> to vector<1x8x256xf32>
      %852 = vector.broadcast %834 : vector<1x1x1xf32> to vector<1x8x256xf32>
      %853 = arith.mulf %852, %851 : vector<1x8x256xf32>
      %854 = arith.addf %849, %853 : vector<1x8x256xf32>
      %c4_286 = arith.constant 4 : index
      %c0_287 = arith.constant 0 : index
      %c0_288 = arith.constant 0 : index
      %c0_289 = arith.constant 0 : index
      %855 = vector.load %arg5[%c4_286, %c0_287, %c0_288, %c0_289] : memref<5x1x8x256xf32, #tpu.memory_space<vmem>>, vector<1x1x8x256xf32>
      %856 = vector.shape_cast %855 : vector<1x1x8x256xf32> to vector<1x8x256xf32>
      %857 = vector.broadcast %835 : vector<1x1x1xf32> to vector<1x8x256xf32>
      %858 = arith.mulf %857, %856 : vector<1x8x256xf32>
      %859 = arith.addf %854, %858 : vector<1x8x256xf32>
      %860 = vector.shape_cast %859 : vector<1x8x256xf32> to vector<8x256xf32>
      %cst_290 = arith.constant dense<0.000000e+00> : vector<8x256xf32>
      %861 = tpu.matmul %2, %860, %cst_290 {dimension_numbers = #tpu.dot_dimension_numbers<[1], [0], [0], [1], [0, 0, 1, 1], [], []>} : vector<8x8xf32>, vector<8x256xf32>, vector<8x256xf32> -> vector<8x256xf32>
      %862 = vector.shape_cast %861 : vector<8x256xf32> to vector<1x8x256xf32>
      %863 = arith.addf %4, %862 : vector<1x8x256xf32>
      %864 = arith.subf %863, %859 : vector<1x8x256xf32>
      %865 = arith.mulf %864, %864 : vector<1x8x256xf32>
      %cst_291 = arith.constant dense<0.000000e+00> : vector<1xf32>
      %866 = vector.multi_reduction <add>, %865, %cst_291 [1, 2] : vector<1x8x256xf32> to vector<1xf32>
      %867 = vector.shape_cast %866 : vector<1xf32> to vector<1x1x1xf32>
      %c0_292 = arith.constant 0 : index
      %c0_293 = arith.constant 0 : index
      %c0_294 = arith.constant 0 : index
      %c0_295 = arith.constant 0 : index
      %868 = vector.load %arg6[%c0_292, %c0_293, %c0_294, %c0_295] : memref<5x1x8x256xf32, #tpu.memory_space<vmem>>, vector<1x1x8x256xf32>
      %869 = vector.shape_cast %868 : vector<1x1x8x256xf32> to vector<1x8x256xf32>
      %870 = arith.mulf %864, %869 : vector<1x8x256xf32>
      %cst_296 = arith.constant dense<0.000000e+00> : vector<1xf32>
      %871 = vector.multi_reduction <add>, %870, %cst_296 [1, 2] : vector<1x8x256xf32> to vector<1xf32>
      %872 = vector.shape_cast %871 : vector<1xf32> to vector<1x1x1xf32>
      %c2_297 = arith.constant 2 : index
      %c0_298 = arith.constant 0 : index
      %c0_299 = arith.constant 0 : index
      %c0_300 = arith.constant 0 : index
      %873 = vector.load %arg6[%c2_297, %c0_298, %c0_299, %c0_300] : memref<5x1x8x256xf32, #tpu.memory_space<vmem>>, vector<1x1x8x256xf32>
      %874 = vector.shape_cast %873 : vector<1x1x8x256xf32> to vector<1x8x256xf32>
      %875 = arith.mulf %864, %874 : vector<1x8x256xf32>
      %cst_301 = arith.constant dense<0.000000e+00> : vector<1xf32>
      %876 = vector.multi_reduction <add>, %875, %cst_301 [1, 2] : vector<1x8x256xf32> to vector<1xf32>
      %877 = vector.shape_cast %876 : vector<1xf32> to vector<1x1x1xf32>
      %c3_302 = arith.constant 3 : index
      %c0_303 = arith.constant 0 : index
      %c0_304 = arith.constant 0 : index
      %c0_305 = arith.constant 0 : index
      %878 = vector.load %arg6[%c3_302, %c0_303, %c0_304, %c0_305] : memref<5x1x8x256xf32, #tpu.memory_space<vmem>>, vector<1x1x8x256xf32>
      %879 = vector.shape_cast %878 : vector<1x1x8x256xf32> to vector<1x8x256xf32>
      %880 = arith.mulf %864, %879 : vector<1x8x256xf32>
      %cst_306 = arith.constant dense<0.000000e+00> : vector<1xf32>
      %881 = vector.multi_reduction <add>, %880, %cst_306 [1, 2] : vector<1x8x256xf32> to vector<1xf32>
      %882 = vector.shape_cast %881 : vector<1xf32> to vector<1x1x1xf32>
      %c4_307 = arith.constant 4 : index
      %c0_308 = arith.constant 0 : index
      %c0_309 = arith.constant 0 : index
      %c0_310 = arith.constant 0 : index
      %883 = vector.load %arg6[%c4_307, %c0_308, %c0_309, %c0_310] : memref<5x1x8x256xf32, #tpu.memory_space<vmem>>, vector<1x1x8x256xf32>
      %884 = vector.shape_cast %883 : vector<1x1x8x256xf32> to vector<1x8x256xf32>
      %885 = arith.mulf %864, %884 : vector<1x8x256xf32>
      %cst_311 = arith.constant dense<0.000000e+00> : vector<1xf32>
      %886 = vector.multi_reduction <add>, %885, %cst_311 [1, 2] : vector<1x8x256xf32> to vector<1xf32>
      %887 = vector.shape_cast %886 : vector<1xf32> to vector<1x1x1xf32>
      %c1_312 = arith.constant 1 : index
      %c0_313 = arith.constant 0 : index
      %c0_314 = arith.constant 0 : index
      %c0_315 = arith.constant 0 : index
      %888 = vector.load %arg5[%c1_312, %c0_313, %c0_314, %c0_315] : memref<5x1x8x256xf32, #tpu.memory_space<vmem>>, vector<1x1x8x256xf32>
      %889 = vector.shape_cast %888 : vector<1x1x8x256xf32> to vector<1x8x256xf32>
      %890 = vector.shape_cast %863 : vector<1x8x256xf32> to vector<1x1x8x256xf32>
      tpu.vector_store %arg5[%c1_312, %c0_313, %c0_314, %c0_315], %890 {strides = array<i32>} : memref<5x1x8x256xf32, #tpu.memory_space<vmem>>, vector<1x1x8x256xf32>,
      %c1_316 = arith.constant 1 : index
      %c0_317 = arith.constant 0 : index
      %c0_318 = arith.constant 0 : index
      %c0_319 = arith.constant 0 : index
      %891 = vector.load %arg6[%c1_316, %c0_317, %c0_318, %c0_319] : memref<5x1x8x256xf32, #tpu.memory_space<vmem>>, vector<1x1x8x256xf32>
      %892 = vector.shape_cast %891 : vector<1x1x8x256xf32> to vector<1x8x256xf32>
      %893 = vector.shape_cast %864 : vector<1x8x256xf32> to vector<1x1x8x256xf32>
      tpu.vector_store %arg6[%c1_316, %c0_317, %c0_318, %c0_319], %893 {strides = array<i32>} : memref<5x1x8x256xf32, #tpu.memory_space<vmem>>, vector<1x1x8x256xf32>,
      %894 = arith.mulf %863, %863 : vector<1x8x256xf32>
      %cst_320 = arith.constant dense<0.000000e+00> : vector<1xf32>
      %895 = vector.multi_reduction <add>, %894, %cst_320 [1, 2] : vector<1x8x256xf32> to vector<1xf32>
      %896 = vector.shape_cast %895 : vector<1xf32> to vector<1x1x1xf32>
      %897 = math.sqrt %867 : vector<1x1x1xf32>
      %898 = math.sqrt %896 : vector<1x1x1xf32>
      %cst_321 = arith.constant 9.99999974E-6 : f32
      %899 = vector.broadcast %cst_321 : f32 to vector<1x1x1xf32>
      %900 = arith.addf %899, %898 : vector<1x1x1xf32>
      %901 = tpu.reciprocal %900 {approx = true} : vector<1x1x1xf32> -> vector<1x1x1xf32>
      %902 = arith.mulf %897, %901 : vector<1x1x1xf32>
      %903 = arith.cmpf olt, %902, %659 : vector<1x1x1xf32>
      %904 = arith.select %903, %902, %659 : vector<1x1x1xi1>, vector<1x1x1xf32>
      %905 = vector.shape_cast %903 : vector<1x1x1xi1> to vector<1x1x1xi1>
      %906 = vector.broadcast %905 : vector<1x1x1xi1> to vector<1x8x256xi1>
      %907 = arith.select %906, %859, %662 : vector<1x8x256xi1>, vector<1x8x256xf32>
      %cst_322 = arith.constant 9.99999974E-5 : f32
      %908 = vector.broadcast %cst_322 : f32 to vector<1x1x1xf32>
      %909 = arith.addf %622, %908 : vector<1x1x1xf32>
      %cst_323 = arith.constant 9.99999974E-5 : f32
      %910 = vector.broadcast %cst_323 : f32 to vector<1x1x1xf32>
      %911 = arith.addf %867, %910 : vector<1x1x1xf32>
      %cst_324 = arith.constant 9.99999974E-5 : f32
      %912 = vector.broadcast %cst_324 : f32 to vector<1x1x1xf32>
      %913 = arith.addf %arg17, %912 : vector<1x1x1xf32>
      %cst_325 = arith.constant 9.99999974E-5 : f32
      %914 = vector.broadcast %cst_325 : f32 to vector<1x1x1xf32>
      %915 = arith.addf %arg20, %914 : vector<1x1x1xf32>
      %cst_326 = arith.constant 9.99999974E-5 : f32
      %916 = vector.broadcast %cst_326 : f32 to vector<1x1x1xf32>
      %917 = arith.addf %arg22, %916 : vector<1x1x1xf32>
      %918 = tpu.reciprocal %909 {approx = true} : vector<1x1x1xf32> -> vector<1x1x1xf32>
      %919 = arith.mulf %909, %918 : vector<1x1x1xf32>
      %cst_327 = arith.constant 2.000000e+00 : f32
      %920 = vector.broadcast %cst_327 : f32 to vector<1x1x1xf32>
      %921 = arith.subf %920, %919 : vector<1x1x1xf32>
      %922 = arith.mulf %918, %921 : vector<1x1x1xf32>
      %923 = arith.mulf %872, %922 : vector<1x1x1xf32>
      %924 = arith.mulf %923, %872 : vector<1x1x1xf32>
      %925 = arith.subf %911, %924 : vector<1x1x1xf32>
      %926 = arith.mulf %923, %632 : vector<1x1x1xf32>
      %927 = arith.subf %877, %926 : vector<1x1x1xf32>
      %928 = arith.mulf %923, %637 : vector<1x1x1xf32>
      %929 = arith.subf %882, %928 : vector<1x1x1xf32>
      %930 = arith.mulf %923, %642 : vector<1x1x1xf32>
      %931 = arith.subf %887, %930 : vector<1x1x1xf32>
      %cst_328 = arith.constant 1.000000e+00 : f32
      %932 = vector.broadcast %cst_328 : f32 to vector<1x1x1xf32>
      %933 = arith.mulf %923, %932 : vector<1x1x1xf32>
      %cst_329 = arith.constant 1.000000e+00 : f32
      %934 = vector.broadcast %cst_329 : f32 to vector<1x1x1xf32>
      %935 = arith.subf %934, %933 : vector<1x1x1xf32>
      %936 = arith.mulf %632, %922 : vector<1x1x1xf32>
      %937 = arith.mulf %936, %872 : vector<1x1x1xf32>
      %938 = arith.subf %877, %937 : vector<1x1x1xf32>
      %939 = arith.mulf %936, %632 : vector<1x1x1xf32>
      %940 = arith.subf %913, %939 : vector<1x1x1xf32>
      %941 = arith.mulf %936, %637 : vector<1x1x1xf32>
      %942 = arith.subf %arg18, %941 : vector<1x1x1xf32>
      %943 = arith.mulf %936, %642 : vector<1x1x1xf32>
      %944 = arith.subf %arg19, %943 : vector<1x1x1xf32>
      %cst_330 = arith.constant 1.000000e+00 : f32
      %945 = vector.broadcast %cst_330 : f32 to vector<1x1x1xf32>
      %946 = arith.mulf %936, %945 : vector<1x1x1xf32>
      %cst_331 = arith.constant 1.000000e+00 : f32
      %947 = vector.broadcast %cst_331 : f32 to vector<1x1x1xf32>
      %948 = arith.subf %947, %946 : vector<1x1x1xf32>
      %949 = arith.mulf %637, %922 : vector<1x1x1xf32>
      %950 = arith.mulf %949, %872 : vector<1x1x1xf32>
      %951 = arith.subf %882, %950 : vector<1x1x1xf32>
      %952 = arith.mulf %949, %632 : vector<1x1x1xf32>
      %953 = arith.subf %arg18, %952 : vector<1x1x1xf32>
      %954 = arith.mulf %949, %637 : vector<1x1x1xf32>
      %955 = arith.subf %915, %954 : vector<1x1x1xf32>
      %956 = arith.mulf %949, %642 : vector<1x1x1xf32>
      %957 = arith.subf %arg21, %956 : vector<1x1x1xf32>
      %cst_332 = arith.constant 1.000000e+00 : f32
      %958 = vector.broadcast %cst_332 : f32 to vector<1x1x1xf32>
      %959 = arith.mulf %949, %958 : vector<1x1x1xf32>
      %cst_333 = arith.constant 1.000000e+00 : f32
      %960 = vector.broadcast %cst_333 : f32 to vector<1x1x1xf32>
      %961 = arith.subf %960, %959 : vector<1x1x1xf32>
      %962 = arith.mulf %642, %922 : vector<1x1x1xf32>
      %963 = arith.mulf %962, %872 : vector<1x1x1xf32>
      %964 = arith.subf %887, %963 : vector<1x1x1xf32>
      %965 = arith.mulf %962, %632 : vector<1x1x1xf32>
      %966 = arith.subf %arg19, %965 : vector<1x1x1xf32>
      %967 = arith.mulf %962, %637 : vector<1x1x1xf32>
      %968 = arith.subf %arg21, %967 : vector<1x1x1xf32>
      %969 = arith.mulf %962, %642 : vector<1x1x1xf32>
      %970 = arith.subf %917, %969 : vector<1x1x1xf32>
      %cst_334 = arith.constant 1.000000e+00 : f32
      %971 = vector.broadcast %cst_334 : f32 to vector<1x1x1xf32>
      %972 = arith.mulf %962, %971 : vector<1x1x1xf32>
      %cst_335 = arith.constant 1.000000e+00 : f32
      %973 = vector.broadcast %cst_335 : f32 to vector<1x1x1xf32>
      %974 = arith.subf %973, %972 : vector<1x1x1xf32>
      %975 = tpu.reciprocal %925 {approx = true} : vector<1x1x1xf32> -> vector<1x1x1xf32>
      %976 = arith.mulf %925, %975 : vector<1x1x1xf32>
      %cst_336 = arith.constant 2.000000e+00 : f32
      %977 = vector.broadcast %cst_336 : f32 to vector<1x1x1xf32>
      %978 = arith.subf %977, %976 : vector<1x1x1xf32>
      %979 = arith.mulf %975, %978 : vector<1x1x1xf32>
      %980 = arith.mulf %938, %979 : vector<1x1x1xf32>
      %981 = arith.mulf %980, %927 : vector<1x1x1xf32>
      %982 = arith.subf %940, %981 : vector<1x1x1xf32>
      %983 = arith.mulf %980, %929 : vector<1x1x1xf32>
      %984 = arith.subf %942, %983 : vector<1x1x1xf32>
      %985 = arith.mulf %980, %931 : vector<1x1x1xf32>
      %986 = arith.subf %944, %985 : vector<1x1x1xf32>
      %987 = arith.mulf %980, %935 : vector<1x1x1xf32>
      %988 = arith.subf %948, %987 : vector<1x1x1xf32>
      %989 = arith.mulf %951, %979 : vector<1x1x1xf32>
      %990 = arith.mulf %989, %927 : vector<1x1x1xf32>
      %991 = arith.subf %953, %990 : vector<1x1x1xf32>
      %992 = arith.mulf %989, %929 : vector<1x1x1xf32>
      %993 = arith.subf %955, %992 : vector<1x1x1xf32>
      %994 = arith.mulf %989, %931 : vector<1x1x1xf32>
      %995 = arith.subf %957, %994 : vector<1x1x1xf32>
      %996 = arith.mulf %989, %935 : vector<1x1x1xf32>
      %997 = arith.subf %961, %996 : vector<1x1x1xf32>
      %998 = arith.mulf %964, %979 : vector<1x1x1xf32>
      %999 = arith.mulf %998, %927 : vector<1x1x1xf32>
      %1000 = arith.subf %966, %999 : vector<1x1x1xf32>
      %1001 = arith.mulf %998, %929 : vector<1x1x1xf32>
      %1002 = arith.subf %968, %1001 : vector<1x1x1xf32>
      %1003 = arith.mulf %998, %931 : vector<1x1x1xf32>
      %1004 = arith.subf %970, %1003 : vector<1x1x1xf32>
      %1005 = arith.mulf %998, %935 : vector<1x1x1xf32>
      %1006 = arith.subf %974, %1005 : vector<1x1x1xf32>
      %1007 = tpu.reciprocal %982 {approx = true} : vector<1x1x1xf32> -> vector<1x1x1xf32>
      %1008 = arith.mulf %982, %1007 : vector<1x1x1xf32>
      %cst_337 = arith.constant 2.000000e+00 : f32
      %1009 = vector.broadcast %cst_337 : f32 to vector<1x1x1xf32>
      %1010 = arith.subf %1009, %1008 : vector<1x1x1xf32>
      %1011 = arith.mulf %1007, %1010 : vector<1x1x1xf32>
      %1012 = arith.mulf %991, %1011 : vector<1x1x1xf32>
      %1013 = arith.mulf %1012, %984 : vector<1x1x1xf32>
      %1014 = arith.subf %993, %1013 : vector<1x1x1xf32>
      %1015 = arith.mulf %1012, %986 : vector<1x1x1xf32>
      %1016 = arith.subf %995, %1015 : vector<1x1x1xf32>
      %1017 = arith.mulf %1012, %988 : vector<1x1x1xf32>
      %1018 = arith.subf %997, %1017 : vector<1x1x1xf32>
      %1019 = arith.mulf %1000, %1011 : vector<1x1x1xf32>
      %1020 = arith.mulf %1019, %984 : vector<1x1x1xf32>
      %1021 = arith.subf %1002, %1020 : vector<1x1x1xf32>
      %1022 = arith.mulf %1019, %986 : vector<1x1x1xf32>
      %1023 = arith.subf %1004, %1022 : vector<1x1x1xf32>
      %1024 = arith.mulf %1019, %988 : vector<1x1x1xf32>
      %1025 = arith.subf %1006, %1024 : vector<1x1x1xf32>
      %1026 = tpu.reciprocal %1014 {approx = true} : vector<1x1x1xf32> -> vector<1x1x1xf32>
      %1027 = arith.mulf %1014, %1026 : vector<1x1x1xf32>
      %cst_338 = arith.constant 2.000000e+00 : f32
      %1028 = vector.broadcast %cst_338 : f32 to vector<1x1x1xf32>
      %1029 = arith.subf %1028, %1027 : vector<1x1x1xf32>
      %1030 = arith.mulf %1026, %1029 : vector<1x1x1xf32>
      %1031 = arith.mulf %1021, %1030 : vector<1x1x1xf32>
      %1032 = arith.mulf %1031, %1016 : vector<1x1x1xf32>
      %1033 = arith.subf %1023, %1032 : vector<1x1x1xf32>
      %1034 = arith.mulf %1031, %1018 : vector<1x1x1xf32>
      %1035 = arith.subf %1025, %1034 : vector<1x1x1xf32>
      %1036 = tpu.reciprocal %1033 {approx = true} : vector<1x1x1xf32> -> vector<1x1x1xf32>
      %1037 = arith.mulf %1033, %1036 : vector<1x1x1xf32>
      %cst_339 = arith.constant 2.000000e+00 : f32
      %1038 = vector.broadcast %cst_339 : f32 to vector<1x1x1xf32>
      %1039 = arith.subf %1038, %1037 : vector<1x1x1xf32>
      %1040 = arith.mulf %1036, %1039 : vector<1x1x1xf32>
      %1041 = arith.mulf %1035, %1040 : vector<1x1x1xf32>
      %1042 = arith.mulf %1016, %1041 : vector<1x1x1xf32>
      %1043 = arith.subf %1018, %1042 : vector<1x1x1xf32>
      %1044 = arith.mulf %1043, %1030 : vector<1x1x1xf32>
      %1045 = arith.mulf %984, %1044 : vector<1x1x1xf32>
      %1046 = arith.subf %988, %1045 : vector<1x1x1xf32>
      %1047 = arith.mulf %986, %1041 : vector<1x1x1xf32>
      %1048 = arith.subf %1046, %1047 : vector<1x1x1xf32>
      %1049 = arith.mulf %1048, %1011 : vector<1x1x1xf32>
      %1050 = arith.mulf %927, %1049 : vector<1x1x1xf32>
      %1051 = arith.subf %935, %1050 : vector<1x1x1xf32>
      %1052 = arith.mulf %929, %1044 : vector<1x1x1xf32>
      %1053 = arith.subf %1051, %1052 : vector<1x1x1xf32>
      %1054 = arith.mulf %931, %1041 : vector<1x1x1xf32>
      %1055 = arith.subf %1053, %1054 : vector<1x1x1xf32>
      %1056 = arith.mulf %1055, %979 : vector<1x1x1xf32>
      %1057 = arith.mulf %872, %1056 : vector<1x1x1xf32>
      %cst_340 = arith.constant 1.000000e+00 : f32
      %1058 = vector.broadcast %cst_340 : f32 to vector<1x1x1xf32>
      %1059 = arith.subf %1058, %1057 : vector<1x1x1xf32>
      %1060 = arith.mulf %632, %1049 : vector<1x1x1xf32>
      %1061 = arith.subf %1059, %1060 : vector<1x1x1xf32>
      %1062 = arith.mulf %637, %1044 : vector<1x1x1xf32>
      %1063 = arith.subf %1061, %1062 : vector<1x1x1xf32>
      %1064 = arith.mulf %642, %1041 : vector<1x1x1xf32>
      %1065 = arith.subf %1063, %1064 : vector<1x1x1xf32>
      %1066 = arith.mulf %1065, %922 : vector<1x1x1xf32>
      %1067 = arith.addf %1066, %1056 : vector<1x1x1xf32>
      %1068 = arith.addf %1067, %1049 : vector<1x1x1xf32>
      %1069 = arith.addf %1068, %1044 : vector<1x1x1xf32>
      %1070 = arith.addf %1069, %1041 : vector<1x1x1xf32>
      %1071 = tpu.reciprocal %1070 {approx = true} : vector<1x1x1xf32> -> vector<1x1x1xf32>
      %1072 = arith.mulf %1070, %1071 : vector<1x1x1xf32>
      %cst_341 = arith.constant 2.000000e+00 : f32
      %1073 = vector.broadcast %cst_341 : f32 to vector<1x1x1xf32>
      %1074 = arith.subf %1073, %1072 : vector<1x1x1xf32>
      %1075 = arith.mulf %1071, %1074 : vector<1x1x1xf32>
      %1076 = arith.mulf %1066, %1075 : vector<1x1x1xf32>
      %1077 = arith.mulf %1056, %1075 : vector<1x1x1xf32>
      %1078 = arith.mulf %1049, %1075 : vector<1x1x1xf32>
      %1079 = arith.mulf %1044, %1075 : vector<1x1x1xf32>
      %1080 = arith.mulf %1041, %1075 : vector<1x1x1xf32>
      %c0_342 = arith.constant 0 : index
      %c0_343 = arith.constant 0 : index
      %c0_344 = arith.constant 0 : index
      %c0_345 = arith.constant 0 : index
      %1081 = vector.load %arg5[%c0_342, %c0_343, %c0_344, %c0_345] : memref<5x1x8x256xf32, #tpu.memory_space<vmem>>, vector<1x1x8x256xf32>
      %1082 = vector.shape_cast %1081 : vector<1x1x8x256xf32> to vector<1x8x256xf32>
      %1083 = vector.broadcast %1076 : vector<1x1x1xf32> to vector<1x8x256xf32>
      %1084 = arith.mulf %1083, %1082 : vector<1x8x256xf32>
      %c1_346 = arith.constant 1 : index
      %c0_347 = arith.constant 0 : index
      %c0_348 = arith.constant 0 : index
      %c0_349 = arith.constant 0 : index
      %1085 = vector.load %arg5[%c1_346, %c0_347, %c0_348, %c0_349] : memref<5x1x8x256xf32, #tpu.memory_space<vmem>>, vector<1x1x8x256xf32>
      %1086 = vector.shape_cast %1085 : vector<1x1x8x256xf32> to vector<1x8x256xf32>
      %1087 = vector.broadcast %1077 : vector<1x1x1xf32> to vector<1x8x256xf32>
      %1088 = arith.mulf %1087, %1086 : vector<1x8x256xf32>
      %1089 = arith.addf %1084, %1088 : vector<1x8x256xf32>
      %c2_350 = arith.constant 2 : index
      %c0_351 = arith.constant 0 : index
      %c0_352 = arith.constant 0 : index
      %c0_353 = arith.constant 0 : index
      %1090 = vector.load %arg5[%c2_350, %c0_351, %c0_352, %c0_353] : memref<5x1x8x256xf32, #tpu.memory_space<vmem>>, vector<1x1x8x256xf32>
      %1091 = vector.shape_cast %1090 : vector<1x1x8x256xf32> to vector<1x8x256xf32>
      %1092 = vector.broadcast %1078 : vector<1x1x1xf32> to vector<1x8x256xf32>
      %1093 = arith.mulf %1092, %1091 : vector<1x8x256xf32>
      %1094 = arith.addf %1089, %1093 : vector<1x8x256xf32>
      %c3_354 = arith.constant 3 : index
      %c0_355 = arith.constant 0 : index
      %c0_356 = arith.constant 0 : index
      %c0_357 = arith.constant 0 : index
      %1095 = vector.load %arg5[%c3_354, %c0_355, %c0_356, %c0_357] : memref<5x1x8x256xf32, #tpu.memory_space<vmem>>, vector<1x1x8x256xf32>
      %1096 = vector.shape_cast %1095 : vector<1x1x8x256xf32> to vector<1x8x256xf32>
      %1097 = vector.broadcast %1079 : vector<1x1x1xf32> to vector<1x8x256xf32>
      %1098 = arith.mulf %1097, %1096 : vector<1x8x256xf32>
      %1099 = arith.addf %1094, %1098 : vector<1x8x256xf32>
      %c4_358 = arith.constant 4 : index
      %c0_359 = arith.constant 0 : index
      %c0_360 = arith.constant 0 : index
      %c0_361 = arith.constant 0 : index
      %1100 = vector.load %arg5[%c4_358, %c0_359, %c0_360, %c0_361] : memref<5x1x8x256xf32, #tpu.memory_space<vmem>>, vector<1x1x8x256xf32>
      %1101 = vector.shape_cast %1100 : vector<1x1x8x256xf32> to vector<1x8x256xf32>
      %1102 = vector.broadcast %1080 : vector<1x1x1xf32> to vector<1x8x256xf32>
      %1103 = arith.mulf %1102, %1101 : vector<1x8x256xf32>
      %1104 = arith.addf %1099, %1103 : vector<1x8x256xf32>
      %1105 = vector.shape_cast %1104 : vector<1x8x256xf32> to vector<8x256xf32>
      %cst_362 = arith.constant dense<0.000000e+00> : vector<8x256xf32>
      %1106 = tpu.matmul %2, %1105, %cst_362 {dimension_numbers = #tpu.dot_dimension_numbers<[1], [0], [0], [1], [0, 0, 1, 1], [], []>} : vector<8x8xf32>, vector<8x256xf32>, vector<8x256xf32> -> vector<8x256xf32>
      %1107 = vector.shape_cast %1106 : vector<8x256xf32> to vector<1x8x256xf32>
      %1108 = arith.addf %4, %1107 : vector<1x8x256xf32>
      %1109 = arith.subf %1108, %1104 : vector<1x8x256xf32>
      %1110 = arith.mulf %1109, %1109 : vector<1x8x256xf32>
      %cst_363 = arith.constant dense<0.000000e+00> : vector<1xf32>
      %1111 = vector.multi_reduction <add>, %1110, %cst_363 [1, 2] : vector<1x8x256xf32> to vector<1xf32>
      %1112 = vector.shape_cast %1111 : vector<1xf32> to vector<1x1x1xf32>
      %c0_364 = arith.constant 0 : index
      %c0_365 = arith.constant 0 : index
      %c0_366 = arith.constant 0 : index
      %c0_367 = arith.constant 0 : index
      %1113 = vector.load %arg6[%c0_364, %c0_365, %c0_366, %c0_367] : memref<5x1x8x256xf32, #tpu.memory_space<vmem>>, vector<1x1x8x256xf32>
      %1114 = vector.shape_cast %1113 : vector<1x1x8x256xf32> to vector<1x8x256xf32>
      %1115 = arith.mulf %1109, %1114 : vector<1x8x256xf32>
      %cst_368 = arith.constant dense<0.000000e+00> : vector<1xf32>
      %1116 = vector.multi_reduction <add>, %1115, %cst_368 [1, 2] : vector<1x8x256xf32> to vector<1xf32>
      %1117 = vector.shape_cast %1116 : vector<1xf32> to vector<1x1x1xf32>
      %c1_369 = arith.constant 1 : index
      %c0_370 = arith.constant 0 : index
      %c0_371 = arith.constant 0 : index
      %c0_372 = arith.constant 0 : index
      %1118 = vector.load %arg6[%c1_369, %c0_370, %c0_371, %c0_372] : memref<5x1x8x256xf32, #tpu.memory_space<vmem>>, vector<1x1x8x256xf32>
      %1119 = vector.shape_cast %1118 : vector<1x1x8x256xf32> to vector<1x8x256xf32>
      %1120 = arith.mulf %1109, %1119 : vector<1x8x256xf32>
      %cst_373 = arith.constant dense<0.000000e+00> : vector<1xf32>
      %1121 = vector.multi_reduction <add>, %1120, %cst_373 [1, 2] : vector<1x8x256xf32> to vector<1xf32>
      %1122 = vector.shape_cast %1121 : vector<1xf32> to vector<1x1x1xf32>
      %c3_374 = arith.constant 3 : index
      %c0_375 = arith.constant 0 : index
      %c0_376 = arith.constant 0 : index
      %c0_377 = arith.constant 0 : index
      %1123 = vector.load %arg6[%c3_374, %c0_375, %c0_376, %c0_377] : memref<5x1x8x256xf32, #tpu.memory_space<vmem>>, vector<1x1x8x256xf32>
      %1124 = vector.shape_cast %1123 : vector<1x1x8x256xf32> to vector<1x8x256xf32>
      %1125 = arith.mulf %1109, %1124 : vector<1x8x256xf32>
      %cst_378 = arith.constant dense<0.000000e+00> : vector<1xf32>
      %1126 = vector.multi_reduction <add>, %1125, %cst_378 [1, 2] : vector<1x8x256xf32> to vector<1xf32>
      %1127 = vector.shape_cast %1126 : vector<1xf32> to vector<1x1x1xf32>
      %c4_379 = arith.constant 4 : index
      %c0_380 = arith.constant 0 : index
      %c0_381 = arith.constant 0 : index
      %c0_382 = arith.constant 0 : index
      %1128 = vector.load %arg6[%c4_379, %c0_380, %c0_381, %c0_382] : memref<5x1x8x256xf32, #tpu.memory_space<vmem>>, vector<1x1x8x256xf32>
      %1129 = vector.shape_cast %1128 : vector<1x1x8x256xf32> to vector<1x8x256xf32>
      %1130 = arith.mulf %1109, %1129 : vector<1x8x256xf32>
      %cst_383 = arith.constant dense<0.000000e+00> : vector<1xf32>
      %1131 = vector.multi_reduction <add>, %1130, %cst_383 [1, 2] : vector<1x8x256xf32> to vector<1xf32>
      %1132 = vector.shape_cast %1131 : vector<1xf32> to vector<1x1x1xf32>
      %c2_384 = arith.constant 2 : index
      %c0_385 = arith.constant 0 : index
      %c0_386 = arith.constant 0 : index
      %c0_387 = arith.constant 0 : index
      %1133 = vector.load %arg5[%c2_384, %c0_385, %c0_386, %c0_387] : memref<5x1x8x256xf32, #tpu.memory_space<vmem>>, vector<1x1x8x256xf32>
      %1134 = vector.shape_cast %1133 : vector<1x1x8x256xf32> to vector<1x8x256xf32>
      %1135 = vector.shape_cast %1108 : vector<1x8x256xf32> to vector<1x1x8x256xf32>
      tpu.vector_store %arg5[%c2_384, %c0_385, %c0_386, %c0_387], %1135 {strides = array<i32>} : memref<5x1x8x256xf32, #tpu.memory_space<vmem>>, vector<1x1x8x256xf32>,
      %c2_388 = arith.constant 2 : index
      %c0_389 = arith.constant 0 : index
      %c0_390 = arith.constant 0 : index
      %c0_391 = arith.constant 0 : index
      %1136 = vector.load %arg6[%c2_388, %c0_389, %c0_390, %c0_391] : memref<5x1x8x256xf32, #tpu.memory_space<vmem>>, vector<1x1x8x256xf32>
      %1137 = vector.shape_cast %1136 : vector<1x1x8x256xf32> to vector<1x8x256xf32>
      %1138 = vector.shape_cast %1109 : vector<1x8x256xf32> to vector<1x1x8x256xf32>
      tpu.vector_store %arg6[%c2_388, %c0_389, %c0_390, %c0_391], %1138 {strides = array<i32>} : memref<5x1x8x256xf32, #tpu.memory_space<vmem>>, vector<1x1x8x256xf32>,
      %1139 = arith.mulf %1108, %1108 : vector<1x8x256xf32>
      %cst_392 = arith.constant dense<0.000000e+00> : vector<1xf32>
      %1140 = vector.multi_reduction <add>, %1139, %cst_392 [1, 2] : vector<1x8x256xf32> to vector<1xf32>
      %1141 = vector.shape_cast %1140 : vector<1xf32> to vector<1x1x1xf32>
      %1142 = math.sqrt %1112 : vector<1x1x1xf32>
      %1143 = math.sqrt %1141 : vector<1x1x1xf32>
      %cst_393 = arith.constant 9.99999974E-6 : f32
      %1144 = vector.broadcast %cst_393 : f32 to vector<1x1x1xf32>
      %1145 = arith.addf %1144, %1143 : vector<1x1x1xf32>
      %1146 = tpu.reciprocal %1145 {approx = true} : vector<1x1x1xf32> -> vector<1x1x1xf32>
      %1147 = arith.mulf %1142, %1146 : vector<1x1x1xf32>
      %1148 = arith.cmpf olt, %1147, %904 : vector<1x1x1xf32>
      %1149 = arith.select %1148, %1147, %904 : vector<1x1x1xi1>, vector<1x1x1xf32>
      %1150 = vector.shape_cast %1148 : vector<1x1x1xi1> to vector<1x1x1xi1>
      %1151 = vector.broadcast %1150 : vector<1x1x1xi1> to vector<1x8x256xi1>
      %1152 = arith.select %1151, %1104, %907 : vector<1x8x256xi1>, vector<1x8x256xf32>
      %cst_394 = arith.constant 9.99999974E-5 : f32
      %1153 = vector.broadcast %cst_394 : f32 to vector<1x1x1xf32>
      %1154 = arith.addf %622, %1153 : vector<1x1x1xf32>
      %cst_395 = arith.constant 9.99999974E-5 : f32
      %1155 = vector.broadcast %cst_395 : f32 to vector<1x1x1xf32>
      %1156 = arith.addf %867, %1155 : vector<1x1x1xf32>
      %cst_396 = arith.constant 9.99999974E-5 : f32
      %1157 = vector.broadcast %cst_396 : f32 to vector<1x1x1xf32>
      %1158 = arith.addf %1112, %1157 : vector<1x1x1xf32>
      %cst_397 = arith.constant 9.99999974E-5 : f32
      %1159 = vector.broadcast %cst_397 : f32 to vector<1x1x1xf32>
      %1160 = arith.addf %arg20, %1159 : vector<1x1x1xf32>
      %cst_398 = arith.constant 9.99999974E-5 : f32
      %1161 = vector.broadcast %cst_398 : f32 to vector<1x1x1xf32>
      %1162 = arith.addf %arg22, %1161 : vector<1x1x1xf32>
      %1163 = tpu.reciprocal %1154 {approx = true} : vector<1x1x1xf32> -> vector<1x1x1xf32>
      %1164 = arith.mulf %1154, %1163 : vector<1x1x1xf32>
      %cst_399 = arith.constant 2.000000e+00 : f32
      %1165 = vector.broadcast %cst_399 : f32 to vector<1x1x1xf32>
      %1166 = arith.subf %1165, %1164 : vector<1x1x1xf32>
      %1167 = arith.mulf %1163, %1166 : vector<1x1x1xf32>
      %1168 = arith.mulf %872, %1167 : vector<1x1x1xf32>
      %1169 = arith.mulf %1168, %872 : vector<1x1x1xf32>
      %1170 = arith.subf %1156, %1169 : vector<1x1x1xf32>
      %1171 = arith.mulf %1168, %1117 : vector<1x1x1xf32>
      %1172 = arith.subf %1122, %1171 : vector<1x1x1xf32>
      %1173 = arith.mulf %1168, %637 : vector<1x1x1xf32>
      %1174 = arith.subf %882, %1173 : vector<1x1x1xf32>
      %1175 = arith.mulf %1168, %642 : vector<1x1x1xf32>
      %1176 = arith.subf %887, %1175 : vector<1x1x1xf32>
      %cst_400 = arith.constant 1.000000e+00 : f32
      %1177 = vector.broadcast %cst_400 : f32 to vector<1x1x1xf32>
      %1178 = arith.mulf %1168, %1177 : vector<1x1x1xf32>
      %cst_401 = arith.constant 1.000000e+00 : f32
      %1179 = vector.broadcast %cst_401 : f32 to vector<1x1x1xf32>
      %1180 = arith.subf %1179, %1178 : vector<1x1x1xf32>
      %1181 = arith.mulf %1117, %1167 : vector<1x1x1xf32>
      %1182 = arith.mulf %1181, %872 : vector<1x1x1xf32>
      %1183 = arith.subf %1122, %1182 : vector<1x1x1xf32>
      %1184 = arith.mulf %1181, %1117 : vector<1x1x1xf32>
      %1185 = arith.subf %1158, %1184 : vector<1x1x1xf32>
      %1186 = arith.mulf %1181, %637 : vector<1x1x1xf32>
      %1187 = arith.subf %1127, %1186 : vector<1x1x1xf32>
      %1188 = arith.mulf %1181, %642 : vector<1x1x1xf32>
      %1189 = arith.subf %1132, %1188 : vector<1x1x1xf32>
      %cst_402 = arith.constant 1.000000e+00 : f32
      %1190 = vector.broadcast %cst_402 : f32 to vector<1x1x1xf32>
      %1191 = arith.mulf %1181, %1190 : vector<1x1x1xf32>
      %cst_403 = arith.constant 1.000000e+00 : f32
      %1192 = vector.broadcast %cst_403 : f32 to vector<1x1x1xf32>
      %1193 = arith.subf %1192, %1191 : vector<1x1x1xf32>
      %1194 = arith.mulf %637, %1167 : vector<1x1x1xf32>
      %1195 = arith.mulf %1194, %872 : vector<1x1x1xf32>
      %1196 = arith.subf %882, %1195 : vector<1x1x1xf32>
      %1197 = arith.mulf %1194, %1117 : vector<1x1x1xf32>
      %1198 = arith.subf %1127, %1197 : vector<1x1x1xf32>
      %1199 = arith.mulf %1194, %637 : vector<1x1x1xf32>
      %1200 = arith.subf %1160, %1199 : vector<1x1x1xf32>
      %1201 = arith.mulf %1194, %642 : vector<1x1x1xf32>
      %1202 = arith.subf %arg21, %1201 : vector<1x1x1xf32>
      %cst_404 = arith.constant 1.000000e+00 : f32
      %1203 = vector.broadcast %cst_404 : f32 to vector<1x1x1xf32>
      %1204 = arith.mulf %1194, %1203 : vector<1x1x1xf32>
      %cst_405 = arith.constant 1.000000e+00 : f32
      %1205 = vector.broadcast %cst_405 : f32 to vector<1x1x1xf32>
      %1206 = arith.subf %1205, %1204 : vector<1x1x1xf32>
      %1207 = arith.mulf %642, %1167 : vector<1x1x1xf32>
      %1208 = arith.mulf %1207, %872 : vector<1x1x1xf32>
      %1209 = arith.subf %887, %1208 : vector<1x1x1xf32>
      %1210 = arith.mulf %1207, %1117 : vector<1x1x1xf32>
      %1211 = arith.subf %1132, %1210 : vector<1x1x1xf32>
      %1212 = arith.mulf %1207, %637 : vector<1x1x1xf32>
      %1213 = arith.subf %arg21, %1212 : vector<1x1x1xf32>
      %1214 = arith.mulf %1207, %642 : vector<1x1x1xf32>
      %1215 = arith.subf %1162, %1214 : vector<1x1x1xf32>
      %cst_406 = arith.constant 1.000000e+00 : f32
      %1216 = vector.broadcast %cst_406 : f32 to vector<1x1x1xf32>
      %1217 = arith.mulf %1207, %1216 : vector<1x1x1xf32>
      %cst_407 = arith.constant 1.000000e+00 : f32
      %1218 = vector.broadcast %cst_407 : f32 to vector<1x1x1xf32>
      %1219 = arith.subf %1218, %1217 : vector<1x1x1xf32>
      %1220 = tpu.reciprocal %1170 {approx = true} : vector<1x1x1xf32> -> vector<1x1x1xf32>
      %1221 = arith.mulf %1170, %1220 : vector<1x1x1xf32>
      %cst_408 = arith.constant 2.000000e+00 : f32
      %1222 = vector.broadcast %cst_408 : f32 to vector<1x1x1xf32>
      %1223 = arith.subf %1222, %1221 : vector<1x1x1xf32>
      %1224 = arith.mulf %1220, %1223 : vector<1x1x1xf32>
      %1225 = arith.mulf %1183, %1224 : vector<1x1x1xf32>
      %1226 = arith.mulf %1225, %1172 : vector<1x1x1xf32>
      %1227 = arith.subf %1185, %1226 : vector<1x1x1xf32>
      %1228 = arith.mulf %1225, %1174 : vector<1x1x1xf32>
      %1229 = arith.subf %1187, %1228 : vector<1x1x1xf32>
      %1230 = arith.mulf %1225, %1176 : vector<1x1x1xf32>
      %1231 = arith.subf %1189, %1230 : vector<1x1x1xf32>
      %1232 = arith.mulf %1225, %1180 : vector<1x1x1xf32>
      %1233 = arith.subf %1193, %1232 : vector<1x1x1xf32>
      %1234 = arith.mulf %1196, %1224 : vector<1x1x1xf32>
      %1235 = arith.mulf %1234, %1172 : vector<1x1x1xf32>
      %1236 = arith.subf %1198, %1235 : vector<1x1x1xf32>
      %1237 = arith.mulf %1234, %1174 : vector<1x1x1xf32>
      %1238 = arith.subf %1200, %1237 : vector<1x1x1xf32>
      %1239 = arith.mulf %1234, %1176 : vector<1x1x1xf32>
      %1240 = arith.subf %1202, %1239 : vector<1x1x1xf32>
      %1241 = arith.mulf %1234, %1180 : vector<1x1x1xf32>
      %1242 = arith.subf %1206, %1241 : vector<1x1x1xf32>
      %1243 = arith.mulf %1209, %1224 : vector<1x1x1xf32>
      %1244 = arith.mulf %1243, %1172 : vector<1x1x1xf32>
      %1245 = arith.subf %1211, %1244 : vector<1x1x1xf32>
      %1246 = arith.mulf %1243, %1174 : vector<1x1x1xf32>
      %1247 = arith.subf %1213, %1246 : vector<1x1x1xf32>
      %1248 = arith.mulf %1243, %1176 : vector<1x1x1xf32>
      %1249 = arith.subf %1215, %1248 : vector<1x1x1xf32>
      %1250 = arith.mulf %1243, %1180 : vector<1x1x1xf32>
      %1251 = arith.subf %1219, %1250 : vector<1x1x1xf32>
      %1252 = tpu.reciprocal %1227 {approx = true} : vector<1x1x1xf32> -> vector<1x1x1xf32>
      %1253 = arith.mulf %1227, %1252 : vector<1x1x1xf32>
      %cst_409 = arith.constant 2.000000e+00 : f32
      %1254 = vector.broadcast %cst_409 : f32 to vector<1x1x1xf32>
      %1255 = arith.subf %1254, %1253 : vector<1x1x1xf32>
      %1256 = arith.mulf %1252, %1255 : vector<1x1x1xf32>
      %1257 = arith.mulf %1236, %1256 : vector<1x1x1xf32>
      %1258 = arith.mulf %1257, %1229 : vector<1x1x1xf32>
      %1259 = arith.subf %1238, %1258 : vector<1x1x1xf32>
      %1260 = arith.mulf %1257, %1231 : vector<1x1x1xf32>
      %1261 = arith.subf %1240, %1260 : vector<1x1x1xf32>
      %1262 = arith.mulf %1257, %1233 : vector<1x1x1xf32>
      %1263 = arith.subf %1242, %1262 : vector<1x1x1xf32>
      %1264 = arith.mulf %1245, %1256 : vector<1x1x1xf32>
      %1265 = arith.mulf %1264, %1229 : vector<1x1x1xf32>
      %1266 = arith.subf %1247, %1265 : vector<1x1x1xf32>
      %1267 = arith.mulf %1264, %1231 : vector<1x1x1xf32>
      %1268 = arith.subf %1249, %1267 : vector<1x1x1xf32>
      %1269 = arith.mulf %1264, %1233 : vector<1x1x1xf32>
      %1270 = arith.subf %1251, %1269 : vector<1x1x1xf32>
      %1271 = tpu.reciprocal %1259 {approx = true} : vector<1x1x1xf32> -> vector<1x1x1xf32>
      %1272 = arith.mulf %1259, %1271 : vector<1x1x1xf32>
      %cst_410 = arith.constant 2.000000e+00 : f32
      %1273 = vector.broadcast %cst_410 : f32 to vector<1x1x1xf32>
      %1274 = arith.subf %1273, %1272 : vector<1x1x1xf32>
      %1275 = arith.mulf %1271, %1274 : vector<1x1x1xf32>
      %1276 = arith.mulf %1266, %1275 : vector<1x1x1xf32>
      %1277 = arith.mulf %1276, %1261 : vector<1x1x1xf32>
      %1278 = arith.subf %1268, %1277 : vector<1x1x1xf32>
      %1279 = arith.mulf %1276, %1263 : vector<1x1x1xf32>
      %1280 = arith.subf %1270, %1279 : vector<1x1x1xf32>
      %1281 = tpu.reciprocal %1278 {approx = true} : vector<1x1x1xf32> -> vector<1x1x1xf32>
      %1282 = arith.mulf %1278, %1281 : vector<1x1x1xf32>
      %cst_411 = arith.constant 2.000000e+00 : f32
      %1283 = vector.broadcast %cst_411 : f32 to vector<1x1x1xf32>
      %1284 = arith.subf %1283, %1282 : vector<1x1x1xf32>
      %1285 = arith.mulf %1281, %1284 : vector<1x1x1xf32>
      %1286 = arith.mulf %1280, %1285 : vector<1x1x1xf32>
      %1287 = arith.mulf %1261, %1286 : vector<1x1x1xf32>
      %1288 = arith.subf %1263, %1287 : vector<1x1x1xf32>
      %1289 = arith.mulf %1288, %1275 : vector<1x1x1xf32>
      %1290 = arith.mulf %1229, %1289 : vector<1x1x1xf32>
      %1291 = arith.subf %1233, %1290 : vector<1x1x1xf32>
      %1292 = arith.mulf %1231, %1286 : vector<1x1x1xf32>
      %1293 = arith.subf %1291, %1292 : vector<1x1x1xf32>
      %1294 = arith.mulf %1293, %1256 : vector<1x1x1xf32>
      %1295 = arith.mulf %1172, %1294 : vector<1x1x1xf32>
      %1296 = arith.subf %1180, %1295 : vector<1x1x1xf32>
      %1297 = arith.mulf %1174, %1289 : vector<1x1x1xf32>
      %1298 = arith.subf %1296, %1297 : vector<1x1x1xf32>
      %1299 = arith.mulf %1176, %1286 : vector<1x1x1xf32>
      %1300 = arith.subf %1298, %1299 : vector<1x1x1xf32>
      %1301 = arith.mulf %1300, %1224 : vector<1x1x1xf32>
      %1302 = arith.mulf %872, %1301 : vector<1x1x1xf32>
      %cst_412 = arith.constant 1.000000e+00 : f32
      %1303 = vector.broadcast %cst_412 : f32 to vector<1x1x1xf32>
      %1304 = arith.subf %1303, %1302 : vector<1x1x1xf32>
      %1305 = arith.mulf %1117, %1294 : vector<1x1x1xf32>
      %1306 = arith.subf %1304, %1305 : vector<1x1x1xf32>
      %1307 = arith.mulf %637, %1289 : vector<1x1x1xf32>
      %1308 = arith.subf %1306, %1307 : vector<1x1x1xf32>
      %1309 = arith.mulf %642, %1286 : vector<1x1x1xf32>
      %1310 = arith.subf %1308, %1309 : vector<1x1x1xf32>
      %1311 = arith.mulf %1310, %1167 : vector<1x1x1xf32>
      %1312 = arith.addf %1311, %1301 : vector<1x1x1xf32>
      %1313 = arith.addf %1312, %1294 : vector<1x1x1xf32>
      %1314 = arith.addf %1313, %1289 : vector<1x1x1xf32>
      %1315 = arith.addf %1314, %1286 : vector<1x1x1xf32>
      %1316 = tpu.reciprocal %1315 {approx = true} : vector<1x1x1xf32> -> vector<1x1x1xf32>
      %1317 = arith.mulf %1315, %1316 : vector<1x1x1xf32>
      %cst_413 = arith.constant 2.000000e+00 : f32
      %1318 = vector.broadcast %cst_413 : f32 to vector<1x1x1xf32>
      %1319 = arith.subf %1318, %1317 : vector<1x1x1xf32>
      %1320 = arith.mulf %1316, %1319 : vector<1x1x1xf32>
      %1321 = arith.mulf %1311, %1320 : vector<1x1x1xf32>
      %1322 = arith.mulf %1301, %1320 : vector<1x1x1xf32>
      %1323 = arith.mulf %1294, %1320 : vector<1x1x1xf32>
      %1324 = arith.mulf %1289, %1320 : vector<1x1x1xf32>
      %1325 = arith.mulf %1286, %1320 : vector<1x1x1xf32>
      %c0_414 = arith.constant 0 : index
      %c0_415 = arith.constant 0 : index
      %c0_416 = arith.constant 0 : index
      %c0_417 = arith.constant 0 : index
      %1326 = vector.load %arg5[%c0_414, %c0_415, %c0_416, %c0_417] : memref<5x1x8x256xf32, #tpu.memory_space<vmem>>, vector<1x1x8x256xf32>
      %1327 = vector.shape_cast %1326 : vector<1x1x8x256xf32> to vector<1x8x256xf32>
      %1328 = vector.broadcast %1321 : vector<1x1x1xf32> to vector<1x8x256xf32>
      %1329 = arith.mulf %1328, %1327 : vector<1x8x256xf32>
      %c1_418 = arith.constant 1 : index
      %c0_419 = arith.constant 0 : index
      %c0_420 = arith.constant 0 : index
      %c0_421 = arith.constant 0 : index
      %1330 = vector.load %arg5[%c1_418, %c0_419, %c0_420, %c0_421] : memref<5x1x8x256xf32, #tpu.memory_space<vmem>>, vector<1x1x8x256xf32>
      %1331 = vector.shape_cast %1330 : vector<1x1x8x256xf32> to vector<1x8x256xf32>
      %1332 = vector.broadcast %1322 : vector<1x1x1xf32> to vector<1x8x256xf32>
      %1333 = arith.mulf %1332, %1331 : vector<1x8x256xf32>
      %1334 = arith.addf %1329, %1333 : vector<1x8x256xf32>
      %c2_422 = arith.constant 2 : index
      %c0_423 = arith.constant 0 : index
      %c0_424 = arith.constant 0 : index
      %c0_425 = arith.constant 0 : index
      %1335 = vector.load %arg5[%c2_422, %c0_423, %c0_424, %c0_425] : memref<5x1x8x256xf32, #tpu.memory_space<vmem>>, vector<1x1x8x256xf32>
      %1336 = vector.shape_cast %1335 : vector<1x1x8x256xf32> to vector<1x8x256xf32>
      %1337 = vector.broadcast %1323 : vector<1x1x1xf32> to vector<1x8x256xf32>
      %1338 = arith.mulf %1337, %1336 : vector<1x8x256xf32>
      %1339 = arith.addf %1334, %1338 : vector<1x8x256xf32>
      %c3_426 = arith.constant 3 : index
      %c0_427 = arith.constant 0 : index
      %c0_428 = arith.constant 0 : index
      %c0_429 = arith.constant 0 : index
      %1340 = vector.load %arg5[%c3_426, %c0_427, %c0_428, %c0_429] : memref<5x1x8x256xf32, #tpu.memory_space<vmem>>, vector<1x1x8x256xf32>
      %1341 = vector.shape_cast %1340 : vector<1x1x8x256xf32> to vector<1x8x256xf32>
      %1342 = vector.broadcast %1324 : vector<1x1x1xf32> to vector<1x8x256xf32>
      %1343 = arith.mulf %1342, %1341 : vector<1x8x256xf32>
      %1344 = arith.addf %1339, %1343 : vector<1x8x256xf32>
      %c4_430 = arith.constant 4 : index
      %c0_431 = arith.constant 0 : index
      %c0_432 = arith.constant 0 : index
      %c0_433 = arith.constant 0 : index
      %1345 = vector.load %arg5[%c4_430, %c0_431, %c0_432, %c0_433] : memref<5x1x8x256xf32, #tpu.memory_space<vmem>>, vector<1x1x8x256xf32>
      %1346 = vector.shape_cast %1345 : vector<1x1x8x256xf32> to vector<1x8x256xf32>
      %1347 = vector.broadcast %1325 : vector<1x1x1xf32> to vector<1x8x256xf32>
      %1348 = arith.mulf %1347, %1346 : vector<1x8x256xf32>
      %1349 = arith.addf %1344, %1348 : vector<1x8x256xf32>
      %1350 = vector.shape_cast %1349 : vector<1x8x256xf32> to vector<8x256xf32>
      %cst_434 = arith.constant dense<0.000000e+00> : vector<8x256xf32>
      %1351 = tpu.matmul %2, %1350, %cst_434 {dimension_numbers = #tpu.dot_dimension_numbers<[1], [0], [0], [1], [0, 0, 1, 1], [], []>} : vector<8x8xf32>, vector<8x256xf32>, vector<8x256xf32> -> vector<8x256xf32>
      %1352 = vector.shape_cast %1351 : vector<8x256xf32> to vector<1x8x256xf32>
      %1353 = arith.addf %4, %1352 : vector<1x8x256xf32>
      %1354 = arith.subf %1353, %1349 : vector<1x8x256xf32>
      %1355 = arith.mulf %1354, %1354 : vector<1x8x256xf32>
      %cst_435 = arith.constant dense<0.000000e+00> : vector<1xf32>
      %1356 = vector.multi_reduction <add>, %1355, %cst_435 [1, 2] : vector<1x8x256xf32> to vector<1xf32>
      %1357 = vector.shape_cast %1356 : vector<1xf32> to vector<1x1x1xf32>
      %c0_436 = arith.constant 0 : index
      %c0_437 = arith.constant 0 : index
      %c0_438 = arith.constant 0 : index
      %c0_439 = arith.constant 0 : index
      %1358 = vector.load %arg6[%c0_436, %c0_437, %c0_438, %c0_439] : memref<5x1x8x256xf32, #tpu.memory_space<vmem>>, vector<1x1x8x256xf32>
      %1359 = vector.shape_cast %1358 : vector<1x1x8x256xf32> to vector<1x8x256xf32>
      %1360 = arith.mulf %1354, %1359 : vector<1x8x256xf32>
      %cst_440 = arith.constant dense<0.000000e+00> : vector<1xf32>
      %1361 = vector.multi_reduction <add>, %1360, %cst_440 [1, 2] : vector<1x8x256xf32> to vector<1xf32>
      %1362 = vector.shape_cast %1361 : vector<1xf32> to vector<1x1x1xf32>
      %c1_441 = arith.constant 1 : index
      %c0_442 = arith.constant 0 : index
      %c0_443 = arith.constant 0 : index
      %c0_444 = arith.constant 0 : index
      %1363 = vector.load %arg6[%c1_441, %c0_442, %c0_443, %c0_444] : memref<5x1x8x256xf32, #tpu.memory_space<vmem>>, vector<1x1x8x256xf32>
      %1364 = vector.shape_cast %1363 : vector<1x1x8x256xf32> to vector<1x8x256xf32>
      %1365 = arith.mulf %1354, %1364 : vector<1x8x256xf32>
      %cst_445 = arith.constant dense<0.000000e+00> : vector<1xf32>
      %1366 = vector.multi_reduction <add>, %1365, %cst_445 [1, 2] : vector<1x8x256xf32> to vector<1xf32>
      %1367 = vector.shape_cast %1366 : vector<1xf32> to vector<1x1x1xf32>
      %c2_446 = arith.constant 2 : index
      %c0_447 = arith.constant 0 : index
      %c0_448 = arith.constant 0 : index
      %c0_449 = arith.constant 0 : index
      %1368 = vector.load %arg6[%c2_446, %c0_447, %c0_448, %c0_449] : memref<5x1x8x256xf32, #tpu.memory_space<vmem>>, vector<1x1x8x256xf32>
      %1369 = vector.shape_cast %1368 : vector<1x1x8x256xf32> to vector<1x8x256xf32>
      %1370 = arith.mulf %1354, %1369 : vector<1x8x256xf32>
      %cst_450 = arith.constant dense<0.000000e+00> : vector<1xf32>
      %1371 = vector.multi_reduction <add>, %1370, %cst_450 [1, 2] : vector<1x8x256xf32> to vector<1xf32>
      %1372 = vector.shape_cast %1371 : vector<1xf32> to vector<1x1x1xf32>
      %c4_451 = arith.constant 4 : index
      %c0_452 = arith.constant 0 : index
      %c0_453 = arith.constant 0 : index
      %c0_454 = arith.constant 0 : index
      %1373 = vector.load %arg6[%c4_451, %c0_452, %c0_453, %c0_454] : memref<5x1x8x256xf32, #tpu.memory_space<vmem>>, vector<1x1x8x256xf32>
      %1374 = vector.shape_cast %1373 : vector<1x1x8x256xf32> to vector<1x8x256xf32>
      %1375 = arith.mulf %1354, %1374 : vector<1x8x256xf32>
      %cst_455 = arith.constant dense<0.000000e+00> : vector<1xf32>
      %1376 = vector.multi_reduction <add>, %1375, %cst_455 [1, 2] : vector<1x8x256xf32> to vector<1xf32>
      %1377 = vector.shape_cast %1376 : vector<1xf32> to vector<1x1x1xf32>
      %c3_456 = arith.constant 3 : index
      %c0_457 = arith.constant 0 : index
      %c0_458 = arith.constant 0 : index
      %c0_459 = arith.constant 0 : index
      %1378 = vector.load %arg5[%c3_456, %c0_457, %c0_458, %c0_459] : memref<5x1x8x256xf32, #tpu.memory_space<vmem>>, vector<1x1x8x256xf32>
      %1379 = vector.shape_cast %1378 : vector<1x1x8x256xf32> to vector<1x8x256xf32>
      %1380 = vector.shape_cast %1353 : vector<1x8x256xf32> to vector<1x1x8x256xf32>
      tpu.vector_store %arg5[%c3_456, %c0_457, %c0_458, %c0_459], %1380 {strides = array<i32>} : memref<5x1x8x256xf32, #tpu.memory_space<vmem>>, vector<1x1x8x256xf32>,
      %c3_460 = arith.constant 3 : index
      %c0_461 = arith.constant 0 : index
      %c0_462 = arith.constant 0 : index
      %c0_463 = arith.constant 0 : index
      %1381 = vector.load %arg6[%c3_460, %c0_461, %c0_462, %c0_463] : memref<5x1x8x256xf32, #tpu.memory_space<vmem>>, vector<1x1x8x256xf32>
      %1382 = vector.shape_cast %1381 : vector<1x1x8x256xf32> to vector<1x8x256xf32>
      %1383 = vector.shape_cast %1354 : vector<1x8x256xf32> to vector<1x1x8x256xf32>
      tpu.vector_store %arg6[%c3_460, %c0_461, %c0_462, %c0_463], %1383 {strides = array<i32>} : memref<5x1x8x256xf32, #tpu.memory_space<vmem>>, vector<1x1x8x256xf32>,
      %1384 = arith.mulf %1353, %1353 : vector<1x8x256xf32>
      %cst_464 = arith.constant dense<0.000000e+00> : vector<1xf32>
      %1385 = vector.multi_reduction <add>, %1384, %cst_464 [1, 2] : vector<1x8x256xf32> to vector<1xf32>
      %1386 = vector.shape_cast %1385 : vector<1xf32> to vector<1x1x1xf32>
      %1387 = math.sqrt %1357 : vector<1x1x1xf32>
      %1388 = math.sqrt %1386 : vector<1x1x1xf32>
      %cst_465 = arith.constant 9.99999974E-6 : f32
      %1389 = vector.broadcast %cst_465 : f32 to vector<1x1x1xf32>
      %1390 = arith.addf %1389, %1388 : vector<1x1x1xf32>
      %1391 = tpu.reciprocal %1390 {approx = true} : vector<1x1x1xf32> -> vector<1x1x1xf32>
      %1392 = arith.mulf %1387, %1391 : vector<1x1x1xf32>
      %1393 = arith.cmpf olt, %1392, %1149 : vector<1x1x1xf32>
      %1394 = arith.select %1393, %1392, %1149 : vector<1x1x1xi1>, vector<1x1x1xf32>
      %1395 = vector.shape_cast %1393 : vector<1x1x1xi1> to vector<1x1x1xi1>
      %1396 = vector.broadcast %1395 : vector<1x1x1xi1> to vector<1x8x256xi1>
      %1397 = arith.select %1396, %1349, %1152 : vector<1x8x256xi1>, vector<1x8x256xf32>
      %cst_466 = arith.constant 9.99999974E-5 : f32
      %1398 = vector.broadcast %cst_466 : f32 to vector<1x1x1xf32>
      %1399 = arith.addf %622, %1398 : vector<1x1x1xf32>
      %cst_467 = arith.constant 9.99999974E-5 : f32
      %1400 = vector.broadcast %cst_467 : f32 to vector<1x1x1xf32>
      %1401 = arith.addf %867, %1400 : vector<1x1x1xf32>
      %cst_468 = arith.constant 9.99999974E-5 : f32
      %1402 = vector.broadcast %cst_468 : f32 to vector<1x1x1xf32>
      %1403 = arith.addf %1112, %1402 : vector<1x1x1xf32>
      %cst_469 = arith.constant 9.99999974E-5 : f32
      %1404 = vector.broadcast %cst_469 : f32 to vector<1x1x1xf32>
      %1405 = arith.addf %1357, %1404 : vector<1x1x1xf32>
      %cst_470 = arith.constant 9.99999974E-5 : f32
      %1406 = vector.broadcast %cst_470 : f32 to vector<1x1x1xf32>
      %1407 = arith.addf %arg22, %1406 : vector<1x1x1xf32>
      %1408 = tpu.reciprocal %1399 {approx = true} : vector<1x1x1xf32> -> vector<1x1x1xf32>
      %1409 = arith.mulf %1399, %1408 : vector<1x1x1xf32>
      %cst_471 = arith.constant 2.000000e+00 : f32
      %1410 = vector.broadcast %cst_471 : f32 to vector<1x1x1xf32>
      %1411 = arith.subf %1410, %1409 : vector<1x1x1xf32>
      %1412 = arith.mulf %1408, %1411 : vector<1x1x1xf32>
      %1413 = arith.mulf %872, %1412 : vector<1x1x1xf32>
      %1414 = arith.mulf %1413, %872 : vector<1x1x1xf32>
      %1415 = arith.subf %1401, %1414 : vector<1x1x1xf32>
      %1416 = arith.mulf %1413, %1117 : vector<1x1x1xf32>
      %1417 = arith.subf %1122, %1416 : vector<1x1x1xf32>
      %1418 = arith.mulf %1413, %1362 : vector<1x1x1xf32>
      %1419 = arith.subf %1367, %1418 : vector<1x1x1xf32>
      %1420 = arith.mulf %1413, %642 : vector<1x1x1xf32>
      %1421 = arith.subf %887, %1420 : vector<1x1x1xf32>
      %cst_472 = arith.constant 1.000000e+00 : f32
      %1422 = vector.broadcast %cst_472 : f32 to vector<1x1x1xf32>
      %1423 = arith.mulf %1413, %1422 : vector<1x1x1xf32>
      %cst_473 = arith.constant 1.000000e+00 : f32
      %1424 = vector.broadcast %cst_473 : f32 to vector<1x1x1xf32>
      %1425 = arith.subf %1424, %1423 : vector<1x1x1xf32>
      %1426 = arith.mulf %1117, %1412 : vector<1x1x1xf32>
      %1427 = arith.mulf %1426, %872 : vector<1x1x1xf32>
      %1428 = arith.subf %1122, %1427 : vector<1x1x1xf32>
      %1429 = arith.mulf %1426, %1117 : vector<1x1x1xf32>
      %1430 = arith.subf %1403, %1429 : vector<1x1x1xf32>
      %1431 = arith.mulf %1426, %1362 : vector<1x1x1xf32>
      %1432 = arith.subf %1372, %1431 : vector<1x1x1xf32>
      %1433 = arith.mulf %1426, %642 : vector<1x1x1xf32>
      %1434 = arith.subf %1132, %1433 : vector<1x1x1xf32>
      %cst_474 = arith.constant 1.000000e+00 : f32
      %1435 = vector.broadcast %cst_474 : f32 to vector<1x1x1xf32>
      %1436 = arith.mulf %1426, %1435 : vector<1x1x1xf32>
      %cst_475 = arith.constant 1.000000e+00 : f32
      %1437 = vector.broadcast %cst_475 : f32 to vector<1x1x1xf32>
      %1438 = arith.subf %1437, %1436 : vector<1x1x1xf32>
      %1439 = arith.mulf %1362, %1412 : vector<1x1x1xf32>
      %1440 = arith.mulf %1439, %872 : vector<1x1x1xf32>
      %1441 = arith.subf %1367, %1440 : vector<1x1x1xf32>
      %1442 = arith.mulf %1439, %1117 : vector<1x1x1xf32>
      %1443 = arith.subf %1372, %1442 : vector<1x1x1xf32>
      %1444 = arith.mulf %1439, %1362 : vector<1x1x1xf32>
      %1445 = arith.subf %1405, %1444 : vector<1x1x1xf32>
      %1446 = arith.mulf %1439, %642 : vector<1x1x1xf32>
      %1447 = arith.subf %1377, %1446 : vector<1x1x1xf32>
      %cst_476 = arith.constant 1.000000e+00 : f32
      %1448 = vector.broadcast %cst_476 : f32 to vector<1x1x1xf32>
      %1449 = arith.mulf %1439, %1448 : vector<1x1x1xf32>
      %cst_477 = arith.constant 1.000000e+00 : f32
      %1450 = vector.broadcast %cst_477 : f32 to vector<1x1x1xf32>
      %1451 = arith.subf %1450, %1449 : vector<1x1x1xf32>
      %1452 = arith.mulf %642, %1412 : vector<1x1x1xf32>
      %1453 = arith.mulf %1452, %872 : vector<1x1x1xf32>
      %1454 = arith.subf %887, %1453 : vector<1x1x1xf32>
      %1455 = arith.mulf %1452, %1117 : vector<1x1x1xf32>
      %1456 = arith.subf %1132, %1455 : vector<1x1x1xf32>
      %1457 = arith.mulf %1452, %1362 : vector<1x1x1xf32>
      %1458 = arith.subf %1377, %1457 : vector<1x1x1xf32>
      %1459 = arith.mulf %1452, %642 : vector<1x1x1xf32>
      %1460 = arith.subf %1407, %1459 : vector<1x1x1xf32>
      %cst_478 = arith.constant 1.000000e+00 : f32
      %1461 = vector.broadcast %cst_478 : f32 to vector<1x1x1xf32>
      %1462 = arith.mulf %1452, %1461 : vector<1x1x1xf32>
      %cst_479 = arith.constant 1.000000e+00 : f32
      %1463 = vector.broadcast %cst_479 : f32 to vector<1x1x1xf32>
      %1464 = arith.subf %1463, %1462 : vector<1x1x1xf32>
      %1465 = tpu.reciprocal %1415 {approx = true} : vector<1x1x1xf32> -> vector<1x1x1xf32>
      %1466 = arith.mulf %1415, %1465 : vector<1x1x1xf32>
      %cst_480 = arith.constant 2.000000e+00 : f32
      %1467 = vector.broadcast %cst_480 : f32 to vector<1x1x1xf32>
      %1468 = arith.subf %1467, %1466 : vector<1x1x1xf32>
      %1469 = arith.mulf %1465, %1468 : vector<1x1x1xf32>
      %1470 = arith.mulf %1428, %1469 : vector<1x1x1xf32>
      %1471 = arith.mulf %1470, %1417 : vector<1x1x1xf32>
      %1472 = arith.subf %1430, %1471 : vector<1x1x1xf32>
      %1473 = arith.mulf %1470, %1419 : vector<1x1x1xf32>
      %1474 = arith.subf %1432, %1473 : vector<1x1x1xf32>
      %1475 = arith.mulf %1470, %1421 : vector<1x1x1xf32>
      %1476 = arith.subf %1434, %1475 : vector<1x1x1xf32>
      %1477 = arith.mulf %1470, %1425 : vector<1x1x1xf32>
      %1478 = arith.subf %1438, %1477 : vector<1x1x1xf32>
      %1479 = arith.mulf %1441, %1469 : vector<1x1x1xf32>
      %1480 = arith.mulf %1479, %1417 : vector<1x1x1xf32>
      %1481 = arith.subf %1443, %1480 : vector<1x1x1xf32>
      %1482 = arith.mulf %1479, %1419 : vector<1x1x1xf32>
      %1483 = arith.subf %1445, %1482 : vector<1x1x1xf32>
      %1484 = arith.mulf %1479, %1421 : vector<1x1x1xf32>
      %1485 = arith.subf %1447, %1484 : vector<1x1x1xf32>
      %1486 = arith.mulf %1479, %1425 : vector<1x1x1xf32>
      %1487 = arith.subf %1451, %1486 : vector<1x1x1xf32>
      %1488 = arith.mulf %1454, %1469 : vector<1x1x1xf32>
      %1489 = arith.mulf %1488, %1417 : vector<1x1x1xf32>
      %1490 = arith.subf %1456, %1489 : vector<1x1x1xf32>
      %1491 = arith.mulf %1488, %1419 : vector<1x1x1xf32>
      %1492 = arith.subf %1458, %1491 : vector<1x1x1xf32>
      %1493 = arith.mulf %1488, %1421 : vector<1x1x1xf32>
      %1494 = arith.subf %1460, %1493 : vector<1x1x1xf32>
      %1495 = arith.mulf %1488, %1425 : vector<1x1x1xf32>
      %1496 = arith.subf %1464, %1495 : vector<1x1x1xf32>
      %1497 = tpu.reciprocal %1472 {approx = true} : vector<1x1x1xf32> -> vector<1x1x1xf32>
      %1498 = arith.mulf %1472, %1497 : vector<1x1x1xf32>
      %cst_481 = arith.constant 2.000000e+00 : f32
      %1499 = vector.broadcast %cst_481 : f32 to vector<1x1x1xf32>
      %1500 = arith.subf %1499, %1498 : vector<1x1x1xf32>
      %1501 = arith.mulf %1497, %1500 : vector<1x1x1xf32>
      %1502 = arith.mulf %1481, %1501 : vector<1x1x1xf32>
      %1503 = arith.mulf %1502, %1474 : vector<1x1x1xf32>
      %1504 = arith.subf %1483, %1503 : vector<1x1x1xf32>
      %1505 = arith.mulf %1502, %1476 : vector<1x1x1xf32>
      %1506 = arith.subf %1485, %1505 : vector<1x1x1xf32>
      %1507 = arith.mulf %1502, %1478 : vector<1x1x1xf32>
      %1508 = arith.subf %1487, %1507 : vector<1x1x1xf32>
      %1509 = arith.mulf %1490, %1501 : vector<1x1x1xf32>
      %1510 = arith.mulf %1509, %1474 : vector<1x1x1xf32>
      %1511 = arith.subf %1492, %1510 : vector<1x1x1xf32>
      %1512 = arith.mulf %1509, %1476 : vector<1x1x1xf32>
      %1513 = arith.subf %1494, %1512 : vector<1x1x1xf32>
      %1514 = arith.mulf %1509, %1478 : vector<1x1x1xf32>
      %1515 = arith.subf %1496, %1514 : vector<1x1x1xf32>
      %1516 = tpu.reciprocal %1504 {approx = true} : vector<1x1x1xf32> -> vector<1x1x1xf32>
      %1517 = arith.mulf %1504, %1516 : vector<1x1x1xf32>
      %cst_482 = arith.constant 2.000000e+00 : f32
      %1518 = vector.broadcast %cst_482 : f32 to vector<1x1x1xf32>
      %1519 = arith.subf %1518, %1517 : vector<1x1x1xf32>
      %1520 = arith.mulf %1516, %1519 : vector<1x1x1xf32>
      %1521 = arith.mulf %1511, %1520 : vector<1x1x1xf32>
      %1522 = arith.mulf %1521, %1506 : vector<1x1x1xf32>
      %1523 = arith.subf %1513, %1522 : vector<1x1x1xf32>
      %1524 = arith.mulf %1521, %1508 : vector<1x1x1xf32>
      %1525 = arith.subf %1515, %1524 : vector<1x1x1xf32>
      %1526 = tpu.reciprocal %1523 {approx = true} : vector<1x1x1xf32> -> vector<1x1x1xf32>
      %1527 = arith.mulf %1523, %1526 : vector<1x1x1xf32>
      %cst_483 = arith.constant 2.000000e+00 : f32
      %1528 = vector.broadcast %cst_483 : f32 to vector<1x1x1xf32>
      %1529 = arith.subf %1528, %1527 : vector<1x1x1xf32>
      %1530 = arith.mulf %1526, %1529 : vector<1x1x1xf32>
      %1531 = arith.mulf %1525, %1530 : vector<1x1x1xf32>
      %1532 = arith.mulf %1506, %1531 : vector<1x1x1xf32>
      %1533 = arith.subf %1508, %1532 : vector<1x1x1xf32>
      %1534 = arith.mulf %1533, %1520 : vector<1x1x1xf32>
      %1535 = arith.mulf %1474, %1534 : vector<1x1x1xf32>
      %1536 = arith.subf %1478, %1535 : vector<1x1x1xf32>
      %1537 = arith.mulf %1476, %1531 : vector<1x1x1xf32>
      %1538 = arith.subf %1536, %1537 : vector<1x1x1xf32>
      %1539 = arith.mulf %1538, %1501 : vector<1x1x1xf32>
      %1540 = arith.mulf %1417, %1539 : vector<1x1x1xf32>
      %1541 = arith.subf %1425, %1540 : vector<1x1x1xf32>
      %1542 = arith.mulf %1419, %1534 : vector<1x1x1xf32>
      %1543 = arith.subf %1541, %1542 : vector<1x1x1xf32>
      %1544 = arith.mulf %1421, %1531 : vector<1x1x1xf32>
      %1545 = arith.subf %1543, %1544 : vector<1x1x1xf32>
      %1546 = arith.mulf %1545, %1469 : vector<1x1x1xf32>
      %1547 = arith.mulf %872, %1546 : vector<1x1x1xf32>
      %cst_484 = arith.constant 1.000000e+00 : f32
      %1548 = vector.broadcast %cst_484 : f32 to vector<1x1x1xf32>
      %1549 = arith.subf %1548, %1547 : vector<1x1x1xf32>
      %1550 = arith.mulf %1117, %1539 : vector<1x1x1xf32>
      %1551 = arith.subf %1549, %1550 : vector<1x1x1xf32>
      %1552 = arith.mulf %1362, %1534 : vector<1x1x1xf32>
      %1553 = arith.subf %1551, %1552 : vector<1x1x1xf32>
      %1554 = arith.mulf %642, %1531 : vector<1x1x1xf32>
      %1555 = arith.subf %1553, %1554 : vector<1x1x1xf32>
      %1556 = arith.mulf %1555, %1412 : vector<1x1x1xf32>
      %1557 = arith.addf %1556, %1546 : vector<1x1x1xf32>
      %1558 = arith.addf %1557, %1539 : vector<1x1x1xf32>
      %1559 = arith.addf %1558, %1534 : vector<1x1x1xf32>
      %1560 = arith.addf %1559, %1531 : vector<1x1x1xf32>
      %1561 = tpu.reciprocal %1560 {approx = true} : vector<1x1x1xf32> -> vector<1x1x1xf32>
      %1562 = arith.mulf %1560, %1561 : vector<1x1x1xf32>
      %cst_485 = arith.constant 2.000000e+00 : f32
      %1563 = vector.broadcast %cst_485 : f32 to vector<1x1x1xf32>
      %1564 = arith.subf %1563, %1562 : vector<1x1x1xf32>
      %1565 = arith.mulf %1561, %1564 : vector<1x1x1xf32>
      %1566 = arith.mulf %1556, %1565 : vector<1x1x1xf32>
      %1567 = arith.mulf %1546, %1565 : vector<1x1x1xf32>
      %1568 = arith.mulf %1539, %1565 : vector<1x1x1xf32>
      %1569 = arith.mulf %1534, %1565 : vector<1x1x1xf32>
      %1570 = arith.mulf %1531, %1565 : vector<1x1x1xf32>
      %c0_486 = arith.constant 0 : index
      %c0_487 = arith.constant 0 : index
      %c0_488 = arith.constant 0 : index
      %c0_489 = arith.constant 0 : index
      %1571 = vector.load %arg5[%c0_486, %c0_487, %c0_488, %c0_489] : memref<5x1x8x256xf32, #tpu.memory_space<vmem>>, vector<1x1x8x256xf32>
      %1572 = vector.shape_cast %1571 : vector<1x1x8x256xf32> to vector<1x8x256xf32>
      %1573 = vector.broadcast %1566 : vector<1x1x1xf32> to vector<1x8x256xf32>
      %1574 = arith.mulf %1573, %1572 : vector<1x8x256xf32>
      %c1_490 = arith.constant 1 : index
      %c0_491 = arith.constant 0 : index
      %c0_492 = arith.constant 0 : index
      %c0_493 = arith.constant 0 : index
      %1575 = vector.load %arg5[%c1_490, %c0_491, %c0_492, %c0_493] : memref<5x1x8x256xf32, #tpu.memory_space<vmem>>, vector<1x1x8x256xf32>
      %1576 = vector.shape_cast %1575 : vector<1x1x8x256xf32> to vector<1x8x256xf32>
      %1577 = vector.broadcast %1567 : vector<1x1x1xf32> to vector<1x8x256xf32>
      %1578 = arith.mulf %1577, %1576 : vector<1x8x256xf32>
      %1579 = arith.addf %1574, %1578 : vector<1x8x256xf32>
      %c2_494 = arith.constant 2 : index
      %c0_495 = arith.constant 0 : index
      %c0_496 = arith.constant 0 : index
      %c0_497 = arith.constant 0 : index
      %1580 = vector.load %arg5[%c2_494, %c0_495, %c0_496, %c0_497] : memref<5x1x8x256xf32, #tpu.memory_space<vmem>>, vector<1x1x8x256xf32>
      %1581 = vector.shape_cast %1580 : vector<1x1x8x256xf32> to vector<1x8x256xf32>
      %1582 = vector.broadcast %1568 : vector<1x1x1xf32> to vector<1x8x256xf32>
      %1583 = arith.mulf %1582, %1581 : vector<1x8x256xf32>
      %1584 = arith.addf %1579, %1583 : vector<1x8x256xf32>
      %c3_498 = arith.constant 3 : index
      %c0_499 = arith.constant 0 : index
      %c0_500 = arith.constant 0 : index
      %c0_501 = arith.constant 0 : index
      %1585 = vector.load %arg5[%c3_498, %c0_499, %c0_500, %c0_501] : memref<5x1x8x256xf32, #tpu.memory_space<vmem>>, vector<1x1x8x256xf32>
      %1586 = vector.shape_cast %1585 : vector<1x1x8x256xf32> to vector<1x8x256xf32>
      %1587 = vector.broadcast %1569 : vector<1x1x1xf32> to vector<1x8x256xf32>
      %1588 = arith.mulf %1587, %1586 : vector<1x8x256xf32>
      %1589 = arith.addf %1584, %1588 : vector<1x8x256xf32>
      %c4_502 = arith.constant 4 : index
      %c0_503 = arith.constant 0 : index
      %c0_504 = arith.constant 0 : index
      %c0_505 = arith.constant 0 : index
      %1590 = vector.load %arg5[%c4_502, %c0_503, %c0_504, %c0_505] : memref<5x1x8x256xf32, #tpu.memory_space<vmem>>, vector<1x1x8x256xf32>
      %1591 = vector.shape_cast %1590 : vector<1x1x8x256xf32> to vector<1x8x256xf32>
      %1592 = vector.broadcast %1570 : vector<1x1x1xf32> to vector<1x8x256xf32>
      %1593 = arith.mulf %1592, %1591 : vector<1x8x256xf32>
      %1594 = arith.addf %1589, %1593 : vector<1x8x256xf32>
      %1595 = vector.shape_cast %1594 : vector<1x8x256xf32> to vector<8x256xf32>
      %cst_506 = arith.constant dense<0.000000e+00> : vector<8x256xf32>
      %1596 = tpu.matmul %2, %1595, %cst_506 {dimension_numbers = #tpu.dot_dimension_numbers<[1], [0], [0], [1], [0, 0, 1, 1], [], []>} : vector<8x8xf32>, vector<8x256xf32>, vector<8x256xf32> -> vector<8x256xf32>
      %1597 = vector.shape_cast %1596 : vector<8x256xf32> to vector<1x8x256xf32>
      %1598 = arith.addf %4, %1597 : vector<1x8x256xf32>
      %1599 = arith.subf %1598, %1594 : vector<1x8x256xf32>
      %1600 = arith.mulf %1599, %1599 : vector<1x8x256xf32>
      %cst_507 = arith.constant dense<0.000000e+00> : vector<1xf32>
      %1601 = vector.multi_reduction <add>, %1600, %cst_507 [1, 2] : vector<1x8x256xf32> to vector<1xf32>
      %1602 = vector.shape_cast %1601 : vector<1xf32> to vector<1x1x1xf32>
      %c0_508 = arith.constant 0 : index
      %c0_509 = arith.constant 0 : index
      %c0_510 = arith.constant 0 : index
      %c0_511 = arith.constant 0 : index
      %1603 = vector.load %arg6[%c0_508, %c0_509, %c0_510, %c0_511] : memref<5x1x8x256xf32, #tpu.memory_space<vmem>>, vector<1x1x8x256xf32>
      %1604 = vector.shape_cast %1603 : vector<1x1x8x256xf32> to vector<1x8x256xf32>
      %1605 = arith.mulf %1599, %1604 : vector<1x8x256xf32>
      %cst_512 = arith.constant dense<0.000000e+00> : vector<1xf32>
      %1606 = vector.multi_reduction <add>, %1605, %cst_512 [1, 2] : vector<1x8x256xf32> to vector<1xf32>
      %1607 = vector.shape_cast %1606 : vector<1xf32> to vector<1x1x1xf32>
      %c1_513 = arith.constant 1 : index
      %c0_514 = arith.constant 0 : index
      %c0_515 = arith.constant 0 : index
      %c0_516 = arith.constant 0 : index
      %1608 = vector.load %arg6[%c1_513, %c0_514, %c0_515, %c0_516] : memref<5x1x8x256xf32, #tpu.memory_space<vmem>>, vector<1x1x8x256xf32>
      %1609 = vector.shape_cast %1608 : vector<1x1x8x256xf32> to vector<1x8x256xf32>
      %1610 = arith.mulf %1599, %1609 : vector<1x8x256xf32>
      %cst_517 = arith.constant dense<0.000000e+00> : vector<1xf32>
      %1611 = vector.multi_reduction <add>, %1610, %cst_517 [1, 2] : vector<1x8x256xf32> to vector<1xf32>
      %1612 = vector.shape_cast %1611 : vector<1xf32> to vector<1x1x1xf32>
      %c2_518 = arith.constant 2 : index
      %c0_519 = arith.constant 0 : index
      %c0_520 = arith.constant 0 : index
      %c0_521 = arith.constant 0 : index
      %1613 = vector.load %arg6[%c2_518, %c0_519, %c0_520, %c0_521] : memref<5x1x8x256xf32, #tpu.memory_space<vmem>>, vector<1x1x8x256xf32>
      %1614 = vector.shape_cast %1613 : vector<1x1x8x256xf32> to vector<1x8x256xf32>
      %1615 = arith.mulf %1599, %1614 : vector<1x8x256xf32>
      %cst_522 = arith.constant dense<0.000000e+00> : vector<1xf32>
      %1616 = vector.multi_reduction <add>, %1615, %cst_522 [1, 2] : vector<1x8x256xf32> to vector<1xf32>
      %1617 = vector.shape_cast %1616 : vector<1xf32> to vector<1x1x1xf32>
      %c3_523 = arith.constant 3 : index
      %c0_524 = arith.constant 0 : index
      %c0_525 = arith.constant 0 : index
      %c0_526 = arith.constant 0 : index
      %1618 = vector.load %arg6[%c3_523, %c0_524, %c0_525, %c0_526] : memref<5x1x8x256xf32, #tpu.memory_space<vmem>>, vector<1x1x8x256xf32>
      %1619 = vector.shape_cast %1618 : vector<1x1x8x256xf32> to vector<1x8x256xf32>
      %1620 = arith.mulf %1599, %1619 : vector<1x8x256xf32>
      %cst_527 = arith.constant dense<0.000000e+00> : vector<1xf32>
      %1621 = vector.multi_reduction <add>, %1620, %cst_527 [1, 2] : vector<1x8x256xf32> to vector<1xf32>
      %1622 = vector.shape_cast %1621 : vector<1xf32> to vector<1x1x1xf32>
      %c4_528 = arith.constant 4 : index
      %c0_529 = arith.constant 0 : index
      %c0_530 = arith.constant 0 : index
      %c0_531 = arith.constant 0 : index
      %1623 = vector.load %arg5[%c4_528, %c0_529, %c0_530, %c0_531] : memref<5x1x8x256xf32, #tpu.memory_space<vmem>>, vector<1x1x8x256xf32>
      %1624 = vector.shape_cast %1623 : vector<1x1x8x256xf32> to vector<1x8x256xf32>
      %1625 = vector.shape_cast %1598 : vector<1x8x256xf32> to vector<1x1x8x256xf32>
      tpu.vector_store %arg5[%c4_528, %c0_529, %c0_530, %c0_531], %1625 {strides = array<i32>} : memref<5x1x8x256xf32, #tpu.memory_space<vmem>>, vector<1x1x8x256xf32>,
      %c4_532 = arith.constant 4 : index
      %c0_533 = arith.constant 0 : index
      %c0_534 = arith.constant 0 : index
      %c0_535 = arith.constant 0 : index
      %1626 = vector.load %arg6[%c4_532, %c0_533, %c0_534, %c0_535] : memref<5x1x8x256xf32, #tpu.memory_space<vmem>>, vector<1x1x8x256xf32>
      %1627 = vector.shape_cast %1626 : vector<1x1x8x256xf32> to vector<1x8x256xf32>
      %1628 = vector.shape_cast %1599 : vector<1x8x256xf32> to vector<1x1x8x256xf32>
      tpu.vector_store %arg6[%c4_532, %c0_533, %c0_534, %c0_535], %1628 {strides = array<i32>} : memref<5x1x8x256xf32, #tpu.memory_space<vmem>>, vector<1x1x8x256xf32>,
      %1629 = arith.mulf %1598, %1598 : vector<1x8x256xf32>
      %cst_536 = arith.constant dense<0.000000e+00> : vector<1xf32>
      %1630 = vector.multi_reduction <add>, %1629, %cst_536 [1, 2] : vector<1x8x256xf32> to vector<1xf32>
      %1631 = vector.shape_cast %1630 : vector<1xf32> to vector<1x1x1xf32>
      %1632 = math.sqrt %1602 : vector<1x1x1xf32>
      %1633 = math.sqrt %1631 : vector<1x1x1xf32>
      %cst_537 = arith.constant 9.99999974E-6 : f32
      %1634 = vector.broadcast %cst_537 : f32 to vector<1x1x1xf32>
      %1635 = arith.addf %1634, %1633 : vector<1x1x1xf32>
      %1636 = tpu.reciprocal %1635 {approx = true} : vector<1x1x1xf32> -> vector<1x1x1xf32>
      %1637 = arith.mulf %1632, %1636 : vector<1x1x1xf32>
      %1638 = arith.cmpf olt, %1637, %1394 : vector<1x1x1xf32>
      %1639 = arith.select %1638, %1637, %1394 : vector<1x1x1xi1>, vector<1x1x1xf32>
      %1640 = vector.shape_cast %1638 : vector<1x1x1xi1> to vector<1x1x1xi1>
      %1641 = vector.broadcast %1640 : vector<1x1x1xi1> to vector<1x8x256xi1>
      %1642 = arith.select %1641, %1594, %1397 : vector<1x8x256xi1>, vector<1x8x256xf32>
      scf.yield %622, %872, %1117, %1362, %1607, %867, %1122, %1367, %1612, %1112, %1372, %1617, %1357, %1622, %1602, %1639, %1642 : vector<1x1x1xf32>, vector<1x1x1xf32>, vector<1x1x1xf32>, vector<1x1x1xf32>, vector<1x1x1xf32>, vector<1x1x1xf32>, vector<1x1x1xf32>, vector<1x1x1xf32>, vector<1x1x1xf32>, vector<1x1x1xf32>, vector<1x1x1xf32>, vector<1x1x1xf32>, vector<1x1x1xf32>, vector<1x1x1xf32>, vector<1x1x1xf32>, vector<1x1x1xf32>, vector<1x8x256xf32>
    }
    %c0_175 = arith.constant 0 : index
    %c0_176 = arith.constant 0 : index
    %c0_177 = arith.constant 0 : index
    %417 = vector.load %arg4[%c0_175, %c0_176, %c0_177] : memref<1x8x256xf32, #tpu.memory_space<vmem>>, vector<1x8x256xf32>
    tpu.vector_store %arg4[%c0_175, %c0_176, %c0_177], %416#16 {strides = array<i32>} : memref<1x8x256xf32, #tpu.memory_space<vmem>>, vector<1x8x256xf32>,
    return
  }
  func.func @transform_0(%arg0: i32) -> (i32, i32, i32) {
    %c0_i32 = arith.constant 0 : i32
    %c0_i32_0 = arith.constant 0 : i32
    %c0_i32_1 = arith.constant 0 : i32
    return %arg0, %c0_i32, %c0_i32_0 : i32, i32, i32
  }
  func.func @transform_1(%arg0: i32) -> (i32, i32) {
    %c0_i32 = arith.constant 0 : i32
    %c0_i32_0 = arith.constant 0 : i32
    %c0_i32_1 = arith.constant 0 : i32
    return %c0_i32, %c0_i32_0 : i32, i32
  }
  func.func @transform_2(%arg0: i32) -> i32 {
    %c0_i32 = arith.constant 0 : i32
    %c0_i32_0 = arith.constant 0 : i32
    return %c0_i32 : i32
  }
  func.func @transform_3(%arg0: i32) -> (i32, i32, i32) {
    %c0_i32 = arith.constant 0 : i32
    %c0_i32_0 = arith.constant 0 : i32
    %c0_i32_1 = arith.constant 0 : i32
    return %arg0, %c0_i32, %c0_i32_0 : i32, i32, i32
  }
}

</mosaic_0001>

<bundles_post_ra>
// kernel: deq_solver_solve.1
= control target key start
LH: loop header
LB: loop body
LE: loop exit
PB: predicated region body
PF: predicated region fallthrough
CT: control target
= control target key end

     0   :  { %s3057_s14 = smov 0   ;;  %s4579_s0 = inlined_call_operand.vmem [shape: f32[2,8,256], index: 0, kind: input, shape index: {}]   ;;  %s4580_s1 = inlined_call_operand.vmem [shape: f32[8,8], index: 1, kind: input, shape index: {}]   ;;  %s4581_s2 = inlined_call_operand.<no memory space> [shape: f32[1], index: 2, kind: input, shape index: {}]   ;;  %s4582_s3 = inlined_call_operand.vmem [shape: f32[2,8,256], index: 3, kind: output, shape index: {}]  }
   0x1   :  { %8 = sst [smem:[#allocation4]] %s4581_s2 }
   0x2 LB: > { %s2568_s15 = sadd.s32 4294967295, %s2956_s14   ;;  %p2572_p0 = scmp.ge.s32.totalorder %s2956_s14, 1  ;;  %s2956_s14 = sphi %s3057_s14, %s14_s14  }
   0x3   : > { %p138_p1 = scmp.lt.s32.totalorder %s2956_s14, 3 }
   0x5   : > { %p139_p2 = pnand %p2572_p0, %p138_p1 }
   0x7   : > { %142 = sbr.rel (%p139_p2) target bundleno = 3542 (0xdd6), region = 32 }
   0xc   : > { %p162_p3 = scmp.lt.s32.totalorder %s2568_s15, 1  ;;  %v3076_v0 = vld [vmem:[%s4580_s1] sm:$0xff]  ;;  %vm179_vm0 = vcmask 64512   ;;  %s172_s24 = sld [smem:[#allocation4]] }
   0xd   : > { %4646 = vst [vmem:[#allocation5_spill] sm:$0xff] %v3076_v0  ;;  %s3481_s25 = smov 0  }
   0xe   : > { %s4767_s15 = smov (!%p162_p3, %s2568_s15), 1 }
   0xf   : > { %s2599_s16 = sshll.u32 %s4767_s15, 4 }
  0x10   : > { %s166_s18 = scalar_lea.vmem %s4579_s0, %s2599_s16  ;;  %s3071_s21 = scalar_lea.vmem %s4582_s3, %s2599_s16 }
  0x11   : > { %v3078_v1 = vld [vmem:[%s166_s18] sm:$0xff]  ;;  %v3080_v2 = vld [vmem:[%s166_s18 + $0x8] sm:$0xff] }
  0x12   : > { %198 = vmatpush.msra.mxu0 %v3078_v1  ;;  %218 = vmatpush.msra.mxu1 %v3080_v2  ;;  %v176_v3 = vstv %s172_s24 }
  0x13   : > { %2577 = vmatmul.msk.f32.vlgmr.msra.gmra.mxu0 %vm179_vm0, %v3076_v0  ;;  %2578 = vmatmul.msk.f32.vlgmr.msra.gmra.mxu1 %vm179_vm0, %v3076_v0  ;;  %v3089_v4 = vmul.f32 %v176_v3, %v3078_v1  ;;  %v3092_v5 = vmul.f32 %v176_v3, %v3080_v2 }
  0x15   : > { %4647 = vst [vmem:[#allocation6_spill] sm:$0xff] %v3089_v4 }
  0x16   : > { %4648 = vst [vmem:[#allocation7_spill] sm:$0xff] %v3092_v5 }
  0x90   : > { %v200_v6 = vpop.f32.mrf.mxu0  ;;  %v220_v7 = vpop.f32.mrf.mxu1 }
  0x91   : > { %v3095_v8 = vadd.f32 %v200_v6, %v3089_v4  ;;  %v3098_v9 = vadd.f32 %v220_v7, %v3092_v5 }
  0x93   : > { %271 = vst [vmem:[#allocation2 + $0x30] sm:$0xff] %v3095_v8  ;;  %242 = vmatpush.msra.mxu2 %v3095_v8  ;;  %262 = vmatpush.msra.mxu3 %v3098_v9  ;;  %v3105_v10 = vsub.f32 %v3095_v8, %v3078_v1  ;;  %v3109_v11 = vsub.f32 %v3098_v9, %v3080_v2 }
  0x94   : > { %272 = vst [vmem:[#allocation2] sm:$0xff] %v3098_v9  ;;  %2579 = vmatmul.msk.f32.vlgmr.msra.gmra.mxu2 %vm179_vm0, %v3076_v0  ;;  %2580 = vmatmul.msk.f32.vlgmr.msra.gmra.mxu3 %vm179_vm0, %v3076_v0 }
  0x95   : > { %274 = vst [vmem:[#allocation3] sm:$0xff] %v3109_v11  ;;  %v281_v12 = vmul.f32 %v3105_v10, %v3105_v10  ;;  %v282_v13 = vmul.f32 %v3109_v11, %v3109_v11 }
  0x96   : > { %273 = vst [vmem:[#allocation3 + $0x48] sm:$0xff] %v3105_v10 }
  0x97   : > { %v283_v14 = vadd.f32 %v282_v13, %v281_v12 }
  0x99   : > { %284 = vadd.xlane.f32.xlu0 %v283_v14 }
 0x10c   : > { %v285_v27 = vpop.xlane.xlu0 %284 }
 0x10d   : > { %v286_v28 = vrot.slane %v285_v27, 4 }
 0x10f   : > { %v287_v29 = vadd.f32 %v286_v28, %v285_v27 }
 0x111   : > { %v288_v30 = vrot.slane %v287_v29, 2 }
 0x113   : > { %v289_v31 = vadd.f32 %v288_v30, %v287_v29 }
 0x115   : > { %v290_v32 = vrot.slane %v289_v31, 1 }
 0x117   : > { %v244_v15 = vpop.f32.mrf.mxu2  ;;  %v264_v16 = vpop.f32.mrf.mxu3  ;;  %v3148_v33 = vadd.f32 %v290_v32, %v289_v31  }
 0x118   : > { %v3123_v17 = vadd.f32 %v244_v15, %v3089_v4  ;;  %v3126_v18 = vadd.f32 %v264_v16, %v3092_v5 }
 0x119   : > { %4650 = vst [vmem:[#allocation9_spill] sm:$0xff] %v3148_v33  ;;  %v314_v34 = vadd.f32 0.0001, %v3148_v33 }
 0x11a   : > { %v3130_v19 = vsub.f32 %v3123_v17, %v3095_v8  ;;  %276 = vst [vmem:[#allocation2 + $0x18] sm:$0xff] %v3123_v17  ;;  %v3135_v20 = vsub.f32 %v3126_v18, %v3098_v9 }
 0x11b   : > { %277 = vst [vmem:[#allocation2 + $0x10] sm:$0xff] %v3126_v18  ;;  %2761 = vrcp.f32 %v314_v34 }
 0x11c   : > { %4649 = vst [vmem:[#allocation8_spill] sm:$0xff] %v3135_v20  ;;  %v303_v21 = vmul.f32 %v3130_v19, %v3130_v19  ;;  %v304_v22 = vmul.f32 %v3135_v20, %v3135_v20  ;;  %v292_v23 = vmul.f32 %v3130_v19, %v3105_v10  ;;  %v293_v24 = vmul.f32 %v3135_v20, %v3109_v11 }
 0x11d   : > { %279 = vst [vmem:[#allocation3 + $0x10] sm:$0xff] %v3130_v19 }
 0x11e   : > { %280 = vst [vmem:[#allocation3 + $0x40] sm:$0xff] %v3135_v20  ;;  %v305_v25 = vadd.f32 %v304_v22, %v303_v21  ;;  %v294_v26 = vadd.f32 %v293_v24, %v292_v23 }
 0x120   : > { %306 = vadd.xlane.f32.xlu1 %v305_v25  ;;  %295 = vadd.xlane.f32.xlu0 %v294_v26 }
 0x121   : > { %v2762_v35 = vpop.eup %2761 }
 0x122   : > { %v317_v40 = vmul.f32 %v2762_v35, %v314_v34 }
 0x124   : > { %v318_v45 = vsub.f32 2.0, %v317_v40 }
 0x126   : > { %v3151_v50 = vmul.f32 %v2762_v35, %v318_v45 }
 0x193   : > { %v307_v36 = vpop.xlane.xlu1 %306  ;;  %v296_v37 = vpop.xlane.xlu0 %295 }
 0x194   : > { %v308_v38 = vrot.slane %v307_v36, 4  ;;  %v297_v39 = vrot.slane %v296_v37, 4 }
 0x196   : > { %v309_v41 = vadd.f32 %v308_v38, %v307_v36  ;;  %v298_v42 = vadd.f32 %v297_v39, %v296_v37 }
 0x198   : > { %v310_v43 = vrot.slane %v309_v41, 2  ;;  %v299_v44 = vrot.slane %v298_v42, 2 }
 0x19a   : > { %v311_v46 = vadd.f32 %v310_v43, %v309_v41  ;;  %v300_v47 = vadd.f32 %v299_v44, %v298_v42 }
 0x19c   : > { %v312_v48 = vrot.slane %v311_v46, 1  ;;  %v301_v49 = vrot.slane %v300_v47, 1 }
 0x19e   : > { %v3153_v51 = vadd.f32 %v312_v48, %v311_v46   ;;  %v3155_v52 = vadd.f32 %v301_v49, %v300_v47  }
 0x1a0   : > { %4651 = vst [vmem:[#allocation10_spill] sm:$0xff] %v3153_v51  ;;  %v3159_v53 = vmul.f32 %v3151_v50, %v3155_v52  ;;  %v315_v54 = vadd.f32 0.0001, %v3153_v51 }
 0x1a2   : > { %v321_v55 = vmul.f32 %v3159_v53, %v3155_v52  ;;  %v3165_v60 = vsub.f32 1.0, %v3159_v53 }
 0x1a4   : > { %v322_v56 = vsub.f32 %v315_v54, %v321_v55 }
 0x1a6   : > { %2763 = vrcp.f32 %v322_v56 }
 0x1ac   : > { %v2764_v57 = vpop.eup %2763 }
 0x1ad   : > { %v325_v58 = vmul.f32 %v2764_v57, %v322_v56 }
 0x1af   : > { %v326_v59 = vsub.f32 2.0, %v325_v58 }
 0x1b1   : > { %v3167_v61 = vmul.f32 %v2764_v57, %v326_v59 }
 0x1b3   : > { %v328_v62 = vmul.f32 %v3167_v61, %v3165_v60 }
 0x1b5   : > { %v329_v63 = vmul.f32 %v328_v62, %v3155_v52 }
 0x1b7   : > { %v330_v3 = vsub.f32 1.0, %v329_v63 }
 0x1b9   : > { %v331_v6 = vmul.f32 %v330_v3, %v3151_v50 }
 0x1bb   : > { %v332_v7 = vadd.f32 %v331_v6, %v328_v62 }
 0x1bd   : > { %2765 = vrcp.f32 %v332_v7 }
 0x1c3   : > { %v2766_v12 = vpop.eup %2765 }
 0x1c4   : > { %v334_v13 = vmul.f32 %v2766_v12, %v332_v7 }
 0x1c6   : > { %v335_v14 = vsub.f32 2.0, %v334_v13 }
 0x1c8   : > { %v336_v15 = vmul.f32 %v2766_v12, %v335_v14 }
 0x1ca   : > { %v337_v16 = vmul.f32 %v336_v15, %v331_v6  ;;  %v338_v21 = vmul.f32 %v336_v15, %v328_v62 }
 0x1cc   : > { %v341_v22 = vmul.f32 %v337_v16, %v3095_v8  ;;  %v345_v23 = vmul.f32 %v338_v21, %v3123_v17  ;;  %v342_v24 = vmul.f32 %v337_v16, %v3098_v9  ;;  %v346_v25 = vmul.f32 %v338_v21, %v3126_v18 }
 0x1ce   : > { %v3177_v26 = vadd.f32 %v345_v23, %v341_v22  ;;  %v3179_v27 = vadd.f32 %v346_v25, %v342_v24 }
 0x1d0   : > { %364 = vmatpush.msrb.mxu0 %v3177_v26  ;;  %384 = vmatpush.msrb.mxu1 %v3179_v27 }
 0x1d1   : > { %2581 = vmatmul.msk.f32.vlgmr.msrb.gmra.mxu0 %vm179_vm0, %v3076_v0  ;;  %2582 = vmatmul.msk.f32.vlgmr.msrb.gmra.mxu1 %vm179_vm0, %v3076_v0 }
 0x24e   : > { %v366_v28 = vpop.f32.mrf.mxu0  ;;  %v386_v29 = vpop.f32.mrf.mxu1 }
 0x24f   : > { %v3188_v30 = vadd.f32 %v366_v28, %v3089_v4  ;;  %v3191_v31 = vadd.f32 %v386_v29, %v3092_v5 }
 0x251   : > { %v3195_v32 = vsub.f32 %v3188_v30, %v3177_v26  ;;  %431 = vst [vmem:[#allocation2 + $0x48] sm:$0xff] %v3188_v30  ;;  %v3200_v34 = vsub.f32 %v3191_v31, %v3179_v27 }
 0x252   : > { %432 = vst [vmem:[#allocation2 + $0x28] sm:$0xff] %v3191_v31 }
 0x253   : > { %4652 = vst [vmem:[#allocation11_spill] sm:$0xff] %v3195_v32  ;;  %v419_v35 = vmul.f32 %v3195_v32, %v3130_v19  ;;  %v420_v36 = vmul.f32 %v3200_v34, %v3135_v20  ;;  %v406_v37 = vmul.f32 %v3195_v32, %v3105_v10  ;;  %v407_v38 = vmul.f32 %v3200_v34, %v3109_v11 }
 0x254   : > { %4653 = vst [vmem:[#allocation12_spill] sm:$0xff] %v3200_v34  ;;  %v393_v41 = vmul.f32 %v3195_v32, %v3195_v32  ;;  %v394_v42 = vmul.f32 %v3200_v34, %v3200_v34 }
 0x255   : > { %434 = vst [vmem:[#allocation3 + $0x38] sm:$0xff] %v3195_v32  ;;  %v421_v39 = vadd.f32 %v420_v36, %v419_v35  ;;  %v408_v40 = vadd.f32 %v407_v38, %v406_v37 }
 0x256   : > { %435 = vst [vmem:[#allocation3 + $0x8] sm:$0xff] %v3200_v34  ;;  %v395_v43 = vadd.f32 %v394_v42, %v393_v41 }
 0x257   : > { %422 = vadd.xlane.f32.xlu2 %v421_v39  ;;  %409 = vadd.xlane.f32.xlu1 %v408_v40 }
 0x25f   : > { %396 = vadd.xlane.f32.xlu2 %v395_v43 }
 0x2ca   : > { %v423_v44 = vpop.xlane.xlu2 %422  ;;  %v410_v45 = vpop.xlane.xlu1 %409 }
 0x2cb   : > { %v424_v46 = vrot.slane %v423_v44, 4  ;;  %v411_v47 = vrot.slane %v410_v45, 4 }
 0x2cd   : > { %v425_v48 = vadd.f32 %v424_v46, %v423_v44  ;;  %v412_v49 = vadd.f32 %v411_v47, %v410_v45 }
 0x2cf   : > { %v426_v54 = vrot.slane %v425_v48, 2  ;;  %v413_v55 = vrot.slane %v412_v49, 2 }
 0x2d1   : > { %v427_v56 = vadd.f32 %v426_v54, %v425_v48  ;;  %v414_v57 = vadd.f32 %v413_v55, %v412_v49 }
 0x2d2   : > { %v397_v58 = vpop.xlane.xlu2 %396 }
 0x2d3   : > { %v415_v59 = vrot.slane %v414_v57, 1  ;;  %v398_v62 = vrot.slane %v397_v58, 4  ;;  %v428_v63 = vrot.slane %v427_v56, 1 }
 0x2d5   : > { %v3217_v3 = vadd.f32 %v415_v59, %v414_v57   ;;  %v399_v6 = vadd.f32 %v398_v62, %v397_v58  ;;  %v3223_v13 = vadd.f32 %v428_v63, %v427_v56  }
 0x2d7   : > { %v3221_v7 = vmul.f32 %v3217_v3, %v3151_v50  ;;  %v400_v12 = vrot.slane %v399_v6, 2  ;;  %4654 = vst [vmem:[#allocation13_spill] sm:$0xff] %v3223_v13  ;;  %v481_v22 = vmul.f32 %v3217_v3, %v3159_v53 }
 0x2d9   : > { %v401_v14 = vadd.f32 %v400_v12, %v399_v6  ;;  %v484_v15 = vmul.f32 %v3221_v7, %v3155_v52  ;;  %v3236_v25 = vsub.f32 %v3223_v13, %v481_v22  ;;  %v486_v28 = vmul.f32 %v3221_v7, %v3217_v3 }
 0x2da   : > { %v488_v41 = vsub.f32 1.0, %v3221_v7 }
 0x2db   : > { %v402_v16 = vrot.slane %v401_v14, 1  ;;  %v485_v21 = vsub.f32 %v3223_v13, %v484_v15 }
 0x2dd   : > { %v3230_v23 = vadd.f32 %v402_v16, %v401_v14   ;;  %v3233_v24 = vmul.f32 %v485_v21, %v3167_v61 }
 0x2df   : > { %v480_v29 = vadd.f32 0.0001, %v3230_v23  ;;  %v490_v36 = vmul.f32 %v3233_v24, %v3236_v25  ;;  %v492_v39 = vmul.f32 %v3233_v24, %v3165_v60  ;;  %vm454_vm5 = vcmp.eq.f32.partialorder %v3230_v23, inf }
 0x2e0   : > { %vm456_vm7 = vcmp.eq.f32.partialorder %v3230_v23, 0.0 }
 0x2e1   : > { %v487_v35 = vsub.f32 %v480_v29, %v486_v28  ;;  %v3246_v43 = vsub.f32 %v488_v41, %v492_v39 }
 0x2e3   : > { %v491_v37 = vsub.f32 %v487_v35, %v490_v36 }
 0x2e5   : > { %2767 = vrcp.f32 %v491_v37 }
 0x2eb   : > { %v2768_v38 = vpop.eup %2767 }
 0x2ec   : > { %v495_v40 = vmul.f32 %v2768_v38, %v491_v37 }
 0x2ee   : > { %v496_v42 = vsub.f32 2.0, %v495_v40 }
 0x2f0   : > { %v3248_v44 = vmul.f32 %v2768_v38, %v496_v42 }
 0x2f2   : > { %v498_v45 = vmul.f32 %v3248_v44, %v3246_v43 }
 0x2f4   : > { %v499_v46 = vmul.f32 %v498_v45, %v3236_v25  ;;  %v504_v55 = vmul.f32 %v498_v45, %v3217_v3 }
 0x2f6   : > { %v500_v47 = vsub.f32 %v3165_v60, %v499_v46 }
 0x2f8   : > { %v501_v48 = vmul.f32 %v500_v47, %v3167_v61 }
 0x2fa   : > { %v502_v49 = vmul.f32 %v501_v48, %v3155_v52 }
 0x2fc   : > { %v503_v54 = vsub.f32 1.0, %v502_v49 }
 0x2fe   : > { %v505_v56 = vsub.f32 %v503_v54, %v504_v55 }
 0x300   : > { %v506_v57 = vmul.f32 %v505_v56, %v3151_v50 }
 0x302   : > { %v507_v58 = vadd.f32 %v506_v57, %v501_v48 }
 0x304   : > { %v508_v59 = vadd.f32 %v507_v58, %v498_v45 }
 0x306   : > { %2769 = vrcp.f32 %v508_v59 }
 0x307   : > { %2771 = vrsqrt.f32 %v3230_v23 }
 0x30c   : > { %v2770_v62 = vpop.eup %2769 }
 0x30d   : > { %v510_v63 = vmul.f32 %v2770_v62, %v508_v59 }
 0x30f   : > { %v511_v6 = vsub.f32 2.0, %v510_v63 }
 0x311   : > { %v512_v12 = vmul.f32 %v2770_v62, %v511_v6 }
 0x313   : > { %v513_v14 = vmul.f32 %v512_v12, %v506_v57  ;;  %v514_v15 = vmul.f32 %v512_v12, %v501_v48  ;;  %v515_v16 = vmul.f32 %v512_v12, %v498_v45 }
 0x315   : > { %v518_v21 = vmul.f32 %v513_v14, %v3095_v8  ;;  %v522_v22 = vmul.f32 %v514_v15, %v3123_v17  ;;  %v519_v28 = vmul.f32 %v513_v14, %v3098_v9  ;;  %v523_v29 = vmul.f32 %v514_v15, %v3126_v18 }
 0x316   : > { %v528_v36 = vmul.f32 %v515_v16, %v3188_v30  ;;  %v529_v38 = vmul.f32 %v515_v16, %v3191_v31  ;;  %v436_v14 = vmul.f32 %v3188_v30, %v3188_v30  ;;  %v437_v15 = vmul.f32 %v3191_v31, %v3191_v31 }
 0x317   : > { %v524_v35 = vadd.f32 %v522_v22, %v518_v21  ;;  %v525_v37 = vadd.f32 %v523_v29, %v519_v28 }
 0x318   : > { %v438_v28 = vadd.f32 %v437_v15, %v436_v14 }
 0x319   : > { %v3264_v39 = vadd.f32 %v528_v36, %v524_v35  ;;  %v3266_v40 = vadd.f32 %v529_v38, %v525_v37 }
 0x31b   : > { %547 = vmatpush.msrb.mxu2 %v3264_v39  ;;  %567 = vmatpush.msrb.mxu3 %v3266_v40 }
 0x31c   : > { %2583 = vmatmul.msk.f32.vlgmr.msrb.gmra.mxu2 %vm179_vm0, %v3076_v0  ;;  %2584 = vmatmul.msk.f32.vlgmr.msrb.gmra.mxu3 %vm179_vm0, %v3076_v0 }
 0x39f   : > { %v549_v41 = vpop.f32.mrf.mxu2  ;;  %v569_v45 = vpop.f32.mrf.mxu3 }
 0x3a0   : > { %v3275_v42 = vadd.f32 %v549_v41, %v3089_v4  ;;  %v3278_v46 = vadd.f32 %v569_v45, %v3092_v5 }
 0x3a2   : > { %v3282_v47 = vsub.f32 %v3275_v42, %v3264_v39  ;;  %627 = vst [vmem:[#allocation2 + $0x8] sm:$0xff] %v3275_v42  ;;  %v3287_v48 = vsub.f32 %v3278_v46, %v3266_v40  ;;  %v632_v6 = vmul.f32 %v3275_v42, %v3275_v42  ;;  %v633_v12 = vmul.f32 %v3278_v46, %v3278_v46 }
 0x3a3   : > { %628 = vst [vmem:[#allocation2 + $0x20] sm:$0xff] %v3278_v46 }
 0x3a4   : > { %4655 = vst [vmem:[#allocation14_spill] sm:$0xff] %v3282_v47  ;;  %v615_v49 = vmul.f32 %v3282_v47, %v3195_v32  ;;  %v602_v54 = vmul.f32 %v3282_v47, %v3130_v19  ;;  %v589_v55 = vmul.f32 %v3282_v47, %v3105_v10  ;;  %v616_v56 = vmul.f32 %v3287_v48, %v3200_v34 }
 0x3a5   : > { %4656 = vst [vmem:[#allocation15_spill] sm:$0xff] %v3287_v48  ;;  %v603_v57 = vmul.f32 %v3287_v48, %v3135_v20  ;;  %v590_v58 = vmul.f32 %v3287_v48, %v3109_v11  ;;  %v576_v16 = vmul.f32 %v3282_v47, %v3282_v47  ;;  %v577_v21 = vmul.f32 %v3287_v48, %v3287_v48 }
 0x3a6   : > { %630 = vst [vmem:[#allocation3 + $0x30] sm:$0xff] %v3282_v47  ;;  %v617_v59 = vadd.f32 %v616_v56, %v615_v49  ;;  %v634_v22 = vadd.f32 %v633_v12, %v632_v6 }
 0x3a7   : > { %631 = vst [vmem:[#allocation3 + $0x18] sm:$0xff] %v3287_v48  ;;  %v604_v62 = vadd.f32 %v603_v57, %v602_v54  ;;  %v591_v63 = vadd.f32 %v590_v58, %v589_v55  ;;  %v578_v29 = vadd.f32 %v577_v21, %v576_v16 }
 0x3a8   : > { %618 = vadd.xlane.f32.xlu2 %v617_v59 }
 0x3a9   : > { %605 = vadd.xlane.f32.xlu1 %v604_v62  ;;  %592 = vadd.xlane.f32.xlu0 %v591_v63 }
 0x3b0   : > { %635 = vadd.xlane.f32.xlu2 %v634_v22 }
 0x3b1   : > { %439 = vadd.xlane.f32.xlu1 %v438_v28  ;;  %579 = vadd.xlane.f32.xlu0 %v578_v29 }
 0x41b   : > { %v619_v35 = vpop.xlane.xlu2 %618 }
 0x41c   : > { %v606_v36 = vpop.xlane.xlu1 %605  ;;  %v620_v37 = vrot.slane %v619_v35, 4  ;;  %v593_v41 = vpop.xlane.xlu0 %592 }
 0x41d   : > { %v607_v38 = vrot.slane %v606_v36, 4  ;;  %v594_v45 = vrot.slane %v593_v41, 4 }
 0x41e   : > { %v621_v54 = vadd.f32 %v620_v37, %v619_v35 }
 0x41f   : > { %v608_v49 = vadd.f32 %v607_v38, %v606_v36  ;;  %v595_v55 = vadd.f32 %v594_v45, %v593_v41 }
 0x420   : > { %v622_v58 = vrot.slane %v621_v54, 2 }
 0x421   : > { %v609_v56 = vrot.slane %v608_v49, 2  ;;  %v596_v57 = vrot.slane %v595_v55, 2 }
 0x422   : > { %v623_v29 = vadd.f32 %v622_v58, %v621_v54  ;;  %v2772_v58 = vpop.eup %2771 }
 0x423   : > { %v610_v59 = vadd.f32 %v609_v56, %v608_v49  ;;  %v597_v62 = vadd.f32 %v596_v57, %v595_v55  ;;  %v636_v63 = vpop.xlane.xlu2 %635 }
 0x424   : > { %v440_v6 = vpop.xlane.xlu1 %439  ;;  %v637_v12 = vrot.slane %v636_v63, 4  ;;  %v580_v15 = vpop.xlane.xlu0 %579  ;;  %v624_v33 = vrot.slane %v623_v29, 1 }
 0x425   : > { %v441_v14 = vrot.slane %v440_v6, 4  ;;  %v598_v16 = vrot.slane %v597_v62, 1  ;;  %v581_v21 = vrot.slane %v580_v15, 4  ;;  %v611_v36 = vrot.slane %v610_v59, 1 }
 0x426   : > { %v638_v22 = vadd.f32 %v637_v12, %v636_v63 }
 0x427   : > { %v442_v28 = vadd.f32 %v441_v14, %v440_v6  ;;  %v3317_v35 = vadd.f32 %v598_v16, %v597_v62   ;;  %v582_v37 = vadd.f32 %v581_v21, %v580_v15  ;;  %v3325_v63 = vadd.f32 %v611_v36, %v610_v59  }
 0x428   : > { %v639_v38 = vrot.slane %v638_v22, 2  ;;  %v3337_v59 = vadd.f32 %v624_v33, %v623_v29  }
 0x429   : > { %v443_v41 = vrot.slane %v442_v28, 2  ;;  %v677_v45 = vmul.f32 %v3317_v35, %v3159_v53  ;;  %v3323_v49 = vmul.f32 %v3317_v35, %v3151_v50  ;;  %v583_v55 = vrot.slane %v582_v37, 2  ;;  %4657 = vst [vmem:[#allocation16_spill] sm:$0xff] %v3325_v63 }
 0x42a   : > { %v640_v56 = vadd.f32 %v639_v38, %v638_v22  ;;  %4658 = vst [vmem:[#allocation17_spill] sm:$0xff] %v3337_v59  ;;  %v679_v22 = vmul.f32 %v3317_v35, %v3221_v7  ;;  %v448_v38 = vmul.f32 %v2772_v58, %v3230_v23 }
 0x42b   : > { %v444_v57 = vadd.f32 %v443_v41, %v442_v28  ;;  %v682_v54 = vmul.f32 %v3323_v49, %v3155_v52  ;;  %v3330_v12 = vsub.f32 %v3325_v63, %v677_v45  ;;  %v684_v14 = vmul.f32 %v3323_v49, %v3217_v3 }
 0x42c   : > { %v641_v62 = vrot.slane %v640_v56, 1  ;;  %v584_v15 = vadd.f32 %v583_v55, %v582_v37  ;;  %v680_v29 = vsub.f32 %v3337_v59, %v679_v22  ;;  %v449_v55 = vmul.f32 %v2772_v58, %v448_v38 }
 0x42d   : > { %v445_v6 = vrot.slane %v444_v57, 1  ;;  %v683_v53 = vsub.f32 %v3325_v63, %v682_v54  ;;  %v685_v41 = vsub.f32 %v3337_v59, %v684_v14  ;;  %v689_v45 = vmul.f32 %v3330_v12, %v3233_v24 }
 0x42e   : > { %v642_v16 = vadd.f32 %v641_v62, %v640_v56  ;;  %v585_v36 = vrot.slane %v584_v15, 1  ;;  %v686_v56 = vmul.f32 %v3323_v49, %v3317_v35  ;;  %v450_v22 = vmul.f32 0.5, %v449_v55 }
 0x42f   : > { %v3335_v21 = vadd.f32 %v445_v6, %v444_v57  ;;  %v691_v28 = vmul.f32 %v683_v53, %v3167_v61  ;;  %v690_v57 = vsub.f32 %v680_v29, %v689_v45 }
 0x430   : > { %2773 = vrsqrt.f32 %v642_v16  ;;  %v3348_v33 = vadd.f32 %v585_v36, %v584_v15   ;;  %vm662_vm1 = vcmp.eq.f32.partialorder %v642_v16, inf  ;;  %vm664_vm2 = vcmp.eq.f32.partialorder %v642_v16, 0.0 }
 0x431   : > { %v692_v37 = vmul.f32 %v691_v28, %v3236_v25  ;;  %2775 = vrsqrt.f32 %v3335_v21  ;;  %v694_v53 = vmul.f32 %v691_v28, %v3330_v12  ;;  %vm466_vm3 = vcmp.eq.f32.partialorder %v3335_v21, inf }
 0x432   : > { %2777 = vrsqrt.f32 %v3348_v33  ;;  %v676_v24 = vadd.f32 0.0001, %v3348_v33  ;;  %vm468_vm4 = vcmp.eq.f32.partialorder %v3335_v21, 0.0  ;;  %vm650_vm6 = vcmp.eq.f32.partialorder %v3348_v33, inf }
 0x433   : > { %v693_v7 = vsub.f32 %v685_v41, %v692_v37  ;;  %vm652_vm8 = vcmp.eq.f32.partialorder %v3348_v33, 0.0 }
 0x434   : > { %v687_v36 = vsub.f32 %v676_v24, %v686_v56  ;;  %v688_v24 = vsub.f32 1.0, %v3323_v49 }
 0x435   : > { %v698_v54 = vmul.f32 %v693_v7, %v3248_v44  ;;  %v451_v7 = vsub.f32 1.5, %v450_v22 }
 0x436   : > { %v2774_v62 = vpop.eup %2773  ;;  %v695_v37 = vsub.f32 %v687_v36, %v694_v53  ;;  %v665_v36 = vand.u32 2147483648, %v642_v16 }
 0x437   : > { %v2776_v6 = vpop.eup %2775  ;;  %v699_v14 = vmul.f32 %v698_v54, %v690_v57  ;;  %v656_v15 = vmul.f32 %v2774_v62, %v642_v16  ;;  %v452_v56 = vmul.f32 %v2772_v58, %v451_v7 }
 0x438   : > { %v460_v38 = vmul.f32 %v2776_v6, %v3335_v21  ;;  %v2778_v51 = vpop.eup %2777 }
 0x439   : > { %v657_v41 = vmul.f32 %v2774_v62, %v656_v15  ;;  %v644_v45 = vmul.f32 %v2778_v51, %v3348_v33  ;;  %v700_v29 = vsub.f32 %v695_v37, %v699_v14  ;;  %v696_v14 = vmul.f32 %v691_v28, %v3165_v60 }
 0x43a   : > { %v461_v13 = vmul.f32 %v2776_v6, %v460_v38 }
 0x43b   : > { %v658_v63 = vmul.f32 0.5, %v657_v41  ;;  %v645_v32 = vmul.f32 %v2778_v51, %v644_v45  ;;  %2779 = vrcp.f32 %v700_v29  ;;  %v457_v45 = vand.u32 2147483648, %v3230_v23 }
 0x43c   : > { %v462_v59 = vmul.f32 0.5, %v461_v13 }
 0x43d   : > { %v659_v34 = vsub.f32 1.5, %v658_v63  ;;  %v646_v20 = vmul.f32 0.5, %v645_v32  ;;  %v469_v32 = vand.u32 2147483648, %v3335_v21 }
 0x43e   : > { %v463_v48 = vsub.f32 1.5, %v462_v59 }
 0x43f   : > { %v660_v47 = vmul.f32 %v2774_v62, %v659_v34  ;;  %v647_v53 = vsub.f32 1.5, %v646_v20 }
 0x440   : > { %v464_v55 = vmul.f32 %v2776_v6, %v463_v48  ;;  %v697_v6 = vsub.f32 %v688_v24, %v696_v14  ;;  %v653_v24 = vand.u32 2147483648, %v3348_v33 }
 0x441   : > { %v661_v15 = vmul.f32 %v660_v47, %v642_v16  ;;  %v2780_v13 = vpop.eup %2779  ;;  %v701_v47 = vmul.f32 %v698_v54, %v3246_v43  ;;  %v648_v59 = vmul.f32 %v2778_v51, %v647_v53 }
 0x442   : > { %v465_v38 = vmul.f32 %v464_v55, %v3335_v21  ;;  %v704_v20 = vmul.f32 %v2780_v13, %v700_v29 }
 0x443   : > { %v663_v63 = vsel %vm662_vm1, %v642_v16, %v661_v15  ;;  %v453_v16 = vmul.f32 %v452_v56, %v3230_v23  ;;  %v702_v22 = vsub.f32 %v697_v6, %v701_v47  ;;  %v649_v37 = vmul.f32 %v648_v59, %v3348_v33 }
 0x444   : > { %v666_v34 = vsel %vm664_vm2, %v665_v36, %v663_v63  ;;  %v467_v48 = vsel %vm466_vm3, %v3335_v21, %v465_v38  ;;  %v705_v28 = vsub.f32 2.0, %v704_v20 }
 0x445   : > { %v667_v49 = vadd.f32 1e-05, %v666_v34  ;;  %v470_v58 = vsel %vm468_vm4, %v469_v32, %v467_v48  ;;  %v455_v54 = vsel %vm454_vm5, %v3230_v23, %v453_v16  ;;  %v651_v7 = vsel %vm650_vm6, %v3348_v33, %v649_v37 }
 0x446   : > { %v471_v62 = vadd.f32 1e-05, %v470_v58  ;;  %v706_v41 = vmul.f32 %v2780_v13, %v705_v28  ;;  %v458_v55 = vsel %vm456_vm7, %v457_v45, %v455_v54  ;;  %v654_v36 = vsel %vm652_vm8, %v653_v24, %v651_v7 }
 0x447   : > { %2781 = vrcp.f32 %v667_v49 }
 0x448   : > { %2783 = vrcp.f32 %v471_v62  ;;  %v707_v21 = vmul.f32 %v706_v41, %v702_v22 }
 0x44a   : > { %v708_v51 = vmul.f32 %v707_v21, %v690_v57  ;;  %v713_v32 = vmul.f32 %v707_v21, %v3330_v12 }
 0x44c   : > { %v709_v15 = vsub.f32 %v3246_v43, %v708_v51 }
 0x44d   : > { %v2782_v29 = vpop.eup %2781 }
 0x44e   : > { %v2784_v56 = vpop.eup %2783  ;;  %v710_v38 = vmul.f32 %v709_v15, %v3248_v44  ;;  %v669_v14 = vmul.f32 %v2782_v29, %v654_v36 }
 0x44f   : > { %v473_v53 = vmul.f32 %v2784_v56, %v458_v55 }
 0x450   : > { %v711_v57 = vmul.f32 %v710_v38, %v3236_v25  ;;  %v718_v12 = vmul.f32 %v710_v38, %v3217_v3 }
 0x451   : > { %vm474_vm9 = vcmp.lt.f32.partialorder %v473_v53, 1e+08 }
 0x452   : > { %v475_v13 = vsel %vm474_vm9, %v473_v53, 1e+08  ;;  %v478_v63 = vsel %vm474_vm9, %v3177_v26, %v3078_v1  ;;  %v479_v34 = vsel %vm474_vm9, %v3179_v27, %v3080_v2  ;;  %v712_v43 = vsub.f32 %v3165_v60, %v711_v57 }
 0x453   : > { %vm670_vm10 = vcmp.lt.f32.partialorder %v669_v14, %v475_v13  ;;  %v720_v27 = vmul.f32 %v707_v21, %v3317_v35 }
 0x454   : > { %v3386_v48 = vsel %vm670_vm10, %v669_v14, %v475_v13  ;;  %v3389_v44 = vsel %vm670_vm10, %v3264_v39, %v478_v63  ;;  %v3392_v47 = vsel %vm670_vm10, %v3266_v40, %v479_v34  ;;  %v714_v25 = vsub.f32 %v712_v43, %v713_v32 }
 0x456   : > { %v715_v20 = vmul.f32 %v714_v25, %v3167_v61  ;;  %v4659_v25 = vld [vmem:[#allocation8_spill] sm:$0xff] }
 0x458   : > { %v716_v1 = vmul.f32 %v715_v20, %v3155_v52 }
 0x45a   : > { %v717_v26 = vsub.f32 1.0, %v716_v1  ;;  %v4660_v1 = vld [vmem:[#allocation14_spill] sm:$0xff] }
 0x45c   : > { %v719_v2 = vsub.f32 %v717_v26, %v718_v12  ;;  %v4661_v12 = vld [vmem:[#allocation15_spill] sm:$0xff] }
 0x45e   : > { %v721_v60 = vsub.f32 %v719_v2, %v720_v27 }
 0x460   : > { %v722_v49 = vmul.f32 %v721_v60, %v3151_v50  ;;  %v4663_v60 = vld [vmem:[#allocation12_spill] sm:$0xff] }
 0x462   : > { %v723_v58 = vadd.f32 %v722_v49, %v715_v20 }
 0x464   : > { %v724_v39 = vadd.f32 %v723_v58, %v710_v38 }
 0x466   : > { %v725_v59 = vadd.f32 %v724_v39, %v707_v21 }
 0x468   : > { %2785 = vrcp.f32 %v725_v59 }
 0x46e   : > { %v2786_v40 = vpop.eup %2785 }
 0x46f   : > { %v727_v62 = vmul.f32 %v2786_v40, %v725_v59 }
 0x471   : > { %v728_v6 = vsub.f32 2.0, %v727_v62 }
 0x473   : > { %v729_v28 = vmul.f32 %v2786_v40, %v728_v6 }
 0x475   : > { %v730_v61 = vmul.f32 %v729_v28, %v722_v49  ;;  %v731_v16 = vmul.f32 %v729_v28, %v715_v20  ;;  %v732_v22 = vmul.f32 %v729_v28, %v710_v38  ;;  %v733_v41 = vmul.f32 %v729_v28, %v707_v21 }
 0x477   : > { %v736_v37 = vmul.f32 %v730_v61, %v3095_v8  ;;  %v740_v54 = vmul.f32 %v731_v16, %v3123_v17  ;;  %v737_v45 = vmul.f32 %v730_v61, %v3098_v9  ;;  %v741_v50 = vmul.f32 %v731_v16, %v3126_v18 }
 0x478   : > { %v746_v29 = vmul.f32 %v732_v22, %v3188_v30  ;;  %v747_v56 = vmul.f32 %v732_v22, %v3191_v31  ;;  %v752_v24 = vmul.f32 %v733_v41, %v3275_v42  ;;  %v753_v21 = vmul.f32 %v733_v41, %v3278_v46 }
 0x479   : > { %v742_v51 = vadd.f32 %v740_v54, %v736_v37  ;;  %v743_v7 = vadd.f32 %v741_v50, %v737_v45 }
 0x47b   : > { %v748_v55 = vadd.f32 %v746_v29, %v742_v51  ;;  %v749_v15 = vadd.f32 %v747_v56, %v743_v7 }
 0x47d   : > { %v3407_v53 = vadd.f32 %v752_v24, %v748_v55  ;;  %v3409_v8 = vadd.f32 %v753_v21, %v749_v15 }
 0x47f   : > { %771 = vmatpush.msra.mxu0 %v3407_v53  ;;  %791 = vmatpush.msra.mxu1 %v3409_v8 }
 0x480   : > { %2585 = vmatmul.msk.f32.vlgmr.msra.gmra.mxu0 %vm179_vm0, %v3076_v0  ;;  %2586 = vmatmul.msk.f32.vlgmr.msra.gmra.mxu1 %vm179_vm0, %v3076_v0 }
 0x4fd   : > { %v773_v9 = vpop.f32.mrf.mxu0  ;;  %v793_v18 = vpop.f32.mrf.mxu1 }
 0x4fe   : > { %v796_v17 = vadd.f32 %v773_v9, %v3089_v4  ;;  %v797_v30 = vadd.f32 %v793_v18, %v3092_v5 }
 0x500   : > { %v798_v31 = vsub.f32 %v796_v17, %v3407_v53  ;;  %864 = vst [vmem:[#allocation2 + $0x40] sm:$0xff] %v796_v17  ;;  %v869_v42 = vmul.f32 %v796_v17, %v796_v17  ;;  %v799_v46 = vsub.f32 %v797_v30, %v3409_v8  ;;  %v870_v36 = vmul.f32 %v797_v30, %v797_v30 }
 0x501   : > { %865 = vst [vmem:[#allocation2 + $0x38] sm:$0xff] %v797_v30 }
 0x502   : > { %867 = vst [vmem:[#allocation3 + $0x28] sm:$0xff] %v798_v31  ;;  %v813_v38 = vmul.f32 %v798_v31, %v3105_v10  ;;  %v800_v14 = vmul.f32 %v798_v31, %v798_v31  ;;  %v871_v57 = vadd.f32 %v870_v36, %v869_v42  ;;  %v814_v13 = vmul.f32 %v799_v46, %v3109_v11  ;;  %v4662_v10 = vld [vmem:[#allocation11_spill] sm:$0xff] }
 0x503   : > { %868 = vst [vmem:[#allocation3 + $0x20] sm:$0xff] %v799_v46  ;;  %v801_v63 = vmul.f32 %v799_v46, %v799_v46  ;;  %v826_v43 = vmul.f32 %v798_v31, %v3130_v19  ;;  %v827_v20 = vmul.f32 %v799_v46, %v4659_v25  ;;  %v852_v26 = vmul.f32 %v798_v31, %v4660_v1 }
 0x504   : > { %872 = vadd.xlane.f32.xlu0 %v871_v57  ;;  %v815_v32 = vadd.f32 %v814_v13, %v813_v38  ;;  %v853_v2 = vmul.f32 %v799_v46, %v4661_v12  ;;  %v839_v27 = vmul.f32 %v798_v31, %v4662_v10  ;;  %v840_v49 = vmul.f32 %v799_v46, %v4663_v60 }
 0x505   : > { %v802_v34 = vadd.f32 %v801_v63, %v800_v14  ;;  %v828_v58 = vadd.f32 %v827_v20, %v826_v43 }
 0x506   : > { %816 = vadd.xlane.f32.xlu2 %v815_v32  ;;  %v854_v11 = vadd.f32 %v853_v2, %v852_v26  ;;  %v841_v39 = vadd.f32 %v840_v49, %v839_v27 }
 0x507   : > { %803 = vadd.xlane.f32.xlu1 %v802_v34 }
 0x50c   : > { %829 = vadd.xlane.f32.xlu0 %v828_v58 }
 0x50e   : > { %855 = vadd.xlane.f32.xlu2 %v854_v11 }
 0x50f   : > { %842 = vadd.xlane.f32.xlu1 %v841_v39 }
 0x577   : > { %v873_v59 = vpop.xlane.xlu0 %872 }
 0x578   : > { %v874_v40 = vrot.slane %v873_v59, 4 }
 0x579   : > { %v817_v62 = vpop.xlane.xlu2 %816 }
 0x57a   : > { %v804_v19 = vpop.xlane.xlu1 %803  ;;  %v875_v6 = vadd.f32 %v874_v40, %v873_v59  ;;  %v818_v28 = vrot.slane %v817_v62, 4 }
 0x57b   : > { %v805_v61 = vrot.slane %v804_v19, 4 }
 0x57c   : > { %v876_v16 = vrot.slane %v875_v6, 2  ;;  %v819_v22 = vadd.f32 %v818_v28, %v817_v62 }
 0x57d   : > { %v806_v41 = vadd.f32 %v805_v61, %v804_v19 }
 0x57e   : > { %v877_v37 = vadd.f32 %v876_v16, %v875_v6  ;;  %v820_v54 = vrot.slane %v819_v22, 2 }
 0x57f   : > { %v807_v45 = vrot.slane %v806_v41, 2  ;;  %v830_v50 = vpop.xlane.xlu0 %829 }
 0x580   : > { %v878_v51 = vrot.slane %v877_v37, 1  ;;  %v821_v29 = vadd.f32 %v820_v54, %v819_v22  ;;  %v831_v56 = vrot.slane %v830_v50, 4 }
 0x581   : > { %v808_v7 = vadd.f32 %v807_v45, %v806_v41  ;;  %v856_v55 = vpop.xlane.xlu2 %855 }
 0x582   : > { %v843_v24 = vpop.xlane.xlu1 %842  ;;  %v879_v15 = vadd.f32 %v878_v51, %v877_v37  ;;  %v822_v21 = vrot.slane %v821_v29, 1  ;;  %v832_v17 = vadd.f32 %v831_v56, %v830_v50  ;;  %v857_v18 = vrot.slane %v856_v55, 4 }
 0x583   : > { %v809_v9 = vrot.slane %v808_v7, 1  ;;  %v844_v30 = vrot.slane %v843_v24, 4 }
 0x584   : > { %2787 = vrsqrt.f32 %v879_v15  ;;  %v823_v31 = vadd.f32 %v822_v21, %v821_v29   ;;  %v833_v46 = vrot.slane %v832_v17, 2  ;;  %v858_v36 = vadd.f32 %v857_v18, %v856_v55 }
 0x585   : > { %v810_v42 = vadd.f32 %v809_v9, %v808_v7   ;;  %v845_v38 = vadd.f32 %v844_v30, %v843_v24  ;;  %vm899_vm11 = vcmp.eq.f32.partialorder %v879_v15, inf  ;;  %v902_v19 = vand.u32 2147483648, %v879_v15 }
 0x586   : > { %v834_v14 = vadd.f32 %v833_v46, %v832_v17  ;;  %v859_v57 = vrot.slane %v858_v36, 2  ;;  %vm901_vm12 = vcmp.eq.f32.partialorder %v879_v15, 0.0 }
 0x587   : > { %2789 = vrsqrt.f32 %v810_v42  ;;  %v846_v13 = vrot.slane %v845_v38, 2  ;;  %vm887_vm13 = vcmp.eq.f32.partialorder %v810_v42, inf  ;;  %v890_v37 = vand.u32 2147483648, %v810_v42 }
 0x588   : > { %v835_v32 = vrot.slane %v834_v14, 1  ;;  %v860_v34 = vadd.f32 %v859_v57, %v858_v36  ;;  %vm889_vm14 = vcmp.eq.f32.partialorder %v810_v42, 0.0 }
 0x589   : > { %v847_v43 = vadd.f32 %v846_v13, %v845_v38 }
 0x58a   : > { %v2788_v63 = vpop.eup %2787  ;;  %v836_v20 = vadd.f32 %v835_v32, %v834_v14   ;;  %v861_v1 = vrot.slane %v860_v34, 1 }
 0x58b   : > { %v893_v25 = vmul.f32 %v2788_v63, %v879_v15  ;;  %v848_v26 = vrot.slane %v847_v43, 1 }
 0x58c   : > { %v862_v27 = vadd.f32 %v861_v1, %v860_v34  }
 0x58d   : > { %v2790_v12 = vpop.eup %2789  ;;  %v894_v2 = vmul.f32 %v2788_v63, %v893_v25  ;;  %v849_v60 = vadd.f32 %v848_v26, %v847_v43  }
 0x58e   : > { %v881_v10 = vmul.f32 %v2790_v12, %v810_v42 }
 0x58f   : > { %v895_v49 = vmul.f32 0.5, %v894_v2 }
 0x590   : > { %v882_v58 = vmul.f32 %v2790_v12, %v881_v10 }
 0x591   : > { %v896_v11 = vsub.f32 1.5, %v895_v49 }
 0x592   : > { %v883_v39 = vmul.f32 0.5, %v882_v58 }
 0x593   : > { %v897_v59 = vmul.f32 %v2788_v63, %v896_v11 }
 0x594   : > { %v884_v40 = vsub.f32 1.5, %v883_v39 }
 0x595   : > { %v898_v62 = vmul.f32 %v897_v59, %v879_v15 }
 0x596   : > { %v885_v6 = vmul.f32 %v2790_v12, %v884_v40 }
 0x597   : > { %v900_v28 = vsel %vm899_vm11, %v879_v15, %v898_v62 }
 0x598   : > { %v903_v61 = vsel %vm901_vm12, %v902_v19, %v900_v28  ;;  %v886_v22 = vmul.f32 %v885_v6, %v810_v42 }
 0x599   : > { %v904_v16 = vadd.f32 1e-05, %v903_v61 }
 0x59a   : > { %v888_v41 = vsel %vm887_vm13, %v810_v42, %v886_v22 }
 0x59b   : > { %2791 = vrcp.f32 %v904_v16  ;;  %v891_v45 = vsel %vm889_vm14, %v890_v37, %v888_v41 }
 0x5a1   : > { %v2792_v54 = vpop.eup %2791 }
 0x5a2   : > { %v906_v50 = vmul.f32 %v2792_v54, %v891_v45 }
 0x5a4   : > { %vm907_vm15 = vcmp.lt.f32.partialorder %v906_v50, %v3386_v48 }
 0x5a5   : > { %v908_v51 = vsel %vm907_vm15, %v906_v50, %v3386_v48   ;;  %v911_v29 = vsel %vm907_vm15, %v3407_v53, %v3389_v44   ;;  %v912_v7 = vsel %vm907_vm15, %v3409_v8, %v3392_v47   ;;  %v4664_v48 = vld [vmem:[#allocation17_spill] sm:$0xff]  ;;  %v4665_v44 = vld [vmem:[#allocation16_spill] sm:$0xff]  ;;  %v4667_v53 = vld [vmem:[#allocation10_spill] sm:$0xff] }
 0x5a6   : > { %v4666_v47 = vld [vmem:[#allocation13_spill] sm:$0xff] }
 0x5a7   : > { %v4668_v8 = vld [vmem:[#allocation9_spill] sm:$0xff] }
 0x5a8 LB: >> { %v4669_v0 = vld [vmem:[#allocation5_spill] sm:$0xff]  ;;  %v4670_v4 = vld [vmem:[#allocation6_spill] sm:$0xff]  ;;  %v4671_v5 = vld [vmem:[#allocation7_spill] sm:$0xff]  ;;  %4672 = vst [vmem:[#allocation18_spill] sm:$0xff] %v2960_v7  ;;  %v937_v56 = vadd.f32 0.0001, %v3028_v8  ;;  %v2968_v51 = vphi %v908_v51, %v2447_v51   ;;  %v2964_v29 = vphi %v911_v29, %v4757_v29   ;;  %v2960_v7 = vphi %v912_v7, %v4756_v7   ;;  %s3032_s25 = sphi %s3481_s25, %s918_s25   ;;  %v3028_v8 = vphi %v4668_v8, %v4730_v8   ;;  %v3024_v52 = vphi %v3155_v52, %v4765_v52   ;;  %v3020_v3 = vphi %v3217_v3, %v4764_v3   ;;  %v3016_v35 = vphi %v3317_v35, %v4763_v35   ;;  %v3012_v31 = vphi %v823_v31, %v4510_v31   ;;  %v3008_v53 = vphi %v4667_v53, %v4733_v53   ;;  %v3004_v47 = vphi %v4666_v47, %v4762_v47   ;;  %v3000_v44 = vphi %v4665_v44, %v4761_v44   ;;  %v2996_v20 = vphi %v836_v20, %v2377_v20   ;;  %v2992_v23 = vphi %v3230_v23, %v4760_v23   ;;  %v2988_v48 = vphi %v4664_v48, %v4759_v48   ;;  %v2984_v60 = vphi %v849_v60, %v2390_v60   ;;  %v2980_v33 = vphi %v3348_v33, %v4758_v33   ;;  %v2976_v27 = vphi %v862_v27, %v2403_v27   ;;  %v2972_v42 = vphi %v810_v42, %v2351_v42  }
 0x5a9   : >> { %4673 = vst [vmem:[#allocation19_spill] sm:$0xff] %v2964_v29  ;;  %v3538_v17 = vadd.f32 0.0001, %v3008_v53  ;;  %v3551_v13 = vadd.f32 0.0001, %v2992_v23  ;;  %s918_s25 = sadd.s32 1, %s3032_s25  }
 0x5aa   : >> { %4674 = vst [vmem:[#allocation20_spill] sm:$0xff] %v2968_v51  ;;  %2793 = vrcp.f32 %v937_v56  ;;  %v3588_v28 = vadd.f32 0.0001, %v2980_v33  ;;  %p4519_p4 = scmp.ge.s32.totalorder %s918_s25, 7  }
 0x5b0   : >> { %v2794_v55 = vpop.eup %2793 }
 0x5b1   : >> { %v943_v24 = vmul.f32 %v2794_v55, %v937_v56 }
 0x5b3   : >> { %v944_v15 = vsub.f32 2.0, %v943_v24 }
 0x5b5   : >> { %v3532_v21 = vmul.f32 %v2794_v55, %v944_v15 }
 0x5b7   : >> { %v3536_v9 = vmul.f32 %v3024_v52, %v3532_v21  ;;  %v3545_v46 = vmul.f32 %v3020_v3, %v3532_v21  ;;  %v3558_v34 = vmul.f32 %v3016_v35, %v3532_v21  ;;  %v3572_v10 = vmul.f32 %v3012_v31, %v3532_v21 }
 0x5b9   : >> { %v947_v18 = vmul.f32 %v3024_v52, %v3536_v9  ;;  %v957_v36 = vmul.f32 %v3024_v52, %v3545_v46  ;;  %v949_v14 = vmul.f32 %v3020_v3, %v3536_v9  ;;  %v959_v32 = vmul.f32 %v3020_v3, %v3545_v46 }
 0x5ba   : >> { %v967_v23 = vmul.f32 %v3024_v52, %v3558_v34  ;;  %v951_v11 = vmul.f32 %v3016_v35, %v3536_v9  ;;  %v977_v39 = vmul.f32 %v3024_v52, %v3572_v10  ;;  %v969_v59 = vmul.f32 %v3020_v3, %v3558_v34 }
 0x5bb   : >> { %v948_v30 = vsub.f32 %v3538_v17, %v947_v18  ;;  %v958_v63 = vsub.f32 %v3004_v47, %v957_v36  ;;  %v3561_v25 = vsub.f32 %v3004_v47, %v949_v14  ;;  %v960_v26 = vsub.f32 %v3551_v13, %v959_v32 }
 0x5bc   : >> { %v968_v49 = vsub.f32 %v3000_v44, %v967_v23  ;;  %v3583_v62 = vsub.f32 %v3000_v44, %v951_v11  ;;  %v961_v19 = vmul.f32 %v3016_v35, %v3545_v46  ;;  %v978_v6 = vsub.f32 %v2996_v20, %v977_v39 }
 0x5bd   : >> { %2795 = vrcp.f32 %v948_v30  ;;  %v970_v61 = vsub.f32 %v2988_v48, %v969_v59  ;;  %v971_v16 = vmul.f32 %v3016_v35, %v3558_v34  ;;  %v979_v50 = vmul.f32 %v3020_v3, %v3572_v10 }
 0x5be   : >> { %v962_v37 = vsub.f32 %v2988_v48, %v961_v19  ;;  %v953_v24 = vmul.f32 %v3012_v31, %v3536_v9  ;;  %v3623_v11 = vadd.f32 0.0001, %v2972_v42  ;;  %v983_v59 = vmul.f32 %v3012_v31, %v3572_v10 }
 0x5bf   : >> { %v972_v33 = vsub.f32 %v3588_v28, %v971_v16 }
 0x5c0   : >> { %v984_v42 = vsub.f32 %v3623_v11, %v983_v59  ;;  %v985_v59 = vsub.f32 1.0, %v3572_v10 }
 0x5c3   : >> { %v2796_v38 = vpop.eup %2795 }
 0x5c4   : >> { %v987_v57 = vmul.f32 %v2796_v38, %v948_v30  ;;  %v980_v30 = vsub.f32 %v2984_v60, %v979_v50 }
 0x5c6   : >> { %v988_v43 = vsub.f32 2.0, %v987_v57  ;;  %v3611_v57 = vsub.f32 %v2996_v20, %v953_v24 }
 0x5c8   : >> { %v3563_v1 = vmul.f32 %v2796_v38, %v988_v43  ;;  %v981_v43 = vmul.f32 %v3016_v35, %v3572_v10 }
 0x5ca   : >> { %v990_v12 = vmul.f32 %v3563_v1, %v958_v63  ;;  %v999_v40 = vmul.f32 %v3563_v1, %v968_v49  ;;  %v1008_v53 = vmul.f32 %v3563_v1, %v978_v6  ;;  %v963_v63 = vmul.f32 %v3012_v31, %v3545_v46 }
 0x5cb   : >> { %v973_v49 = vmul.f32 %v3012_v31, %v3558_v34  ;;  %v982_v39 = vsub.f32 %v2976_v27, %v981_v43  ;;  %v975_v43 = vsub.f32 1.0, %v3558_v34 }
 0x5cc   : >> { %v991_v2 = vmul.f32 %v990_v12, %v3561_v25  ;;  %v1000_v22 = vmul.f32 %v999_v40, %v3561_v25  ;;  %v993_v54 = vmul.f32 %v990_v12, %v3583_v62  ;;  %v1002_v56 = vmul.f32 %v999_v40, %v3583_v62 }
 0x5cd   : >> { %v1009_v36 = vmul.f32 %v1008_v53, %v3561_v25  ;;  %v1011_v19 = vmul.f32 %v1008_v53, %v3583_v62 }
 0x5ce   : >> { %v992_v58 = vsub.f32 %v960_v26, %v991_v2  ;;  %v1001_v8 = vsub.f32 %v970_v61, %v1000_v22  ;;  %v3603_v15 = vsub.f32 %v962_v37, %v993_v54  ;;  %v1003_v38 = vsub.f32 %v972_v33, %v1002_v56 }
 0x5cf   : >> { %v1010_v26 = vsub.f32 %v980_v30, %v1009_v36  ;;  %v964_v2 = vsub.f32 %v2984_v60, %v963_v63  ;;  %v974_v61 = vsub.f32 %v2976_v27, %v973_v49  ;;  %v1004_v22 = vmul.f32 %v999_v40, %v3611_v57 }
 0x5d0   : >> { %2797 = vrcp.f32 %v992_v58  ;;  %v1012_v37 = vsub.f32 %v982_v39, %v1011_v19  ;;  %v1013_v54 = vmul.f32 %v1008_v53, %v3611_v57 }
 0x5d1   : >> { %v1005_v33 = vsub.f32 %v974_v61, %v1004_v22 }
 0x5d2   : >> { %v1014_v30 = vsub.f32 %v984_v42, %v1013_v54 }
 0x5d6   : >> { %v2798_v41 = vpop.eup %2797 }
 0x5d7   : >> { %v1018_v45 = vmul.f32 %v2798_v41, %v992_v58  ;;  %v995_v58 = vmul.f32 %v990_v12, %v3611_v57 }
 0x5d9   : >> { %v1019_v55 = vsub.f32 2.0, %v1018_v45  ;;  %v996_v16 = vsub.f32 %v964_v2, %v995_v58 }
 0x5db   : >> { %v3605_v18 = vmul.f32 %v2798_v41, %v1019_v55  ;;  %v955_v41 = vsub.f32 1.0, %v3536_v9  ;;  %v965_v55 = vsub.f32 1.0, %v3545_v46 }
 0x5dd   : >> { %v1021_v14 = vmul.f32 %v3605_v18, %v1001_v8  ;;  %v1028_v6 = vmul.f32 %v3605_v18, %v1010_v26  ;;  %v997_v24 = vmul.f32 %v990_v12, %v955_v41  ;;  %v1006_v2 = vmul.f32 %v999_v40, %v955_v41 }
 0x5df   : >> { %v1022_v32 = vmul.f32 %v1021_v14, %v3603_v15  ;;  %v1029_v45 = vmul.f32 %v1028_v6, %v3603_v15  ;;  %v1024_v8 = vmul.f32 %v1021_v14, %v996_v16  ;;  %v998_v26 = vsub.f32 %v965_v55, %v997_v24 }
 0x5e0   : >> { %v1007_v19 = vsub.f32 %v975_v43, %v1006_v2 }
 0x5e1   : >> { %v1023_v23 = vsub.f32 %v1003_v38, %v1022_v32  ;;  %v1030_v36 = vsub.f32 %v1012_v37, %v1029_v45  ;;  %v1031_v38 = vmul.f32 %v1028_v6, %v996_v16  ;;  %v1025_v32 = vsub.f32 %v1005_v33, %v1024_v8 }
 0x5e2   : >> { %v1026_v61 = vmul.f32 %v1021_v14, %v998_v26  ;;  %v1033_v42 = vmul.f32 %v1028_v6, %v998_v26 }
 0x5e3   : >> { %2799 = vrcp.f32 %v1023_v23  ;;  %v1032_v49 = vsub.f32 %v1014_v30, %v1031_v38 }
 0x5e4   : >> { %v1027_v22 = vsub.f32 %v1007_v19, %v1026_v61 }
 0x5e9   : >> { %v2800_v50 = vpop.eup %2799 }
 0x5ea   : >> { %v1036_v56 = vmul.f32 %v2800_v50, %v1023_v23  ;;  %v1015_v23 = vmul.f32 %v1008_v53, %v955_v41 }
 0x5ec   : >> { %v1037_v63 = vsub.f32 2.0, %v1036_v56  ;;  %v1016_v12 = vsub.f32 %v985_v59, %v1015_v23 }
 0x5ee   : >> { %v1038_v9 = vmul.f32 %v2800_v50, %v1037_v63  ;;  %v1034_v37 = vsub.f32 %v1016_v12, %v1033_v42 }
 0x5f0   : >> { %v1039_v58 = vmul.f32 %v1038_v9, %v1030_v36 }
 0x5f2   : >> { %v1040_v39 = vmul.f32 %v1039_v58, %v1025_v32  ;;  %v1042_v54 = vmul.f32 %v1039_v58, %v1027_v22 }
 0x5f4   : >> { %v1041_v46 = vsub.f32 %v1032_v49, %v1040_v39  ;;  %v1043_v34 = vsub.f32 %v1034_v37, %v1042_v54  ;;  %v1087_v37 = vld [vmem:[#allocation2] sm:$0xff]  ;;  %v3656_v54 = vld [vmem:[#allocation2 + $0x28] sm:$0xff] }
 0x5f6   : >> { %2801 = vrcp.f32 %v1041_v46 }
 0x5fc   : >> { %v2802_v45 = vpop.eup %2801 }
 0x5fd   : >> { %v1045_v50 = vmul.f32 %v2802_v45, %v1041_v46  ;;  %v3650_v46 = vld [vmem:[#allocation2 + $0x18] sm:$0xff] }
 0x5ff   : >> { %v1046_v33 = vsub.f32 2.0, %v1045_v50 }
 0x601   : >> { %v1047_v40 = vmul.f32 %v2802_v45, %v1046_v33  ;;  %v3658_v45 = vld [vmem:[#allocation2 + $0x8] sm:$0xff] }
 0x603   : >> { %v1048_v8 = vmul.f32 %v1047_v40, %v1043_v34 }
 0x605   : >> { %v1049_v56 = vmul.f32 %v1048_v8, %v1025_v32  ;;  %v1054_v53 = vmul.f32 %v1048_v8, %v996_v16  ;;  %v1061_v43 = vmul.f32 %v1048_v8, %v3611_v57 }
 0x607   : >> { %v1050_v55 = vsub.f32 %v1027_v22, %v1049_v56  ;;  %v3662_v56 = vld [vmem:[#allocation2 + $0x20] sm:$0xff] }
 0x609   : >> { %v1051_v24 = vmul.f32 %v1050_v55, %v1038_v9  ;;  %v3664_v55 = vld [vmem:[#allocation2 + $0x40] sm:$0xff] }
 0x60b   : >> { %v1052_v10 = vmul.f32 %v1051_v24, %v3603_v15  ;;  %v1059_v38 = vmul.f32 %v1051_v24, %v3583_v62 }
 0x60d   : >> { %v1053_v14 = vsub.f32 %v998_v26, %v1052_v10  ;;  %v1068_v26 = vmul.f32 %v3016_v35, %v1051_v24  ;;  %v3652_v35 = vld [vmem:[#allocation2 + $0x48] sm:$0xff] }
 0x60f   : >> { %v1055_v30 = vsub.f32 %v1053_v14, %v1054_v53 }
 0x611   : >> { %v1056_v36 = vmul.f32 %v1055_v30, %v3605_v18  ;;  %v1070_v18 = vmul.f32 %v3012_v31, %v1048_v8 }
 0x613   : >> { %v1057_v6 = vmul.f32 %v1056_v36, %v3561_v25  ;;  %v1066_v15 = vmul.f32 %v3020_v3, %v1056_v36  ;;  %v1086_v3 = vld [vmem:[#allocation2 + $0x30] sm:$0xff] }
 0x615   : >> { %v1058_v63 = vsub.f32 %v955_v41, %v1057_v6 }
 0x617   : >> { %v1060_v2 = vsub.f32 %v1058_v63, %v1059_v38 }
 0x619   : >> { %v1062_v49 = vsub.f32 %v1060_v2, %v1061_v43 }
 0x61b   : >> { %v1063_v32 = vmul.f32 %v1062_v49, %v3563_v1 }
 0x61d   : >> { %v1064_v9 = vmul.f32 %v3024_v52, %v1063_v32 }
 0x61f   : >> { %v1065_v16 = vsub.f32 1.0, %v1064_v9 }
 0x621   : >> { %v1067_v58 = vsub.f32 %v1065_v16, %v1066_v15 }
 0x623   : >> { %v1069_v25 = vsub.f32 %v1067_v58, %v1068_v26 }
 0x625   : >> { %v1071_v39 = vsub.f32 %v1069_v25, %v1070_v18  ;;  %v3690_v25 = vld [vmem:[#allocation3 + $0x28] sm:$0xff] }
 0x626   : >> { %4677 = vst [vmem:[#allocation23_spill] sm:$0xff] %v3690_v25 }
 0x627   : >> { %v1072_v62 = vmul.f32 %v1071_v39, %v3532_v21  ;;  %v3654_v21 = vld [vmem:[#allocation2 + $0x10] sm:$0xff]  ;;  %v3692_v39 = vld [vmem:[#allocation3 + $0x38] sm:$0xff] }
 0x629   : >> { %v1073_v41 = vadd.f32 %v1072_v62, %v1063_v32 }
 0x62b   : >> { %v1074_v57 = vadd.f32 %v1073_v41, %v1056_v36  ;;  %v3699_v41 = vld [vmem:[#allocation3 + $0x20] sm:$0xff] }
 0x62c   : >> { %4678 = vst [vmem:[#allocation24_spill] sm:$0xff] %v3699_v41 }
 0x62d   : >> { %v1075_v59 = vadd.f32 %v1074_v57, %v1051_v24  ;;  %v3701_v57 = vld [vmem:[#allocation3 + $0x8] sm:$0xff] }
 0x62f   : >> { %v1076_v19 = vadd.f32 %v1075_v59, %v1048_v8 }
 0x631   : >> { %2803 = vrcp.f32 %v1076_v19 }
 0x637   : >> { %v2804_v1 = vpop.eup %2803 }
 0x638   : >> { %v1078_v23 = vmul.f32 %v2804_v1, %v1076_v19 }
 0x63a   : >> { %v1079_v52 = vsub.f32 2.0, %v1078_v23 }
 0x63c   : >> { %v1080_v61 = vmul.f32 %v2804_v1, %v1079_v52 }
 0x63e   : >> { %v1081_v12 = vmul.f32 %v1080_v61, %v1072_v62  ;;  %v1082_v31 = vmul.f32 %v1080_v61, %v1063_v32  ;;  %v1083_v22 = vmul.f32 %v1080_v61, %v1056_v36  ;;  %v1084_v42 = vmul.f32 %v1080_v61, %v1051_v24  ;;  %v3669_v36 = vld [vmem:[#allocation2 + $0x38] sm:$0xff] }
 0x63f   : >> { %v1085_v50 = vmul.f32 %v1080_v61, %v1048_v8 }
 0x640   : >> { %v1088_v34 = vmul.f32 %v1086_v3, %v1081_v12  ;;  %v1092_v33 = vmul.f32 %v3650_v46, %v1082_v31  ;;  %v1098_v40 = vmul.f32 %v3652_v35, %v1083_v22  ;;  %v1089_v10 = vmul.f32 %v1087_v37, %v1081_v12  ;;  %v3724_v37 = vld [vmem:[#allocation3 + $0x18] sm:$0xff] }
 0x641   : >> { %v1093_v24 = vmul.f32 %v3654_v21, %v1082_v31  ;;  %v1099_v53 = vmul.f32 %v3656_v54, %v1083_v22  ;;  %v1104_v30 = vmul.f32 %v3658_v45, %v1084_v42  ;;  %v1105_v6 = vmul.f32 %v3662_v56, %v1084_v42  ;;  %v3722_v42 = vld [vmem:[#allocation3 + $0x30] sm:$0xff] }
 0x642   : >> { %v1094_v14 = vadd.f32 %v1092_v33, %v1088_v34  ;;  %v1110_v63 = vmul.f32 %v3664_v55, %v1085_v50  ;;  %v1111_v2 = vmul.f32 %v3669_v36, %v1085_v50  ;;  %v1169_v50 = vld [vmem:[#allocation3 + $0x10] sm:$0xff]  ;;  %v1170_v34 = vld [vmem:[#allocation3 + $0x40] sm:$0xff] }
 0x643   : >> { %v1095_v8 = vadd.f32 %v1093_v24, %v1089_v10 }
 0x644   : >> { %v1100_v38 = vadd.f32 %v1098_v40, %v1094_v14 }
 0x645   : >> { %v1101_v43 = vadd.f32 %v1099_v53, %v1095_v8 }
 0x646   : >> { %v1106_v49 = vadd.f32 %v1104_v30, %v1100_v38 }
 0x647   : >> { %v1107_v32 = vadd.f32 %v1105_v6, %v1101_v43 }
 0x648   : >> { %v3674_v9 = vadd.f32 %v1110_v63, %v1106_v49 }
 0x649   : >> { %v3676_v15 = vadd.f32 %v1111_v2, %v1107_v32 }
 0x64a   : >> { %4675 = vst [vmem:[#allocation21_spill] sm:$0xff] %v3674_v9  ;;  %1129 = vmatpush.msra.mxu0 %v3674_v9 }
 0x64b   : >> { %4676 = vst [vmem:[#allocation22_spill] sm:$0xff] %v3676_v15  ;;  %1149 = vmatpush.msra.mxu1 %v3676_v15  ;;  %2587 = vmatmul.msk.f32.vlgmr.msra.gmra.mxu0 %vm179_vm0, %v4669_v0 }
 0x64c   : >> { %2588 = vmatmul.msk.f32.vlgmr.msra.gmra.mxu1 %vm179_vm0, %v4669_v0 }
 0x6c8   : >> { %v1131_v16 = vpop.f32.mrf.mxu0 }
 0x6c9   : >> { %v3685_v26 = vadd.f32 %v1131_v16, %v4670_v4  ;;  %v1151_v58 = vpop.f32.mrf.mxu1 }
 0x6ca   : >> { %v3688_v18 = vadd.f32 %v1151_v58, %v4671_v5 }
 0x6cb   : >> { %v3696_v62 = vsub.f32 %v3685_v26, %v3674_v9  ;;  %1221 = vst [vmem:[#allocation2 + $0x30] sm:$0xff] %v3685_v26 }
 0x6cc   : >> { %v3705_v59 = vsub.f32 %v3688_v18, %v3676_v15  ;;  %1222 = vst [vmem:[#allocation2] sm:$0xff] %v3688_v18 }
 0x6cd   : >> { %1223 = vst [vmem:[#allocation3 + $0x48] sm:$0xff] %v3696_v62  ;;  %v1210_v19 = vmul.f32 %v3690_v25, %v3696_v62  ;;  %v1184_v1 = vmul.f32 %v3692_v39, %v3696_v62  ;;  %v1158_v23 = vmul.f32 %v3696_v62, %v3696_v62  ;;  %v1197_v33 = vmul.f32 %v3722_v42, %v3696_v62 }
 0x6ce   : >> { %1224 = vst [vmem:[#allocation3] sm:$0xff] %v3705_v59  ;;  %v1211_v52 = vmul.f32 %v3699_v41, %v3705_v59  ;;  %v1185_v61 = vmul.f32 %v3701_v57, %v3705_v59  ;;  %v1159_v3 = vmul.f32 %v3705_v59, %v3705_v59  ;;  %v1198_v40 = vmul.f32 %v3724_v37, %v3705_v59 }
 0x6cf   : >> { %v1171_v10 = vmul.f32 %v1169_v50, %v3696_v62  ;;  %v1172_v24 = vmul.f32 %v1170_v34, %v3705_v59 }
 0x6d0   : >> { %v1212_v12 = vadd.f32 %v1211_v52, %v1210_v19  ;;  %v1186_v31 = vadd.f32 %v1185_v61, %v1184_v1  ;;  %v1160_v22 = vadd.f32 %v1159_v3, %v1158_v23  ;;  %v1199_v53 = vadd.f32 %v1198_v40, %v1197_v33 }
 0x6d1   : >> { %v1173_v14 = vadd.f32 %v1172_v24, %v1171_v10 }
 0x6d2   : >> { %1213 = vadd.xlane.f32.xlu2 %v1212_v12  ;;  %1187 = vadd.xlane.f32.xlu1 %v1186_v31 }
 0x6d3   : >> { %1161 = vadd.xlane.f32.xlu0 %v1160_v22 }
 0x6da   : >> { %1200 = vadd.xlane.f32.xlu1 %v1199_v53 }
 0x6db   : >> { %1174 = vadd.xlane.f32.xlu0 %v1173_v14 }
 0x745   : >> { %v1188_v16 = vpop.xlane.xlu1 %1187 }
 0x746   : >> { %v1162_v30 = vpop.xlane.xlu0 %1161  ;;  %v1189_v1 = vrot.slane %v1188_v16, 4 }
 0x747   : >> { %v1163_v8 = vrot.slane %v1162_v30, 4 }
 0x748   : >> { %v1190_v52 = vadd.f32 %v1189_v1, %v1188_v16 }
 0x749   : >> { %v1164_v6 = vadd.f32 %v1163_v8, %v1162_v30  ;;  %v1214_v30 = vpop.xlane.xlu2 %1213 }
 0x74a   : >> { %v1191_v22 = vrot.slane %v1190_v52, 2 }
 0x74b   : >> { %v1165_v38 = vrot.slane %v1164_v6, 2 }
 0x74c   : >> { %v1192_v10 = vadd.f32 %v1191_v22, %v1190_v52 }
 0x74d   : >> { %v1166_v63 = vadd.f32 %v1165_v38, %v1164_v6  ;;  %v1201_v12 = vpop.xlane.xlu1 %1200 }
 0x74e   : >> { %v1175_v43 = vpop.xlane.xlu0 %1174  ;;  %v1202_v34 = vrot.slane %v1201_v12, 4  ;;  %v1193_v6 = vrot.slane %v1192_v10, 1 }
 0x74f   : >> { %v1167_v2 = vrot.slane %v1166_v63, 1  ;;  %v1176_v49 = vrot.slane %v1175_v43, 4 }
 0x750   : >> { %v1203_v53 = vadd.f32 %v1202_v34, %v1201_v12 }
 0x751   : >> { %v3732_v8 = vadd.f32 %v1167_v2, %v1166_v63   ;;  %v1177_v32 = vadd.f32 %v1176_v49, %v1175_v43  ;;  %v1215_v43 = vrot.slane %v1214_v30, 4  ;;  %v3746_v2 = vadd.f32 %v1193_v6, %v1192_v10 }
 0x752   : >> { %v1204_v63 = vrot.slane %v1203_v53, 2 }
 0x753   : >> { %4679 = vst [vmem:[#allocation25_spill] sm:$0xff] %v3732_v8  ;;  %v1269_v58 = vadd.f32 0.0001, %v3732_v8  ;;  %v1178_v19 = vrot.slane %v1177_v32, 2  ;;  %v1216_v16 = vadd.f32 %v1215_v43, %v1214_v30 }
 0x754   : >> { %v1205_v49 = vadd.f32 %v1204_v63, %v1203_v53 }
 0x755   : >> { %2805 = vrcp.f32 %v1269_v58  ;;  %v1179_v23 = vadd.f32 %v1178_v19, %v1177_v32  ;;  %v1217_v52 = vrot.slane %v1216_v16, 2 }
 0x756   : >> { %v1206_v19 = vrot.slane %v1205_v49, 1 }
 0x757   : >> { %v1180_v31 = vrot.slane %v1179_v23, 1 }
 0x759   : >> { %v3737_v40 = vadd.f32 %v1180_v31, %v1179_v23 }
 0x75b   : >> { %v2806_v61 = vpop.eup %2805 }
 0x75c   : >> { %v1271_v3 = vmul.f32 %v2806_v61, %v1269_v58 }
 0x75e   : >> { %v1272_v50 = vsub.f32 2.0, %v1271_v3  ;;  %v3756_v3 = vadd.f32 %v1206_v19, %v1205_v49 }
 0x760   : >> { %v3735_v33 = vmul.f32 %v2806_v61, %v1272_v50  ;;  %v1218_v50 = vadd.f32 %v1217_v52, %v1216_v16 }
 0x762   : >> { %4680 = vst [vmem:[#allocation26_spill] sm:$0xff] %v3735_v33  ;;  %v3741_v24 = vmul.f32 %v3735_v33, %v3737_v40  ;;  %v3750_v32 = vmul.f32 %v3735_v33, %v3746_v2  ;;  %v3765_v34 = vmul.f32 %v3735_v33, %v3756_v3  ;;  %v1219_v6 = vrot.slane %v1218_v50, 1 }
 0x764   : >> { %v1275_v14 = vmul.f32 %v3741_v24, %v3737_v40  ;;  %v1285_v1 = vmul.f32 %v3750_v32, %v3737_v40  ;;  %v1287_v31 = vmul.f32 %v3750_v32, %v3746_v2  ;;  %v3781_v43 = vadd.f32 %v1219_v6, %v1218_v50 }
 0x765   : >> { %v1289_v52 = vmul.f32 %v3750_v32, %v3756_v3 }
 0x766   : >> { %v1276_v38 = vsub.f32 %v3538_v17, %v1275_v14  ;;  %v1277_v17 = vmul.f32 %v3741_v24, %v3746_v2  ;;  %v1286_v12 = vsub.f32 %v3004_v47, %v1285_v1  ;;  %v3774_v14 = vsub.f32 %v3551_v13, %v1287_v31 }
 0x767   : >> { %v3786_v49 = vmul.f32 %v3735_v33, %v3781_v43  ;;  %v1279_v13 = vmul.f32 %v3741_v24, %v3756_v3  ;;  %v1299_v31 = vmul.f32 %v3765_v34, %v3756_v3  ;;  %v3813_v6 = vsub.f32 %v2988_v48, %v1289_v52 }
 0x768   : >> { %2807 = vrcp.f32 %v1276_v38  ;;  %v3768_v10 = vsub.f32 %v3004_v47, %v1277_v17  ;;  %4681 = vst [vmem:[#allocation27_spill] sm:$0xff] %v3774_v14 }
 0x769   : >> { %4682 = vst [vmem:[#allocation28_spill] sm:$0xff] %v3786_v49  ;;  %v1305_v1 = vmul.f32 %v3786_v49, %v3737_v40 }
 0x76a   : >> { %4684 = vst [vmem:[#allocation30_spill] sm:$0xff] %v3813_v6 }
 0x76e   : >> { %v2808_v58 = vpop.eup %2807 }
 0x76f   : >> { %v1315_v23 = vmul.f32 %v2808_v58, %v1276_v38  ;;  %v1295_v38 = vmul.f32 %v3765_v34, %v3737_v40 }
 0x771   : >> { %v1316_v61 = vsub.f32 2.0, %v1315_v23  ;;  %v1296_v47 = vsub.f32 %v3000_v44, %v1295_v38  ;;  %v3798_v23 = vsub.f32 %v3000_v44, %v1279_v13  ;;  %v1306_v44 = vsub.f32 %v2996_v20, %v1305_v1 }
 0x773   : >> { %v3761_v22 = vmul.f32 %v2808_v58, %v1316_v61  ;;  %v1297_v58 = vmul.f32 %v3765_v34, %v3746_v2 }
 0x775   : >> { %v3771_v53 = vmul.f32 %v3761_v22, %v1286_v12  ;;  %v3791_v16 = vmul.f32 %v3761_v22, %v1296_v47  ;;  %v3805_v12 = vsub.f32 %v2988_v48, %v1297_v58  ;;  %v1336_v13 = vmul.f32 %v3761_v22, %v1306_v44 }
 0x776   : >> { %v3822_v58 = vsub.f32 %v3588_v28, %v1299_v31  ;;  %v1307_v48 = vmul.f32 %v3786_v49, %v3746_v2 }
 0x777   : >> { %v1319_v30 = vmul.f32 %v3771_v53, %v3768_v10  ;;  %v1328_v17 = vmul.f32 %v3791_v16, %v3768_v10  ;;  %4683 = vst [vmem:[#allocation29_spill] sm:$0xff] %v3805_v12  ;;  %v1321_v50 = vmul.f32 %v3771_v53, %v3798_v23 }
 0x778   : >> { %4685 = vst [vmem:[#allocation31_spill] sm:$0xff] %v3822_v58  ;;  %v3836_v28 = vsub.f32 %v2984_v60, %v1307_v48  ;;  %v1301_v48 = vmul.f32 %v3765_v34, %v3781_v43 }
 0x779   : >> { %v1320_v63 = vsub.f32 %v3774_v14, %v1319_v30  ;;  %v1329_v38 = vsub.f32 %v3805_v12, %v1328_v17  ;;  %v3825_v15 = vsub.f32 %v3813_v6, %v1321_v50  ;;  %v1291_v50 = vmul.f32 %v3750_v32, %v3781_v43 }
 0x77a   : >> { %4686 = vst [vmem:[#allocation32_spill] sm:$0xff] %v3836_v28  ;;  %v1283_v14 = vsub.f32 1.0, %v3741_v24 }
 0x77b   : >> { %2809 = vrcp.f32 %v1320_v63 }
 0x781   : >> { %v2810_v19 = vpop.eup %2809 }
 0x782   : >> { %v1346_v61 = vmul.f32 %v2810_v19, %v1320_v63  ;;  %v1330_v63 = vmul.f32 %v3791_v16, %v3798_v23 }
 0x784   : >> { %v1347_v30 = vsub.f32 2.0, %v1346_v61  ;;  %v1331_v52 = vsub.f32 %v3822_v58, %v1330_v63  ;;  %v1337_v61 = vmul.f32 %v1336_v13, %v3768_v10 }
 0x786   : >> { %v3818_v47 = vmul.f32 %v2810_v19, %v1347_v30  ;;  %v1281_v19 = vmul.f32 %v3741_v24, %v3781_v43  ;;  %v1338_v44 = vsub.f32 %v3836_v28, %v1337_v61  ;;  %v1311_v61 = vmul.f32 %v3786_v49, %v3781_v43 }
 0x788   : >> { %v1349_v1 = vmul.f32 %v3818_v47, %v1329_v38  ;;  %v3839_v31 = vsub.f32 %v2996_v20, %v1281_v19  ;;  %v1309_v38 = vmul.f32 %v3786_v49, %v3756_v3  ;;  %v1339_v20 = vmul.f32 %v1336_v13, %v3798_v23 }
 0x789   : >> { %v3870_v58 = vsub.f32 %v3623_v11, %v1311_v61 }
 0x78a   : >> { %v1350_v17 = vmul.f32 %v1349_v1, %v3825_v15  ;;  %v1323_v63 = vmul.f32 %v3771_v53, %v3839_v31  ;;  %v3856_v7 = vsub.f32 %v2976_v27, %v1309_v38  ;;  %v1341_v8 = vmul.f32 %v1336_v13, %v3839_v31 }
 0x78c   : >> { %v1351_v30 = vsub.f32 %v1331_v52, %v1350_v17  ;;  %v1356_v52 = vmul.f32 %v3818_v47, %v1338_v44  ;;  %v3852_v17 = vsub.f32 %v2984_v60, %v1291_v50  ;;  %4688 = vst [vmem:[#allocation34_spill] sm:$0xff] %v3856_v7  ;;  %v1332_v44 = vmul.f32 %v3791_v16, %v3839_v31 }
 0x78d   : >> { %v3865_v60 = vsub.f32 %v2976_v27, %v1301_v48  ;;  %v1340_v50 = vsub.f32 %v3856_v7, %v1339_v20  ;;  %v1325_v20 = vmul.f32 %v3771_v53, %v1283_v14  ;;  %v4611_v53 = vsub.f32 1.0, %v3786_v49 }
 0x78e   : >> { %2811 = vrcp.f32 %v1351_v30  ;;  %4687 = vst [vmem:[#allocation33_spill] sm:$0xff] %v3852_v17  ;;  %v1324_v9 = vsub.f32 %v3852_v17, %v1323_v63  ;;  %v1357_v29 = vmul.f32 %v1356_v52, %v3825_v15 }
 0x78f   : >> { %v1333_v63 = vsub.f32 %v3865_v60, %v1332_v44 }
 0x790   : >> { %v1352_v38 = vmul.f32 %v1349_v1, %v1324_v9  ;;  %v1358_v17 = vsub.f32 %v1340_v50, %v1357_v29  ;;  %v1359_v6 = vmul.f32 %v1356_v52, %v1324_v9  ;;  %v1334_v29 = vmul.f32 %v3791_v16, %v1283_v14 }
 0x792   : >> { %v1353_v27 = vsub.f32 %v1333_v63, %v1352_v38 }
 0x794   : >> { %v2812_v19 = vpop.eup %2811 }
 0x795   : >> { %v1364_v51 = vmul.f32 %v2812_v19, %v1351_v30  ;;  %v1342_v30 = vsub.f32 %v3870_v58, %v1341_v8 }
 0x797   : >> { %v1365_v28 = vsub.f32 2.0, %v1364_v51  ;;  %v1360_v7 = vsub.f32 %v1342_v30, %v1359_v6  ;;  %v4609_v51 = vsub.f32 1.0, %v3750_v32 }
 0x799   : >> { %v1366_v12 = vmul.f32 %v2812_v19, %v1365_v28  ;;  %v1326_v11 = vsub.f32 %v4609_v51, %v1325_v20  ;;  %v4610_v28 = vsub.f32 1.0, %v3765_v34 }
 0x79b   : >> { %v1367_v48 = vmul.f32 %v1366_v12, %v1358_v17  ;;  %v1354_v24 = vmul.f32 %v1349_v1, %v1326_v11  ;;  %v1335_v8 = vsub.f32 %v4610_v28, %v1334_v29  ;;  %v1343_v17 = vmul.f32 %v1336_v13, %v1283_v14 }
 0x79c   : >> { %v1361_v19 = vmul.f32 %v1356_v52, %v1326_v11 }
 0x79d   : >> { %v1368_v41 = vmul.f32 %v1367_v48, %v1353_v27  ;;  %v1355_v6 = vsub.f32 %v1335_v8, %v1354_v24 }
 0x79f   : >> { %v1369_v25 = vsub.f32 %v1360_v7, %v1368_v41  ;;  %v1344_v7 = vsub.f32 %v4611_v53, %v1343_v17  ;;  %v1370_v41 = vmul.f32 %v1367_v48, %v1355_v6 }
 0x7a1   : >> { %2813 = vrcp.f32 %v1369_v25  ;;  %v1362_v50 = vsub.f32 %v1344_v7, %v1361_v19 }
 0x7a3   : >> { %v1371_v38 = vsub.f32 %v1362_v50, %v1370_v41 }
 0x7a7   : >> { %v2814_v61 = vpop.eup %2813 }
 0x7a8   : >> { %v1373_v44 = vmul.f32 %v2814_v61, %v1369_v25 }
 0x7aa   : >> { %v1374_v16 = vsub.f32 2.0, %v1373_v44 }
 0x7ac   : >> { %v1375_v63 = vmul.f32 %v2814_v61, %v1374_v16 }
 0x7ae   : >> { %v1376_v30 = vmul.f32 %v1375_v63, %v1371_v38 }
 0x7b0   : >> { %v1377_v1 = vmul.f32 %v1376_v30, %v1353_v27  ;;  %v1382_v28 = vmul.f32 %v1376_v30, %v1324_v9  ;;  %v1389_v19 = vmul.f32 %v1376_v30, %v3839_v31 }
 0x7b2   : >> { %v1378_v20 = vsub.f32 %v1355_v6, %v1377_v1 }
 0x7b4   : >> { %v1379_v51 = vmul.f32 %v1378_v20, %v1366_v12 }
 0x7b6   : >> { %v1380_v13 = vmul.f32 %v1379_v51, %v3825_v15  ;;  %v1387_v25 = vmul.f32 %v1379_v51, %v3798_v23 }
 0x7b8   : >> { %v1381_v29 = vsub.f32 %v1326_v11, %v1380_v13  ;;  %v1396_v11 = vmul.f32 %v1379_v51, %v3756_v3 }
 0x7ba   : >> { %v1383_v24 = vsub.f32 %v1381_v29, %v1382_v28 }
 0x7bc   : >> { %v1384_v52 = vmul.f32 %v1383_v24, %v3818_v47 }
 0x7be   : >> { %v1385_v8 = vmul.f32 %v1384_v52, %v3768_v10  ;;  %v1394_v15 = vmul.f32 %v1384_v52, %v3746_v2  ;;  %v1398_v10 = vmul.f32 %v1376_v30, %v3781_v43 }
 0x7c0   : >> { %v1386_v17 = vsub.f32 %v1283_v14, %v1385_v8 }
 0x7c2   : >> { %v1388_v48 = vsub.f32 %v1386_v17, %v1387_v25 }
 0x7c4   : >> { %v1390_v61 = vsub.f32 %v1388_v48, %v1389_v19 }
 0x7c6   : >> { %v1391_v27 = vmul.f32 %v1390_v61, %v3761_v22 }
 0x7c8   : >> { %v1392_v12 = vmul.f32 %v1391_v27, %v3737_v40 }
 0x7ca   : >> { %v1393_v6 = vsub.f32 1.0, %v1392_v12 }
 0x7cc   : >> { %v1395_v9 = vsub.f32 %v1393_v6, %v1394_v15 }
 0x7ce   : >> { %v1397_v47 = vsub.f32 %v1395_v9, %v1396_v11 }
 0x7d0   : >> { %v1399_v14 = vsub.f32 %v1397_v47, %v1398_v10 }
 0x7d2   : >> { %v1400_v23 = vmul.f32 %v1399_v14, %v3735_v33 }
 0x7d4   : >> { %v1401_v28 = vadd.f32 %v1400_v23, %v1391_v27 }
 0x7d6   : >> { %v1402_v7 = vadd.f32 %v1401_v28, %v1384_v52 }
 0x7d8   : >> { %v1403_v31 = vadd.f32 %v1402_v7, %v1379_v51 }
 0x7da   : >> { %v1404_v41 = vadd.f32 %v1403_v31, %v1376_v30 }
 0x7dc   : >> { %2815 = vrcp.f32 %v1404_v41 }
 0x7e2   : >> { %v2816_v22 = vpop.eup %2815 }
 0x7e3   : >> { %v1406_v44 = vmul.f32 %v2816_v22, %v1404_v41 }
 0x7e5   : >> { %v1407_v40 = vsub.f32 2.0, %v1406_v44 }
 0x7e7   : >> { %v1408_v50 = vmul.f32 %v2816_v22, %v1407_v40 }
 0x7e9   : >> { %v1409_v16 = vmul.f32 %v1408_v50, %v1400_v23  ;;  %v1410_v38 = vmul.f32 %v1408_v50, %v1391_v27  ;;  %v1411_v63 = vmul.f32 %v1408_v50, %v1384_v52  ;;  %v1412_v1 = vmul.f32 %v1408_v50, %v1379_v51 }
 0x7ea   : >> { %v1413_v8 = vmul.f32 %v1408_v50, %v1376_v30 }
 0x7eb   : >> { %v1416_v20 = vmul.f32 %v1409_v16, %v3685_v26  ;;  %v1420_v13 = vmul.f32 %v1410_v38, %v3650_v46  ;;  %v1417_v29 = vmul.f32 %v1409_v16, %v3688_v18  ;;  %v1421_v24 = vmul.f32 %v1410_v38, %v3654_v21 }
 0x7ec   : >> { %v1426_v25 = vmul.f32 %v1411_v63, %v3652_v35  ;;  %v1427_v19 = vmul.f32 %v1411_v63, %v3656_v54  ;;  %v1432_v27 = vmul.f32 %v1412_v1, %v3658_v45  ;;  %v1433_v51 = vmul.f32 %v1412_v1, %v3662_v56  ;;  %v4691_v63 = vld [vmem:[#allocation23_spill] sm:$0xff]  ;;  %v4692_v1 = vld [vmem:[#allocation24_spill] sm:$0xff] }
 0x7ed   : >> { %v1422_v17 = vadd.f32 %v1420_v13, %v1416_v20  ;;  %v1423_v48 = vadd.f32 %v1421_v24, %v1417_v29  ;;  %v1438_v46 = vmul.f32 %v1413_v8, %v3664_v55  ;;  %v1439_v15 = vmul.f32 %v1413_v8, %v3669_v36 }
 0x7ef   : >> { %v1428_v61 = vadd.f32 %v1426_v25, %v1422_v17  ;;  %v1429_v52 = vadd.f32 %v1427_v19, %v1423_v48 }
 0x7f1   : >> { %v1434_v12 = vadd.f32 %v1432_v27, %v1428_v61  ;;  %v1435_v6 = vadd.f32 %v1433_v51, %v1429_v52 }
 0x7f3   : >> { %v3907_v21 = vadd.f32 %v1438_v46, %v1434_v12  ;;  %v3909_v30 = vadd.f32 %v1439_v15, %v1435_v6 }
 0x7f5   : >> { %4689 = vst [vmem:[#allocation35_spill] sm:$0xff] %v3907_v21  ;;  %1457 = vmatpush.msra.mxu2 %v3907_v21  ;;  %1477 = vmatpush.msra.mxu3 %v3909_v30 }
 0x7f6   : >> { %4690 = vst [vmem:[#allocation36_spill] sm:$0xff] %v3909_v30  ;;  %2589 = vmatmul.msk.f32.vlgmr.msra.gmra.mxu2 %vm179_vm0, %v4669_v0  ;;  %2590 = vmatmul.msk.f32.vlgmr.msra.gmra.mxu3 %vm179_vm0, %v4669_v0 }
 0x879   : >> { %v1459_v9 = vpop.f32.mrf.mxu2  ;;  %v1479_v47 = vpop.f32.mrf.mxu3 }
 0x87a   : >> { %v3918_v11 = vadd.f32 %v1459_v9, %v4670_v4  ;;  %v3921_v10 = vadd.f32 %v1479_v47, %v4671_v5 }
 0x87c   : >> { %v3925_v14 = vsub.f32 %v3918_v11, %v3907_v21  ;;  %1549 = vst [vmem:[#allocation2 + $0x18] sm:$0xff] %v3918_v11  ;;  %v3930_v23 = vsub.f32 %v3921_v10, %v3909_v30 }
 0x87d   : >> { %1550 = vst [vmem:[#allocation2 + $0x10] sm:$0xff] %v3921_v10 }
 0x87e   : >> { %1551 = vst [vmem:[#allocation3 + $0x10] sm:$0xff] %v3925_v14  ;;  %v1512_v28 = vmul.f32 %v3925_v14, %v3692_v39  ;;  %v1499_v7 = vmul.f32 %v3925_v14, %v3696_v62  ;;  %v1486_v31 = vmul.f32 %v3925_v14, %v3925_v14  ;;  %v1513_v41 = vmul.f32 %v3930_v23, %v3701_v57 }
 0x87f   : >> { %1552 = vst [vmem:[#allocation3 + $0x40] sm:$0xff] %v3930_v23  ;;  %v1500_v22 = vmul.f32 %v3930_v23, %v3705_v59  ;;  %v1487_v44 = vmul.f32 %v3930_v23, %v3930_v23  ;;  %v1525_v16 = vmul.f32 %v3925_v14, %v3722_v42  ;;  %v1526_v38 = vmul.f32 %v3930_v23, %v3724_v37 }
 0x880   : >> { %v1514_v40 = vadd.f32 %v1513_v41, %v1512_v28  ;;  %v1538_v57 = vmul.f32 %v3925_v14, %v4691_v63  ;;  %v1539_v20 = vmul.f32 %v3930_v23, %v4692_v1 }
 0x881   : >> { %v1501_v50 = vadd.f32 %v1500_v22, %v1499_v7  ;;  %v1488_v39 = vadd.f32 %v1487_v44, %v1486_v31  ;;  %v1527_v13 = vadd.f32 %v1526_v38, %v1525_v16 }
 0x882   : >> { %1515 = vadd.xlane.f32.xlu1 %v1514_v40  ;;  %v1540_v29 = vadd.f32 %v1539_v20, %v1538_v57 }
 0x883   : >> { %1502 = vadd.xlane.f32.xlu2 %v1501_v50  ;;  %1489 = vadd.xlane.f32.xlu0 %v1488_v39 }
 0x88b   : >> { %1528 = vadd.xlane.f32.xlu2 %v1527_v13  ;;  %1541 = vadd.xlane.f32.xlu0 %v1540_v29 }
 0x8f5   : >> { %v1516_v52 = vpop.xlane.xlu1 %1515 }
 0x8f6   : >> { %v1503_v24 = vpop.xlane.xlu2 %1502  ;;  %v1490_v17 = vpop.xlane.xlu0 %1489  ;;  %v1517_v6 = vrot.slane %v1516_v52, 4 }
 0x8f7   : >> { %v1504_v8 = vrot.slane %v1503_v24, 4  ;;  %v1491_v25 = vrot.slane %v1490_v17, 4 }
 0x8f8   : >> { %v1518_v31 = vadd.f32 %v1517_v6, %v1516_v52 }
 0x8f9   : >> { %v1505_v48 = vadd.f32 %v1504_v8, %v1503_v24  ;;  %v1492_v19 = vadd.f32 %v1491_v25, %v1490_v17 }
 0x8fa   : >> { %v1519_v50 = vrot.slane %v1518_v31, 2 }
 0x8fb   : >> { %v1506_v61 = vrot.slane %v1505_v48, 2  ;;  %v1493_v27 = vrot.slane %v1492_v19, 2 }
 0x8fc   : >> { %v1520_v16 = vadd.f32 %v1519_v50, %v1518_v31 }
 0x8fd   : >> { %v1507_v51 = vadd.f32 %v1506_v61, %v1505_v48  ;;  %v1494_v12 = vadd.f32 %v1493_v27, %v1492_v19 }
 0x8fe   : >> { %v1529_v44 = vpop.xlane.xlu2 %1528  ;;  %v1542_v20 = vpop.xlane.xlu0 %1541  ;;  %v1521_v13 = vrot.slane %v1520_v16, 1 }
 0x8ff   : >> { %v1508_v46 = vrot.slane %v1507_v51, 1  ;;  %v1495_v15 = vrot.slane %v1494_v12, 1  ;;  %v1530_v39 = vrot.slane %v1529_v44, 4  ;;  %v1543_v25 = vrot.slane %v1542_v20, 4 }
 0x900   : >> { %v1522_v48 = vadd.f32 %v1521_v13, %v1520_v16 }
 0x901   : >> { %v3955_v9 = vadd.f32 %v1508_v46, %v1507_v51   ;;  %v3957_v47 = vadd.f32 %v1495_v15, %v1494_v12   ;;  %v1531_v38 = vadd.f32 %v1530_v39, %v1529_v44  ;;  %v1544_v51 = vadd.f32 %v1543_v25, %v1542_v20 }
 0x903   : >> { %4693 = vst [vmem:[#allocation23_spill] sm:$0xff] %v3957_v47  ;;  %v4694_v28 = vmov %v3957_v47  ;;  %v3961_v7 = vmul.f32 %v3955_v9, %v3735_v33  ;;  %v1532_v24 = vrot.slane %v1531_v38, 2  ;;  %v1608_v8 = vmul.f32 %v3955_v9, %v3750_v32 }
 0x904   : >> { %v1597_v41 = vadd.f32 0.0001, %v4694_v28  ;;  %v1545_v15 = vrot.slane %v1544_v51, 2 }
 0x905   : >> { %v1599_v22 = vmul.f32 %v3961_v7, %v3955_v9  ;;  %v1533_v61 = vadd.f32 %v1532_v24, %v1531_v38  ;;  %v1601_v27 = vmul.f32 %v3961_v7, %v3746_v2  ;;  %v1609_v52 = vsub.f32 %v1522_v48, %v1608_v8 }
 0x906   : >> { %v1603_v38 = vmul.f32 %v3961_v7, %v3756_v3  ;;  %v1612_v8 = vmul.f32 %v3955_v9, %v3786_v49 }
 0x907   : >> { %v1600_v40 = vsub.f32 %v1597_v41, %v1599_v22  ;;  %v1534_v46 = vrot.slane %v1533_v61, 1  ;;  %v3973_v6 = vsub.f32 %v1522_v48, %v1601_v27  ;;  %v1546_v41 = vadd.f32 %v1545_v15, %v1544_v51  ;;  %v4695_v22 = vld [vmem:[#allocation27_spill] sm:$0xff]  ;;  %v4698_v15 = vld [vmem:[#allocation30_spill] sm:$0xff] }
 0x909   : >> { %2817 = vrcp.f32 %v1600_v40  ;;  %v1535_v31 = vadd.f32 %v1534_v46, %v1533_v61  ;;  %v1547_v39 = vrot.slane %v1546_v41, 1  ;;  %v4696_v61 = vld [vmem:[#allocation29_spill] sm:$0xff] }
 0x90b   : >> { %v1548_v20 = vadd.f32 %v1547_v39, %v1546_v41  ;;  %v3984_v13 = vsub.f32 %v1535_v31, %v1603_v38  ;;  %v4699_v41 = vld [vmem:[#allocation31_spill] sm:$0xff]  ;;  %v1605_v39 = vmul.f32 %v3961_v7, %v3781_v43 }
 0x90d   : >> { %v1613_v48 = vsub.f32 %v1548_v20, %v1612_v8  ;;  %v4006_v38 = vsub.f32 %v1548_v20, %v1605_v39 }
 0x90f   : >> { %v2818_v57 = vpop.eup %2817 }
 0x910   : >> { %v1615_v29 = vmul.f32 %v2818_v57, %v1600_v40  ;;  %v1610_v40 = vmul.f32 %v3955_v9, %v3765_v34 }
 0x912   : >> { %v1616_v17 = vsub.f32 2.0, %v1615_v29  ;;  %v1611_v50 = vsub.f32 %v1535_v31, %v1610_v40 }
 0x914   : >> { %v3968_v19 = vmul.f32 %v2818_v57, %v1616_v17 }
 0x916   : >> { %v1618_v12 = vmul.f32 %v3968_v19, %v1609_v52  ;;  %v3980_v16 = vmul.f32 %v3968_v19, %v1611_v50  ;;  %v3995_v46 = vmul.f32 %v3968_v19, %v1613_v48  ;;  %v4702_v48 = vld [vmem:[#allocation33_spill] sm:$0xff] }
 0x918   : >> { %v1619_v47 = vmul.f32 %v1618_v12, %v3973_v6  ;;  %v1628_v29 = vmul.f32 %v3980_v16, %v3973_v6  ;;  %v1621_v17 = vmul.f32 %v1618_v12, %v3984_v13  ;;  %v1630_v52 = vmul.f32 %v3980_v16, %v3984_v13  ;;  %4697 = vst [vmem:[#allocation24_spill] sm:$0xff] %v3995_v46 }
 0x919   : >> { %v1637_v40 = vmul.f32 %v3995_v46, %v3973_v6  ;;  %v1641_v20 = vmul.f32 %v3995_v46, %v4006_v38 }
 0x91a   : >> { %v1620_v44 = vsub.f32 %v4695_v22, %v1619_v47  ;;  %v1629_v27 = vsub.f32 %v4696_v61, %v1628_v29  ;;  %v1622_v47 = vsub.f32 %v4698_v15, %v1621_v17  ;;  %v3999_v22 = vsub.f32 %v4699_v41, %v1630_v52  ;;  %v4703_v41 = vld [vmem:[#allocation34_spill] sm:$0xff] }
 0x91b   : >> { %v1639_v17 = vmul.f32 %v3995_v46, %v3984_v13 }
 0x91c   : >> { %2819 = vrcp.f32 %v1620_v44  ;;  %4700 = vst [vmem:[#allocation27_spill] sm:$0xff] %v3999_v22 }
 0x922   : >> { %v2820_v57 = vpop.eup %2819 }
 0x923   : >> { %v1646_v24 = vmul.f32 %v2820_v57, %v1620_v44 }
 0x925   : >> { %v1647_v25 = vsub.f32 2.0, %v1646_v24  ;;  %v1623_v24 = vmul.f32 %v1618_v12, %v4006_v38 }
 0x927   : >> { %v1648_v51 = vmul.f32 %v2820_v57, %v1647_v25  ;;  %v4701_v57 = vld [vmem:[#allocation32_spill] sm:$0xff]  ;;  %v1624_v61 = vsub.f32 %v4702_v48, %v1623_v24  ;;  %v4025_v48 = vsub.f32 1.0, %v3961_v7 }
 0x928   : >> { %v1638_v29 = vsub.f32 %v4701_v57, %v1637_v40 }
 0x929   : >> { %v1649_v31 = vmul.f32 %v1648_v51, %v1629_v27  ;;  %v1632_v27 = vmul.f32 %v3980_v16, %v4006_v38  ;;  %v1625_v30 = vmul.f32 %v1618_v12, %v4025_v48 }
 0x92a   : >> { %v1656_v8 = vmul.f32 %v1648_v51, %v1638_v29 }
 0x92b   : >> { %v1650_v44 = vmul.f32 %v1649_v31, %v1622_v47  ;;  %v1652_v40 = vmul.f32 %v1649_v31, %v1624_v61  ;;  %v4021_v57 = vsub.f32 %v3865_v60, %v1632_v27  ;;  %v1634_v27 = vmul.f32 %v3980_v16, %v4025_v48 }
 0x92c   : >> { %v1657_v52 = vmul.f32 %v1656_v8, %v1622_v47  ;;  %v1659_v53 = vmul.f32 %v1656_v8, %v1624_v61 }
 0x92d   : >> { %v1651_v50 = vsub.f32 %v3999_v22, %v1650_v44  ;;  %v4016_v44 = vsub.f32 %v4703_v41, %v1639_v17  ;;  %4705 = vst [vmem:[#allocation30_spill] sm:$0xff] %v4021_v57  ;;  %v1653_v17 = vsub.f32 %v4021_v57, %v1652_v40  ;;  %v1643_v40 = vmul.f32 %v3995_v46, %v4025_v48 }
 0x92f   : >> { %2821 = vrcp.f32 %v1651_v50  ;;  %4704 = vst [vmem:[#allocation29_spill] sm:$0xff] %v4016_v44  ;;  %v1658_v29 = vsub.f32 %v4016_v44, %v1657_v52 }
 0x935   : >> { %v2822_v25 = vpop.eup %2821 }
 0x936   : >> { %v1664_v15 = vmul.f32 %v2822_v25, %v1651_v50  ;;  %v4028_v50 = vsub.f32 %v3870_v58, %v1641_v20  ;;  %v4708_v58 = vsub.f32 1.0, %v3765_v34 }
 0x938   : >> { %v1665_v39 = vsub.f32 2.0, %v1664_v15  ;;  %4706 = vst [vmem:[#allocation31_spill] sm:$0xff] %v4028_v50  ;;  %v1660_v15 = vsub.f32 %v4028_v50, %v1659_v53  ;;  %v4039_v20 = vsub.f32 %v4708_v58, %v1634_v27 }
 0x93a   : >> { %v1666_v24 = vmul.f32 %v2822_v25, %v1665_v39  ;;  %v4707_v25 = vsub.f32 1.0, %v3750_v32  ;;  %4709 = vst [vmem:[#allocation32_spill] sm:$0xff] %v4039_v20 }
 0x93c   : >> { %v1667_v41 = vmul.f32 %v1666_v24, %v1658_v29  ;;  %v1626_v52 = vsub.f32 %v4707_v25, %v1625_v30 }
 0x93e   : >> { %v1668_v21 = vmul.f32 %v1667_v41, %v1653_v17  ;;  %v1654_v39 = vmul.f32 %v1649_v31, %v1626_v52  ;;  %v1661_v53 = vmul.f32 %v1656_v8, %v1626_v52 }
 0x940   : >> { %v1669_v60 = vsub.f32 %v1660_v15, %v1668_v21  ;;  %v1655_v12 = vsub.f32 %v4039_v20, %v1654_v39  ;;  %v4710_v21 = vsub.f32 1.0, %v3786_v49 }
 0x942   : >> { %2823 = vrcp.f32 %v1669_v60  ;;  %v4046_v15 = vsub.f32 %v4710_v21, %v1643_v40  ;;  %v1670_v28 = vmul.f32 %v1667_v41, %v1655_v12 }
 0x944   : >> { %v1662_v30 = vsub.f32 %v4046_v15, %v1661_v53 }
 0x946   : >> { %v1671_v25 = vsub.f32 %v1662_v30, %v1670_v28 }
 0x948   : >> { %v2824_v29 = vpop.eup %2823 }
 0x949   : >> { %v1673_v32 = vmul.f32 %v2824_v29, %v1669_v60 }
 0x94b   : >> { %v1674_v31 = vsub.f32 2.0, %v1673_v32 }
 0x94d   : >> { %v1675_v50 = vmul.f32 %v2824_v29, %v1674_v31 }
 0x94f   : >> { %v1676_v27 = vmul.f32 %v1675_v50, %v1671_v25 }
 0x951   : >> { %v1677_v58 = vmul.f32 %v1676_v27, %v1653_v17  ;;  %v1682_v39 = vmul.f32 %v1676_v27, %v1624_v61  ;;  %v1689_v53 = vmul.f32 %v1676_v27, %v4006_v38 }
 0x953   : >> { %v1678_v57 = vsub.f32 %v1655_v12, %v1677_v58 }
 0x955   : >> { %v1679_v44 = vmul.f32 %v1678_v57, %v1666_v24 }
 0x957   : >> { %v1680_v46 = vmul.f32 %v1679_v44, %v1622_v47  ;;  %v1687_v41 = vmul.f32 %v1679_v44, %v3984_v13 }
 0x959   : >> { %v1681_v22 = vsub.f32 %v1626_v52, %v1680_v46 }
 0x95b   : >> { %v1683_v8 = vsub.f32 %v1681_v22, %v1682_v39 }
 0x95d   : >> { %v1684_v20 = vmul.f32 %v1683_v8, %v1648_v51  ;;  %v1696_v51 = vmul.f32 %v1679_v44, %v3756_v3 }
 0x95f   : >> { %v1685_v49 = vmul.f32 %v1684_v20, %v3973_v6  ;;  %v1694_v46 = vmul.f32 %v1684_v20, %v3746_v2  ;;  %v1698_v6 = vmul.f32 %v1676_v27, %v3781_v43 }
 0x961   : >> { %v1686_v40 = vsub.f32 %v4025_v48, %v1685_v49 }
 0x963   : >> { %v1688_v60 = vsub.f32 %v1686_v40, %v1687_v41 }
 0x965   : >> { %v1690_v28 = vsub.f32 %v1688_v60, %v1689_v53 }
 0x967   : >> { %v1691_v50 = vmul.f32 %v1690_v28, %v3968_v19 }
 0x969   : >> { %v1692_v17 = vmul.f32 %v1691_v50, %v3955_v9 }
 0x96b   : >> { %v1693_v57 = vsub.f32 1.0, %v1692_v17 }
 0x96d   : >> { %v1695_v47 = vsub.f32 %v1693_v57, %v1694_v46 }
 0x96f   : >> { %v1697_v22 = vsub.f32 %v1695_v47, %v1696_v51 }
 0x971   : >> { %v1699_v49 = vsub.f32 %v1697_v22, %v1698_v6 }
 0x973   : >> { %v1700_v61 = vmul.f32 %v1699_v49, %v3735_v33 }
 0x975   : >> { %v1701_v24 = vadd.f32 %v1700_v61, %v1691_v50 }
 0x977   : >> { %v1702_v52 = vadd.f32 %v1701_v24, %v1684_v20 }
 0x979   : >> { %v1703_v12 = vadd.f32 %v1702_v52, %v1679_v44 }
 0x97b   : >> { %v1704_v29 = vadd.f32 %v1703_v12, %v1676_v27 }
 0x97d   : >> { %2825 = vrcp.f32 %v1704_v29 }
 0x983   : >> { %v2826_v21 = vpop.eup %2825 }
 0x984   : >> { %v1706_v32 = vmul.f32 %v2826_v21, %v1704_v29 }
 0x986   : >> { %v1707_v30 = vsub.f32 2.0, %v1706_v32 }
 0x988   : >> { %v1708_v31 = vmul.f32 %v2826_v21, %v1707_v30 }
 0x98a   : >> { %v1709_v25 = vmul.f32 %v1708_v31, %v1700_v61  ;;  %v1710_v2 = vmul.f32 %v1708_v31, %v1691_v50  ;;  %v1711_v58 = vmul.f32 %v1708_v31, %v1684_v20  ;;  %v1712_v39 = vmul.f32 %v1708_v31, %v1679_v44 }
 0x98b   : >> { %v1713_v53 = vmul.f32 %v1708_v31, %v1676_v27 }
 0x98c   : >> { %v1716_v8 = vmul.f32 %v1709_v25, %v3685_v26  ;;  %v1720_v40 = vmul.f32 %v1710_v2, %v3918_v11  ;;  %v1717_v41 = vmul.f32 %v1709_v25, %v3688_v18  ;;  %v1721_v60 = vmul.f32 %v1710_v2, %v3921_v10 }
 0x98d   : >> { %v1726_v17 = vmul.f32 %v1711_v58, %v3652_v35  ;;  %v1727_v46 = vmul.f32 %v1711_v58, %v3656_v54  ;;  %v1732_v50 = vmul.f32 %v1712_v39, %v3658_v45  ;;  %v1733_v44 = vmul.f32 %v1712_v39, %v3662_v56 }
 0x98e   : >> { %v1722_v28 = vadd.f32 %v1720_v40, %v1716_v8  ;;  %v1723_v57 = vadd.f32 %v1721_v60, %v1717_v41  ;;  %v1738_v51 = vmul.f32 %v1713_v53, %v3664_v55  ;;  %v1739_v18 = vmul.f32 %v1713_v53, %v3669_v36 }
 0x990   : >> { %v1728_v47 = vadd.f32 %v1726_v17, %v1722_v28  ;;  %v1729_v20 = vadd.f32 %v1727_v46, %v1723_v57 }
 0x992   : >> { %v1734_v26 = vadd.f32 %v1732_v50, %v1728_v47  ;;  %v1735_v22 = vadd.f32 %v1733_v44, %v1729_v20 }
 0x994   : >> { %v4069_v6 = vadd.f32 %v1738_v51, %v1734_v26  ;;  %v4071_v27 = vadd.f32 %v1739_v18, %v1735_v22 }
 0x996   : >> { %1757 = vmatpush.msrb.mxu0 %v4069_v6  ;;  %1777 = vmatpush.msrb.mxu1 %v4071_v27 }
 0x997   : >> { %2591 = vmatmul.msk.f32.vlgmr.msrb.gmra.mxu0 %vm179_vm0, %v4669_v0  ;;  %2592 = vmatmul.msk.f32.vlgmr.msrb.gmra.mxu1 %vm179_vm0, %v4669_v0 }
 0xa14   : >> { %v1759_v35 = vpop.f32.mrf.mxu0  ;;  %v1779_v45 = vpop.f32.mrf.mxu1 }
 0xa15   : >> { %v4080_v54 = vadd.f32 %v1759_v35, %v4670_v4  ;;  %v4083_v56 = vadd.f32 %v1779_v45, %v4671_v5 }
 0xa17   : >> { %v4087_v55 = vsub.f32 %v4080_v54, %v4069_v6  ;;  %1849 = vst [vmem:[#allocation2 + $0x48] sm:$0xff] %v4080_v54  ;;  %v4092_v36 = vsub.f32 %v4083_v56, %v4071_v27 }
 0xa18   : >> { %1850 = vst [vmem:[#allocation2 + $0x28] sm:$0xff] %v4083_v56 }
 0xa19   : >> { %1851 = vst [vmem:[#allocation3 + $0x38] sm:$0xff] %v4087_v55  ;;  %v1812_v49 = vmul.f32 %v4087_v55, %v3925_v14  ;;  %v1799_v61 = vmul.f32 %v4087_v55, %v3696_v62  ;;  %v1786_v24 = vmul.f32 %v4087_v55, %v4087_v55  ;;  %v1813_v52 = vmul.f32 %v4092_v36, %v3930_v23 }
 0xa1a   : >> { %1852 = vst [vmem:[#allocation3 + $0x8] sm:$0xff] %v4092_v36  ;;  %v1800_v12 = vmul.f32 %v4092_v36, %v3705_v59  ;;  %v1787_v29 = vmul.f32 %v4092_v36, %v4092_v36  ;;  %v1838_v62 = vmul.f32 %v4087_v55, %v4691_v63  ;;  %v1839_v31 = vmul.f32 %v4092_v36, %v4692_v1 }
 0xa1b   : >> { %v1814_v21 = vadd.f32 %v1813_v52, %v1812_v49  ;;  %v1825_v25 = vmul.f32 %v4087_v55, %v3722_v42  ;;  %v1826_v59 = vmul.f32 %v4092_v36, %v3724_v37 }
 0xa1c   : >> { %v1801_v32 = vadd.f32 %v1800_v12, %v1799_v61  ;;  %v1788_v30 = vadd.f32 %v1787_v29, %v1786_v24  ;;  %v1840_v2 = vadd.f32 %v1839_v31, %v1838_v62 }
 0xa1d   : >> { %1815 = vadd.xlane.f32.xlu2 %v1814_v21  ;;  %v1827_v58 = vadd.f32 %v1826_v59, %v1825_v25 }
 0xa1e   : >> { %1802 = vadd.xlane.f32.xlu1 %v1801_v32  ;;  %1789 = vadd.xlane.f32.xlu0 %v1788_v30 }
 0xa25   : >> { %1841 = vadd.xlane.f32.xlu2 %v1840_v2 }
 0xa26   : >> { %1828 = vadd.xlane.f32.xlu1 %v1827_v58 }
 0xa90   : >> { %v1816_v39 = vpop.xlane.xlu2 %1815 }
 0xa91   : >> { %v1803_v8 = vpop.xlane.xlu1 %1802  ;;  %v1817_v40 = vrot.slane %v1816_v39, 4  ;;  %v1790_v60 = vpop.xlane.xlu0 %1789 }
 0xa92   : >> { %v1804_v41 = vrot.slane %v1803_v8, 4  ;;  %v1791_v53 = vrot.slane %v1790_v60, 4 }
 0xa93   : >> { %v1818_v63 = vadd.f32 %v1817_v40, %v1816_v39 }
 0xa94   : >> { %v1805_v28 = vadd.f32 %v1804_v41, %v1803_v8  ;;  %v1792_v17 = vadd.f32 %v1791_v53, %v1790_v60 }
 0xa95   : >> { %v1819_v1 = vrot.slane %v1818_v63, 2 }
 0xa96   : >> { %v1806_v57 = vrot.slane %v1805_v28, 2  ;;  %v1793_v46 = vrot.slane %v1792_v17, 2 }
 0xa97   : >> { %v1820_v42 = vadd.f32 %v1819_v1, %v1818_v63 }
 0xa98   : >> { %v1807_v47 = vadd.f32 %v1806_v57, %v1805_v28  ;;  %v1794_v50 = vadd.f32 %v1793_v46, %v1792_v17  ;;  %v1842_v45 = vpop.xlane.xlu2 %1841 }
 0xa99   : >> { %v1829_v37 = vpop.xlane.xlu1 %1828  ;;  %v1821_v26 = vrot.slane %v1820_v42, 1  ;;  %v1843_v12 = vrot.slane %v1842_v45, 4 }
 0xa9a   : >> { %v1808_v20 = vrot.slane %v1807_v47, 1  ;;  %v1830_v44 = vrot.slane %v1829_v37, 4  ;;  %v1795_v18 = vrot.slane %v1794_v50, 1 }
 0xa9b   : >> { %v1844_v59 = vadd.f32 %v1843_v12, %v1842_v45 }
 0xa9c   : >> { %v4117_v51 = vadd.f32 %v1808_v20, %v1807_v47   ;;  %v1831_v49 = vadd.f32 %v1830_v44, %v1829_v37  ;;  %v4123_v47 = vadd.f32 %v1821_v26, %v1820_v42   ;;  %v4125_v61 = vadd.f32 %v1795_v18, %v1794_v50   ;;  %v4713_v18 = vld [vmem:[#allocation28_spill] sm:$0xff] }
 0xa9d   : >> { %v1845_v40 = vrot.slane %v1844_v59, 2 }
 0xa9e   : >> { %v4711_v22 = vmov %v4117_v51  ;;  %4712 = vst [vmem:[#allocation8_spill] sm:$0xff] %v4123_v47  ;;  %v1832_v32 = vrot.slane %v1831_v49, 2  ;;  %v1897_v30 = vadd.f32 0.0001, %v4125_v61  ;;  %vm1871_vm13 = vcmp.eq.f32.partialorder %v4125_v61, inf }
 0xa9f   : >> { %v4121_v35 = vmul.f32 %v4711_v22, %v3735_v33  ;;  %v1898_v24 = vmul.f32 %v4711_v22, %v3961_v7  ;;  %v1846_v60 = vadd.f32 %v1845_v40, %v1844_v59  ;;  %v1910_v53 = vmul.f32 %v4711_v22, %v3765_v34 }
 0xaa0   : >> { %v1833_v25 = vadd.f32 %v1832_v32, %v1831_v49  ;;  %v1912_v45 = vmul.f32 %v4711_v22, %v4713_v18 }
 0xaa1   : >> { %v1901_v52 = vmul.f32 %v4121_v35, %v3955_v9  ;;  %v1903_v21 = vmul.f32 %v4121_v35, %v4711_v22  ;;  %v4136_v62 = vsub.f32 %v4123_v47, %v1898_v24  ;;  %v1905_v17 = vmul.f32 %v4121_v35, %v3756_v3 }
 0xaa2   : >> { %v1834_v8 = vrot.slane %v1833_v25, 1  ;;  %v1847_v57 = vrot.slane %v1846_v60, 1 }
 0xaa3   : >> { %v1902_v29 = vsub.f32 %v4123_v47, %v1901_v52  ;;  %v1904_v2 = vsub.f32 %v1897_v30, %v1903_v21  ;;  %v1923_v50 = vmul.f32 %v4136_v62, %v3980_v16  ;;  %v4714_v52 = vld [vmem:[#allocation27_spill] sm:$0xff]  ;;  %v1907_v16 = vmul.f32 %v4121_v35, %v3781_v43 }
 0xaa4   : >> { %v1835_v41 = vadd.f32 %v1834_v8, %v1833_v25  ;;  %v1848_v26 = vadd.f32 %v1847_v57, %v1846_v60 }
 0xaa5   : >> { %v4139_v31 = vmul.f32 %v1902_v29, %v3968_v19  ;;  %v4715_v29 = vld [vmem:[#allocation24_spill] sm:$0xff] }
 0xaa6   : >> { %v1911_v1 = vsub.f32 %v1835_v41, %v1910_v53  ;;  %v1906_v37 = vsub.f32 %v1835_v41, %v1905_v17  ;;  %v1913_v24 = vsub.f32 %v1848_v26, %v1912_v45  ;;  %v1925_v21 = vmul.f32 %v4136_v62, %v4715_v29  ;;  %v4716_v53 = vld [vmem:[#allocation29_spill] sm:$0xff]  ;;  %v4717_v17 = vld [vmem:[#allocation30_spill] sm:$0xff] }
 0xaa7   : >> { %v1915_v58 = vmul.f32 %v4139_v31, %v4136_v62  ;;  %v1917_v42 = vmul.f32 %v4139_v31, %v3984_v13  ;;  %v1908_v30 = vsub.f32 %v1848_v26, %v1907_v16  ;;  %v1919_v25 = vmul.f32 %v4139_v31, %v4006_v38 }
 0xaa8   : >> { %v1924_v44 = vsub.f32 %v1911_v1, %v1923_v50  ;;  %v1926_v32 = vsub.f32 %v1913_v24, %v1925_v21 }
 0xaa9   : >> { %v1916_v39 = vsub.f32 %v1904_v2, %v1915_v58  ;;  %v1918_v34 = vsub.f32 %v1906_v37, %v1917_v42  ;;  %v4166_v58 = vsub.f32 %v1908_v30, %v1919_v25  ;;  %v4718_v42 = vld [vmem:[#allocation31_spill] sm:$0xff] }
 0xaab   : >> { %2827 = vrcp.f32 %v1916_v39 }
 0xab1   : >> { %v2828_v63 = vpop.eup %2827 }
 0xab2   : >> { %v1928_v28 = vmul.f32 %v2828_v63, %v1916_v39 }
 0xab4   : >> { %v1929_v46 = vsub.f32 2.0, %v1928_v28 }
 0xab6   : >> { %v4151_v20 = vmul.f32 %v2828_v63, %v1929_v46  ;;  %v1921_v46 = vmul.f32 %v4139_v31, %v4025_v48 }
 0xab8   : >> { %v1931_v51 = vmul.f32 %v4151_v20, %v1924_v44  ;;  %v4164_v59 = vmul.f32 %v4151_v20, %v1926_v32  ;;  %v1909_v44 = vsub.f32 1.0, %v4121_v35 }
 0xaba   : >> { %v1932_v49 = vmul.f32 %v1931_v51, %v1918_v34  ;;  %v1939_v39 = vmul.f32 %v4164_v59, %v1918_v34  ;;  %v1934_v40 = vmul.f32 %v1931_v51, %v4166_v58  ;;  %v1941_v60 = vmul.f32 %v4164_v59, %v4166_v58 }
 0xabb   : >> { %v4181_v45 = vsub.f32 %v1909_v44, %v1921_v46 }
 0xabc   : >> { %v1933_v12 = vsub.f32 %v4714_v52, %v1932_v49  ;;  %v1940_v63 = vsub.f32 %v4716_v53, %v1939_v39  ;;  %v1935_v1 = vsub.f32 %v4717_v17, %v1934_v40  ;;  %v4177_v50 = vsub.f32 %v4718_v42, %v1941_v60  ;;  %v4719_v52 = vld [vmem:[#allocation32_spill] sm:$0xff] }
 0xabd   : >> { %v1936_v49 = vmul.f32 %v1931_v51, %v4181_v45  ;;  %v1943_v24 = vmul.f32 %v4164_v59, %v4181_v45 }
 0xabe   : >> { %2829 = vrcp.f32 %v1933_v12 }
 0xabf   : >> { %v4188_v30 = vsub.f32 %v4046_v15, %v1943_v24 }
 0xac4   : >> { %v2830_v2 = vpop.eup %2829 }
 0xac5   : >> { %v1946_v8 = vmul.f32 %v2830_v2, %v1933_v12  ;;  %v1937_v12 = vsub.f32 %v4719_v52, %v1936_v49 }
 0xac7   : >> { %v1947_v41 = vsub.f32 2.0, %v1946_v8 }
 0xac9   : >> { %v1948_v28 = vmul.f32 %v2830_v2, %v1947_v41 }
 0xacb   : >> { %v1949_v57 = vmul.f32 %v1948_v28, %v1940_v63 }
 0xacd   : >> { %v1950_v37 = vmul.f32 %v1949_v57, %v1935_v1  ;;  %v1952_v16 = vmul.f32 %v1949_v57, %v1937_v12 }
 0xacf   : >> { %v1951_v26 = vsub.f32 %v4177_v50, %v1950_v37  ;;  %v1953_v2 = vsub.f32 %v4188_v30, %v1952_v16 }
 0xad1   : >> { %2831 = vrcp.f32 %v1951_v26 }
 0xad7   : >> { %v2832_v21 = vpop.eup %2831 }
 0xad8   : >> { %v1955_v32 = vmul.f32 %v2832_v21, %v1951_v26 }
 0xada   : >> { %v1956_v25 = vsub.f32 2.0, %v1955_v32 }
 0xadc   : >> { %v1957_v39 = vmul.f32 %v2832_v21, %v1956_v25 }
 0xade   : >> { %v1958_v8 = vmul.f32 %v1957_v39, %v1953_v2 }
 0xae0   : >> { %v1959_v40 = vmul.f32 %v1958_v8, %v1935_v1  ;;  %v1964_v63 = vmul.f32 %v1958_v8, %v4166_v58  ;;  %v1971_v44 = vmul.f32 %v1958_v8, %v4006_v38  ;;  %v1980_v21 = vmul.f32 %v1958_v8, %v3781_v43 }
 0xae2   : >> { %v1960_v41 = vsub.f32 %v1937_v12, %v1959_v40 }
 0xae4   : >> { %v1961_v60 = vmul.f32 %v1960_v41, %v1948_v28 }
 0xae6   : >> { %v1962_v51 = vmul.f32 %v1961_v60, %v1918_v34  ;;  %v1969_v42 = vmul.f32 %v1961_v60, %v3984_v13  ;;  %v1978_v52 = vmul.f32 %v1961_v60, %v3756_v3 }
 0xae8   : >> { %v1963_v53 = vsub.f32 %v4181_v45, %v1962_v51 }
 0xaea   : >> { %v1965_v17 = vsub.f32 %v1963_v53, %v1964_v63 }
 0xaec   : >> { %v1966_v57 = vmul.f32 %v1965_v17, %v4151_v20 }
 0xaee   : >> { %v1967_v46 = vmul.f32 %v1966_v57, %v4136_v62  ;;  %v1976_v49 = vmul.f32 %v1966_v57, %v4711_v22 }
 0xaf0   : >> { %v1968_v15 = vsub.f32 %v4025_v48, %v1967_v46 }
 0xaf2   : >> { %v1970_v37 = vsub.f32 %v1968_v15, %v1969_v42  ;;  %v4204_v15 = vld [vmem:[#allocation2 + $0x30] sm:$0xff] }
 0xaf3   : >> { %4720 = vst [vmem:[#allocation33_spill] sm:$0xff] %v4204_v15 }
 0xaf4   : >> { %v1972_v1 = vsub.f32 %v1970_v37, %v1971_v44  ;;  %v4208_v44 = vld [vmem:[#allocation2] sm:$0xff] }
 0xaf5   : >> { %4721 = vst [vmem:[#allocation34_spill] sm:$0xff] %v4208_v44 }
 0xaf6   : >> { %v1973_v28 = vmul.f32 %v1972_v1, %v3968_v19  ;;  %v2012_v1 = vld [vmem:[#allocation2 + $0x8] sm:$0xff] }
 0xaf8   : >> { %v1974_v34 = vmul.f32 %v1973_v28, %v3955_v9 }
 0xafa   : >> { %v1975_v26 = vsub.f32 1.0, %v1974_v34 }
 0xafc   : >> { %v1977_v24 = vsub.f32 %v1975_v26, %v1976_v49 }
 0xafe   : >> { %v1979_v12 = vsub.f32 %v1977_v24, %v1978_v52 }
 0xb00   : >> { %v1981_v16 = vsub.f32 %v1979_v12, %v1980_v21 }
 0xb02   : >> { %v1982_v13 = vmul.f32 %v1981_v16, %v3735_v33 }
 0xb04   : >> { %v1983_v32 = vadd.f32 %v1982_v13, %v1973_v28 }
 0xb06   : >> { %v1984_v25 = vadd.f32 %v1983_v32, %v1966_v57 }
 0xb08   : >> { %v1985_v2 = vadd.f32 %v1984_v25, %v1961_v60 }
 0xb0a   : >> { %v1986_v39 = vadd.f32 %v1985_v2, %v1958_v8 }
 0xb0c   : >> { %2833 = vrcp.f32 %v1986_v39 }
 0xb12   : >> { %v2834_v40 = vpop.eup %2833 }
 0xb13   : >> { %v1988_v41 = vmul.f32 %v2834_v40, %v1986_v39 }
 0xb15   : >> { %v1989_v51 = vsub.f32 2.0, %v1988_v41 }
 0xb17   : >> { %v1990_v53 = vmul.f32 %v2834_v40, %v1989_v51 }
 0xb19   : >> { %v1991_v63 = vmul.f32 %v1990_v53, %v1982_v13  ;;  %v1992_v17 = vmul.f32 %v1990_v53, %v1973_v28  ;;  %v1993_v46 = vmul.f32 %v1990_v53, %v1966_v57  ;;  %v1994_v3 = vmul.f32 %v1990_v53, %v1961_v60  ;;  %v2013_v28 = vld [vmem:[#allocation2 + $0x20] sm:$0xff]  ;;  %v4216_v13 = vld [vmem:[#allocation2 + $0x38] sm:$0xff] }
 0xb1a   : >> { %v1995_v49 = vmul.f32 %v1990_v53, %v1958_v8  ;;  %v4213_v57 = vld [vmem:[#allocation2 + $0x40] sm:$0xff]  ;;  %4723 = vst [vmem:[#allocation27_spill] sm:$0xff] %v4216_v13 }
 0xb1b   : >> { %v1998_v42 = vmul.f32 %v4204_v15, %v1991_v63  ;;  %v2002_v37 = vmul.f32 %v1992_v17, %v3918_v11  ;;  %v1999_v34 = vmul.f32 %v4208_v44, %v1991_v63  ;;  %v2003_v26 = vmul.f32 %v1992_v17, %v3921_v10  ;;  %4722 = vst [vmem:[#allocation28_spill] sm:$0xff] %v4213_v57 }
 0xb1c   : >> { %v2008_v52 = vmul.f32 %v1993_v46, %v4080_v54  ;;  %v2009_v60 = vmul.f32 %v1993_v46, %v4083_v56  ;;  %v2014_v16 = vmul.f32 %v2012_v1, %v1994_v3  ;;  %v2015_v25 = vmul.f32 %v2013_v28, %v1994_v3 }
 0xb1d   : >> { %v2004_v24 = vadd.f32 %v2002_v37, %v1998_v42  ;;  %v2005_v12 = vadd.f32 %v2003_v26, %v1999_v34  ;;  %v2020_v39 = vmul.f32 %v4213_v57, %v1995_v49  ;;  %v2021_v8 = vmul.f32 %v4216_v13, %v1995_v49  ;;  %v4246_v37 = vld [vmem:[#allocation3 + $0x48] sm:$0xff]  ;;  %v4253_v26 = vld [vmem:[#allocation3] sm:$0xff] }
 0xb1e   : >> { %4728 = vst [vmem:[#allocation32_spill] sm:$0xff] %v4246_v37 }
 0xb1f   : >> { %v2010_v21 = vadd.f32 %v2008_v52, %v2004_v24  ;;  %v2011_v32 = vadd.f32 %v2009_v60, %v2005_v12  ;;  %4729 = vst [vmem:[#allocation37_spill] sm:$0xff] %v4253_v26 }
 0xb21   : >> { %v2016_v2 = vadd.f32 %v2014_v16, %v2010_v21  ;;  %v2017_v40 = vadd.f32 %v2015_v25, %v2011_v32  ;;  %v2119_v21 = vld [vmem:[#allocation3 + $0x20] sm:$0xff]  ;;  %v2872_v25 = vld [vmem:[#allocation2] sm:$0xff] }
 0xb22   : >> { %v2871_v16 = vld [vmem:[#allocation2 + $0x30] sm:$0xff] }
 0xb23   : >> { %v4220_v41 = vadd.f32 %v2020_v39, %v2016_v2  ;;  %v4222_v51 = vadd.f32 %v2021_v8, %v2017_v40  ;;  %v1225_v32 = vmul.f32 %v2871_v16, %v2871_v16  ;;  %v1226_v2 = vmul.f32 %v2872_v25, %v2872_v25 }
 0xb25   : >> { %2039 = vmatpush.msrb.mxu2 %v4220_v41  ;;  %2059 = vmatpush.msrb.mxu3 %v4222_v51  ;;  %v1227_v8 = vadd.f32 %v1226_v2, %v1225_v32 }
 0xb26   : >> { %2593 = vmatmul.msk.f32.vlgmr.msrb.gmra.mxu2 %vm179_vm0, %v4669_v0  ;;  %2594 = vmatmul.msk.f32.vlgmr.msrb.gmra.mxu3 %vm179_vm0, %v4669_v0 }
 0xba9   : >> { %v2041_v53 = vpop.f32.mrf.mxu2  ;;  %v2061_v17 = vpop.f32.mrf.mxu3 }
 0xbaa   : >> { %v4231_v63 = vadd.f32 %v2041_v53, %v4670_v4  ;;  %v4234_v46 = vadd.f32 %v2061_v17, %v4671_v5 }
 0xbac   : >> { %4724 = vst [vmem:[#allocation24_spill] sm:$0xff] %v4231_v63  ;;  %v4238_v3 = vsub.f32 %v4231_v63, %v4220_v41  ;;  %v4243_v42 = vsub.f32 %v4234_v46, %v4222_v51 }
 0xbad   : >> { %4725 = vst [vmem:[#allocation29_spill] sm:$0xff] %v4234_v46 }
 0xbae   : >> { %4726 = vst [vmem:[#allocation30_spill] sm:$0xff] %v4238_v3  ;;  %v2107_v1 = vmul.f32 %v4238_v3, %v4087_v55  ;;  %v2094_v34 = vmul.f32 %v4238_v3, %v3925_v14  ;;  %v2081_v49 = vmul.f32 %v4246_v37, %v4238_v3  ;;  %v2108_v24 = vmul.f32 %v4243_v42, %v4092_v36  ;;  %v2118_v14 = vld [vmem:[#allocation3 + $0x28] sm:$0xff] }
 0xbaf   : >> { %2131 = vst [vmem:[#allocation2 + $0x8] sm:$0xff] %v4231_v63  ;;  %v2095_v52 = vmul.f32 %v4243_v42, %v3930_v23  ;;  %v2082_v28 = vmul.f32 %v4253_v26, %v4243_v42  ;;  %v2120_v36 = vmul.f32 %v2118_v14, %v4238_v3  ;;  %v2121_v39 = vmul.f32 %v2119_v21, %v4243_v42 }
 0xbb0   : >> { %4727 = vst [vmem:[#allocation31_spill] sm:$0xff] %v4243_v42  ;;  %v2109_v55 = vadd.f32 %v2108_v24, %v2107_v1  ;;  %v2068_v23 = vmul.f32 %v4238_v3, %v4238_v3  ;;  %v2069_v40 = vmul.f32 %v4243_v42, %v4243_v42  ;;  %v2135_v1 = vmul.f32 %v4231_v63, %v4231_v63 }
 0xbb1   : >> { %2132 = vst [vmem:[#allocation2 + $0x20] sm:$0xff] %v4234_v46  ;;  %v2096_v12 = vadd.f32 %v2095_v52, %v2094_v34  ;;  %v2083_v60 = vadd.f32 %v2082_v28, %v2081_v49  ;;  %v2122_v53 = vadd.f32 %v2121_v39, %v2120_v36  ;;  %v2136_v34 = vmul.f32 %v4234_v46, %v4234_v46 }
 0xbb2   : >> { %2133 = vst [vmem:[#allocation3 + $0x30] sm:$0xff] %v4238_v3  ;;  %2110 = vadd.xlane.f32.xlu2 %v2109_v55  ;;  %v2070_v17 = vadd.f32 %v2069_v40, %v2068_v23  ;;  %v1853_v49 = vmul.f32 %v4080_v54, %v4080_v54  ;;  %v1854_v24 = vmul.f32 %v4083_v56, %v4083_v56 }
 0xbb3   : >> { %2134 = vst [vmem:[#allocation3 + $0x18] sm:$0xff] %v4243_v42  ;;  %2097 = vadd.xlane.f32.xlu1 %v2096_v12  ;;  %2084 = vadd.xlane.f32.xlu0 %v2083_v60  ;;  %v1553_v52 = vmul.f32 %v3918_v11, %v3918_v11  ;;  %v1554_v28 = vmul.f32 %v3921_v10, %v3921_v10 }
 0xbb4   : >> { %v2137_v55 = vadd.f32 %v2136_v34, %v2135_v1  ;;  %v1855_v12 = vadd.f32 %v1854_v24, %v1853_v49 }
 0xbb5   : >> { %v1555_v60 = vadd.f32 %v1554_v28, %v1553_v52 }
 0xbba   : >> { %1228 = vadd.xlane.f32.xlu2 %v1227_v8 }
 0xbbb   : >> { %2123 = vadd.xlane.f32.xlu1 %v2122_v53  ;;  %2071 = vadd.xlane.f32.xlu0 %v2070_v17 }
 0xbc2   : >> { %2138 = vadd.xlane.f32.xlu2 %v2137_v55 }
 0xbc3   : >> { %1856 = vadd.xlane.f32.xlu1 %v1855_v12  ;;  %1556 = vadd.xlane.f32.xlu0 %v1555_v60 }
 0xc25   : >> { %v2111_v14 = vpop.xlane.xlu2 %2110 }
 0xc26   : >> { %v2098_v21 = vpop.xlane.xlu1 %2097  ;;  %v2112_v16 = vrot.slane %v2111_v14, 4  ;;  %v2085_v54 = vpop.xlane.xlu0 %2084 }
 0xc27   : >> { %v2099_v32 = vrot.slane %v2098_v21, 4  ;;  %v2086_v25 = vrot.slane %v2085_v54, 4 }
 0xc28   : >> { %v2113_v56 = vadd.f32 %v2112_v16, %v2111_v14 }
 0xc29   : >> { %v2100_v2 = vadd.f32 %v2099_v32, %v2098_v21  ;;  %v2087_v36 = vadd.f32 %v2086_v25, %v2085_v54 }
 0xc2a   : >> { %v2114_v23 = vrot.slane %v2113_v56, 2 }
 0xc2b   : >> { %v2101_v39 = vrot.slane %v2100_v2, 2  ;;  %v2088_v11 = vrot.slane %v2087_v36, 2 }
 0xc2c   : >> { %v2115_v52 = vadd.f32 %v2114_v23, %v2113_v56 }
 0xc2d   : >> { %v2102_v40 = vadd.f32 %v2101_v39, %v2100_v2  ;;  %v2089_v10 = vadd.f32 %v2088_v11, %v2087_v36  ;;  %v1229_v8 = vpop.xlane.xlu2 %1228 }
 0xc2e   : >> { %v2124_v53 = vpop.xlane.xlu1 %2123  ;;  %v1230_v17 = vrot.slane %v1229_v8, 4  ;;  %v2072_v1 = vpop.xlane.xlu0 %2071  ;;  %v2116_v54 = vrot.slane %v2115_v52, 1 }
 0xc2f   : >> { %v2090_v34 = vrot.slane %v2089_v10, 1  ;;  %v2073_v49 = vrot.slane %v2072_v1, 4  ;;  %v2103_v28 = vrot.slane %v2102_v40, 1  ;;  %v2125_v16 = vrot.slane %v2124_v53, 4 }
 0xc30   : >> { %v1231_v24 = vadd.f32 %v1230_v17, %v1229_v8  ;;  %v4730_v8 = vld [vmem:[#allocation25_spill] sm:$0xff] }
 0xc31   : >> { %v4282_v55 = vadd.f32 %v2090_v34, %v2089_v10   ;;  %v2074_v12 = vadd.f32 %v2073_v49, %v2072_v1  ;;  %2835 = vrsqrt.f32 %v4730_v8  ;;  %v4289_v25 = vadd.f32 %v2103_v28, %v2102_v40  }
 0xc32   : >> { %v1232_v60 = vrot.slane %v1231_v24, 2  ;;  %v2126_v40 = vadd.f32 %v2125_v16, %v2124_v53  ;;  %v4302_v49 = vadd.f32 %v2116_v54, %v2115_v52   ;;  %vm1243_vm3 = vcmp.eq.f32.partialorder %v4730_v8, inf }
 0xc33   : >> { %v4287_v14 = vmul.f32 %v4282_v55, %v3735_v33  ;;  %v2075_v32 = vrot.slane %v2074_v12, 2  ;;  %4731 = vst [vmem:[#allocation14_spill] sm:$0xff] %v4289_v25  ;;  %v2180_v11 = vmul.f32 %v4282_v55, %v3961_v7  ;;  %vm1245_vm10 = vcmp.eq.f32.partialorder %v4730_v8, 0.0 }
 0xc34   : >> { %v1233_v21 = vadd.f32 %v1232_v60, %v1231_v24  ;;  %4732 = vst [vmem:[#allocation15_spill] sm:$0xff] %v4302_v49 }
 0xc35   : >> { %v2185_v2 = vmul.f32 %v4287_v14, %v3955_v9  ;;  %v2139_v36 = vpop.xlane.xlu2 %2138  ;;  %v2187_v10 = vmul.f32 %v4287_v14, %v4711_v22  ;;  %v2076_v34 = vadd.f32 %v2075_v32, %v2074_v12  ;;  %v2127_v12 = vrot.slane %v2126_v40, 2 }
 0xc36   : >> { %v1234_v56 = vrot.slane %v1233_v21, 1  ;;  %v1857_v39 = vpop.xlane.xlu1 %1856  ;;  %v2140_v28 = vrot.slane %v2139_v36, 4  ;;  %v1557_v52 = vpop.xlane.xlu0 %1556  ;;  %v2182_v32 = vmul.f32 %v4282_v55, %v4121_v35 }
 0xc37   : >> { %v2186_v23 = vsub.f32 %v4289_v25, %v2185_v2  ;;  %v4298_v17 = vpop.eup %2835  ;;  %v1858_v60 = vrot.slane %v1857_v39, 4  ;;  %v4311_v2 = vsub.f32 %v4289_v25, %v2180_v11  ;;  %v2077_v16 = vrot.slane %v2076_v34, 1 }
 0xc38   : >> { %v4300_v1 = vadd.f32 %v1234_v56, %v1233_v21  ;;  %v1237_v7 = vmul.f32 %v4298_v17, %v4730_v8  ;;  %v2188_v21 = vsub.f32 %v4302_v49, %v2187_v10  ;;  %v2141_v56 = vadd.f32 %v2140_v28, %v2139_v36 }
 0xc39   : >> { %v4305_v24 = vmul.f32 %v2186_v23, %v3968_v19  ;;  %v1859_v23 = vadd.f32 %v1858_v60, %v1857_v39  ;;  %v4318_v47 = vadd.f32 %v2077_v16, %v2076_v34   ;;  %v1558_v42 = vrot.slane %v1557_v52, 4 }
 0xc3a   : >> { %2837 = vrsqrt.f32 %v4300_v1  ;;  %v1238_v11 = vmul.f32 %v4298_v17, %v1237_v7  ;;  %v2196_v10 = vmul.f32 %v4311_v2, %v4139_v31  ;;  %v2142_v25 = vrot.slane %v2141_v56, 2 }
 0xc3b   : >> { %v2199_v53 = vmul.f32 %v4305_v24, %v4136_v62  ;;  %v1860_v3 = vrot.slane %v1859_v23, 2  ;;  %v2128_v37 = vadd.f32 %v2127_v12, %v2126_v40  ;;  %v2183_v35 = vsub.f32 %v4302_v49, %v2182_v32 }
 0xc3c   : >> { %v2189_v36 = vmul.f32 %v4287_v14, %v4282_v55  ;;  %v2179_v34 = vadd.f32 0.0001, %v4318_v47  ;;  %v2143_v28 = vadd.f32 %v2142_v25, %v2141_v56  ;;  %v1559_v60 = vadd.f32 %v1558_v42, %v1557_v52 }
 0xc3d   : >> { %v2200_v54 = vsub.f32 %v2188_v21, %v2199_v53  ;;  %v4733_v53 = vld [vmem:[#allocation23_spill] sm:$0xff]  ;;  %v1861_v31 = vadd.f32 %v1860_v3, %v1859_v23  ;;  %v1239_v7 = vmul.f32 0.5, %v1238_v11  ;;  %v4332_v16 = vsub.f32 %v2183_v35, %v2196_v10 }
 0xc3e   : >> { %2839 = vrsqrt.f32 %v4733_v53  ;;  %v2144_v40 = vrot.slane %v2143_v28, 1  ;;  %v1560_v4 = vrot.slane %v1559_v60, 2  ;;  %v2190_v0 = vsub.f32 %v2179_v34, %v2189_v36 }
 0xc3f   : >> { %v4329_v39 = vmul.f32 %v2200_v54, %v4151_v20  ;;  %v1862_v12 = vrot.slane %v1861_v31, 1  ;;  %2841 = vrsqrt.f32 %v4125_v61  ;;  %v2129_v49 = vrot.slane %v2128_v37, 1 }
 0xc40   : >> { %v2838_v26 = vpop.eup %2837  ;;  %v2201_v54 = vmul.f32 %v4305_v24, %v4311_v2  ;;  %v4341_v42 = vadd.f32 %v2144_v40, %v2143_v28  ;;  %v1561_v25 = vadd.f32 %v1560_v4, %v1559_v60  ;;  %v1240_v23 = vsub.f32 1.5, %v1239_v7 }
 0xc41   : >> { %v1249_v5 = vmul.f32 %v2838_v26, %v4300_v1  ;;  %v2210_v3 = vmul.f32 %v4329_v39, %v4332_v16  ;;  %v2130_v10 = vadd.f32 %v2129_v49, %v2128_v37  ;;  %v2207_v40 = vmul.f32 %v4311_v2, %v4715_v29 }
 0xc42   : >> { %2843 = vrsqrt.f32 %v4341_v42  ;;  %v2202_v56 = vsub.f32 %v2190_v0, %v2201_v54  ;;  %v1562_v35 = vrot.slane %v1561_v25, 1  ;;  %v1241_v0 = vmul.f32 %v4298_v17, %v1240_v23 }
 0xc43   : >> { %v1250_v21 = vmul.f32 %v2838_v26, %v1249_v5  ;;  %v4343_v5 = vadd.f32 %v1862_v12, %v1861_v31  ;;  %v2194_v31 = vmul.f32 %v4282_v55, %v4713_v18  ;;  %v2191_v54 = vmul.f32 %v4287_v14, %v3781_v43 }
 0xc44   : >> { %v4337_v13 = vpop.eup %2839  ;;  %v2211_v36 = vsub.f32 %v2202_v56, %v2210_v3  ;;  %v4353_v4 = vadd.f32 %v1562_v35, %v1561_v25  ;;  %v1242_v12 = vmul.f32 %v1241_v0, %v4730_v8  ;;  %vm1255_vm1 = vcmp.eq.f32.partialorder %v4300_v1, inf }
 0xc45   : >> { %v1251_v32 = vmul.f32 0.5, %v1250_v21  ;;  %v1565_v11 = vmul.f32 %v4337_v13, %v4733_v53  ;;  %2845 = vrsqrt.f32 %v4343_v5  ;;  %v4349_v34 = vpop.eup %2841  ;;  %v2195_v49 = vsub.f32 %v2130_v10, %v2194_v31 }
 0xc46   : >> { %2847 = vrcp.f32 %v2211_v36  ;;  %v1865_v37 = vmul.f32 %v4349_v34, %v4125_v61  ;;  %vm1257_vm2 = vcmp.eq.f32.partialorder %v4300_v1, 0.0  ;;  %v2192_v29 = vsub.f32 %v2130_v10, %v2191_v54 }
 0xc47   : >> { %v1252_v52 = vsub.f32 1.5, %v1251_v32  ;;  %v1566_v60 = vmul.f32 %v4337_v13, %v1565_v11  ;;  %2849 = vrsqrt.f32 %v4318_v47  ;;  %v2208_v56 = vsub.f32 %v2195_v49, %v2207_v40 }
 0xc48   : >> { %v2844_v7 = vpop.eup %2843  ;;  %2851 = vrsqrt.f32 %v4353_v4  ;;  %v1258_v49 = vand.u32 2147483648, %v4300_v1  ;;  %v2212_v10 = vmul.f32 %v4329_v39, %v4166_v58  ;;  %vm1883_vm4 = vcmp.eq.f32.partialorder %v4343_v5, inf }
 0xc49   : >> { %v1253_v28 = vmul.f32 %v2838_v26, %v1252_v52  ;;  %v2159_v21 = vmul.f32 %v2844_v7, %v4341_v42  ;;  %v1567_v32 = vmul.f32 0.5, %v1566_v60  ;;  %v1866_v52 = vmul.f32 %v4349_v34, %v1865_v37 }
 0xc4a   : >> { %v2203_v60 = vmul.f32 %v4305_v24, %v4006_v38  ;;  %v2216_v37 = vmul.f32 %v4332_v16, %v4164_v59  ;;  %vm2165_vm5 = vcmp.eq.f32.partialorder %v4341_v42, inf  ;;  %vm1885_vm6 = vcmp.eq.f32.partialorder %v4343_v5, 0.0 }
 0xc4b   : >> { %v2846_v26 = vpop.eup %2845  ;;  %v1254_v18 = vmul.f32 %v1253_v28, %v4300_v1  ;;  %v2160_v3 = vmul.f32 %v2844_v7, %v2159_v21  ;;  %v1568_v63 = vsub.f32 1.5, %v1567_v32  ;;  %vm2167_vm7 = vcmp.eq.f32.partialorder %v4341_v42, 0.0 }
 0xc4c   : >> { %v1877_v17 = vmul.f32 %v2846_v26, %v4343_v5  ;;  %v2848_v25 = vpop.eup %2847  ;;  %vm1583_vm8 = vcmp.eq.f32.partialorder %v4353_v4, inf  ;;  %vm1585_vm9 = vcmp.eq.f32.partialorder %v4353_v4, 0.0  ;;  %vm1571_vm11 = vcmp.eq.f32.partialorder %v4733_v53, inf }
 0xc4d   : >> { %v4371_v11 = vpop.eup %2849  ;;  %v2161_v35 = vmul.f32 0.5, %v2160_v3  ;;  %v2219_v28 = vmul.f32 %v2848_v25, %v2211_v36  ;;  %v1256_v0 = vsel %vm1255_vm1, %v4300_v1, %v1254_v18  ;;  %v2217_v36 = vsub.f32 %v2208_v56, %v2216_v37 }
 0xc4e   : >> { %v1878_v23 = vmul.f32 %v2846_v26, %v1877_v17  ;;  %v2852_v31 = vpop.eup %2851  ;;  %v2147_v18 = vmul.f32 %v4371_v11, %v4318_v47  ;;  %v1259_v3 = vsel %vm1257_vm2, %v1258_v49, %v1256_v0  ;;  %v1569_v32 = vmul.f32 %v4337_v13, %v1568_v63 }
 0xc4f   : >> { %v2162_v40 = vsub.f32 1.5, %v2161_v35  ;;  %v1577_v17 = vmul.f32 %v2852_v31, %v4353_v4  ;;  %v2220_v57 = vsub.f32 2.0, %v2219_v28  ;;  %v2204_v35 = vsub.f32 %v2192_v29, %v2203_v60 }
 0xc50   : >> { %v1879_v21 = vmul.f32 0.5, %v1878_v23  ;;  %v1867_v28 = vmul.f32 0.5, %v1866_v52  ;;  %v1260_v37 = vadd.f32 1e-05, %v1259_v3  ;;  %v1886_v0 = vand.u32 2147483648, %v4343_v5 }
 0xc51   : >> { %v2163_v46 = vmul.f32 %v2844_v7, %v2162_v40  ;;  %v1578_v59 = vmul.f32 %v2852_v31, %v1577_v17  ;;  %v4387_v23 = vmul.f32 %v2848_v25, %v2220_v57  ;;  %v4391_v33 = vsub.f32 %v2204_v35, %v2212_v10 }
 0xc52   : >> { %v1880_v54 = vsub.f32 1.5, %v1879_v21  ;;  %v2148_v21 = vmul.f32 %v4371_v11, %v2147_v18  ;;  %v1244_v7 = vsel %vm1243_vm3, %v4730_v8, %v1242_v12  ;;  %v1868_v52 = vsub.f32 1.5, %v1867_v28 }
 0xc53   : >> { %v1579_v15 = vmul.f32 0.5, %v1578_v59  ;;  %v2222_v56 = vmul.f32 %v4387_v23, %v2217_v36  ;;  %v2164_v57 = vmul.f32 %v2163_v46, %v4341_v42  ;;  %2853 = vrcp.f32 %v1260_v37 }
 0xc54   : >> { %v1881_v44 = vmul.f32 %v2846_v26, %v1880_v54  ;;  %v2193_v46 = vsub.f32 1.0, %v4287_v14  ;;  %v2205_v13 = vmul.f32 %v4305_v24, %v4025_v48  ;;  %v2214_v63 = vmul.f32 %v4329_v39, %v4181_v45 }
 0xc55   : >> { %v1580_v26 = vsub.f32 1.5, %v1579_v15  ;;  %v2223_v25 = vmul.f32 %v2222_v56, %v4391_v33  ;;  %v2166_v15 = vsel %vm2165_vm5, %v4341_v42, %v2164_v57  ;;  %v2168_v49 = vand.u32 2147483648, %v4341_v42 }
 0xc56   : >> { %v1882_v1 = vmul.f32 %v1881_v44, %v4343_v5  ;;  %v2149_v44 = vmul.f32 0.5, %v2148_v21  ;;  %v1246_v39 = vand.u32 2147483648, %v4730_v8  ;;  %v1869_v42 = vmul.f32 %v4349_v34, %v1868_v52 }
 0xc57   : >> { %v1581_v60 = vmul.f32 %v2852_v31, %v1580_v26  ;;  %v2224_v12 = vsub.f32 %v4177_v50, %v2223_v25  ;;  %v1586_v50 = vand.u32 2147483648, %v4353_v4  ;;  %v2169_v24 = vsel %vm2167_vm7, %v2168_v49, %v2166_v15 }
 0xc58   : >> { %v1884_v29 = vsel %vm1883_vm4, %v4343_v5, %v1882_v1  ;;  %v2150_v14 = vsub.f32 1.5, %v2149_v44  ;;  %v1570_v5 = vmul.f32 %v1569_v32, %v4733_v53  ;;  %v2206_v54 = vsub.f32 %v2193_v46, %v2205_v13 }
 0xc59   : >> { %v1887_v40 = vsel %vm1885_vm6, %v1886_v0, %v1884_v29  ;;  %v1582_v17 = vmul.f32 %v1581_v60, %v4353_v4  ;;  %2855 = vrcp.f32 %v2224_v12  ;;  %v2854_v18 = vpop.eup %2853  ;;  %v1247_v59 = vsel %vm1245_vm10, %v1246_v39, %v1244_v7 }
 0xc5a   : >> { %v1888_v10 = vadd.f32 1e-05, %v1887_v40  ;;  %v2170_v35 = vadd.f32 1e-05, %v2169_v24  ;;  %v2215_v28 = vsub.f32 %v2206_v54, %v2214_v63  ;;  %v1572_v21 = vsel %vm1571_vm11, %v4733_v53, %v1570_v5  ;;  %v4737_v24 = vld [vmem:[#allocation18_spill] sm:$0xff] }
 0xc5b   : >> { %v1584_v31 = vsel %vm1583_vm8, %v4353_v4, %v1582_v17  ;;  %v2151_v4 = vmul.f32 %v4371_v11, %v2150_v14  ;;  %v1262_v1 = vmul.f32 %v2854_v18, %v1247_v59  ;;  %v1870_v57 = vmul.f32 %v1869_v42, %v4125_v61  ;;  %v4734_v11 = vld [vmem:[#allocation20_spill] sm:$0xff]  ;;  %v4735_v17 = vld [vmem:[#allocation19_spill] sm:$0xff] }
 0xc5c   : >> { %v1587_v36 = vsel %vm1585_vm9, %v1586_v50, %v1584_v31  ;;  %v2225_v32 = vmul.f32 %v2222_v56, %v2215_v28  ;;  %vm1573_vm12 = vcmp.eq.f32.partialorder %v4733_v53, 0.0  ;;  %v1574_v34 = vand.u32 2147483648, %v4733_v53  ;;  %v4736_v50 = vld [vmem:[#allocation21_spill] sm:$0xff]  ;;  %v4738_v31 = vld [vmem:[#allocation22_spill] sm:$0xff]  ;;  %v4739_v42 = vld [vmem:[#allocation35_spill] sm:$0xff] }
 0xc5d   : >> { %v1588_v3 = vadd.f32 1e-05, %v1587_v36  ;;  %v2152_v7 = vmul.f32 %v2151_v4, %v4318_v47  ;;  %vm1263_vm14 = vcmp.lt.f32.partialorder %v1262_v1, %v4734_v11  ;;  %v1872_v0 = vsel %vm1871_vm13, %v4125_v61, %v1870_v57 }
 0xc5e   : >> { %v1575_v52 = vsel %vm1573_vm12, %v1574_v34, %v1572_v21  ;;  %v1874_v44 = vand.u32 2147483648, %v4125_v61  ;;  %v2226_v56 = vsub.f32 %v4188_v30, %v2225_v32  ;;  %vm2153_vm15 = vcmp.eq.f32.partialorder %v4318_v47, inf }
 0xc5f   : >> { %2857 = vrcp.f32 %v1588_v3  ;;  %v2856_v37 = vpop.eup %2855  ;;  %vm1873_vm1 = vcmp.eq.f32.partialorder %v4125_v61, 0.0  ;;  %v2154_v13 = vsel %vm2153_vm15, %v4318_v47, %v2152_v7  ;;  %v1264_v15 = vsel %vm1263_vm14, %v1262_v1, %v4734_v11  ;;  %v4740_v3 = vld [vmem:[#allocation36_spill] sm:$0xff] }
 0xc60   : >> { %2859 = vrcp.f32 %v1888_v10  ;;  %v2228_v26 = vmul.f32 %v2856_v37, %v2224_v12  ;;  %v1875_v40 = vsel %vm1873_vm1, %v1874_v44, %v1872_v0  ;;  %vm2155_vm2 = vcmp.eq.f32.partialorder %v4318_v47, 0.0  ;;  %v4741_v44 = vld [vmem:[#allocation26_spill] sm:$0xff] }
 0xc61   : >> { %2861 = vrcp.f32 %v2170_v35  ;;  %v2156_v30 = vand.u32 2147483648, %v4318_v47  ;;  %v1267_v14 = vsel %vm1263_vm14, %v4736_v50, %v4735_v17  ;;  %v1268_v39 = vsel %vm1263_vm14, %v4738_v31, %v4737_v24  ;;  %v2273_v50 = vld [vmem:[#allocation2 + $0x18] sm:$0xff]  ;;  %v4742_v24 = vld [vmem:[#allocation33_spill] sm:$0xff] }
 0xc62   : >> { %v2229_v25 = vsub.f32 2.0, %v2228_v26 }
 0xc63   : >> { %v2157_v36 = vsel %vm2155_vm2, %v2156_v30, %v2154_v13 }
 0xc64   : >> { %v2230_v60 = vmul.f32 %v2856_v37, %v2229_v25 }
 0xc65   : >> { %v2858_v29 = vpop.eup %2857 }
 0xc66   : >> { %v2860_v12 = vpop.eup %2859  ;;  %v1590_v46 = vmul.f32 %v2858_v29, %v1575_v52  ;;  %v4440_v63 = vmul.f32 %v2230_v60, %v2226_v56 }
 0xc67   : >> { %v2862_v49 = vpop.eup %2861  ;;  %v1890_v5 = vmul.f32 %v2860_v12, %v1875_v40 }
 0xc68   : >> { %vm1591_vm3 = vcmp.lt.f32.partialorder %v1590_v46, %v1264_v15  ;;  %v2232_v10 = vmul.f32 %v4440_v63, %v4391_v33  ;;  %v2172_v35 = vmul.f32 %v2862_v49, %v2157_v36 }
 0xc69   : >> { %v1592_v18 = vsel %vm1591_vm3, %v1590_v46, %v1264_v15  ;;  %v1595_v54 = vsel %vm1591_vm3, %v4739_v42, %v1267_v14  ;;  %v1596_v59 = vsel %vm1591_vm3, %v4740_v3, %v1268_v39  ;;  %v2274_v39 = vld [vmem:[#allocation2 + $0x10] sm:$0xff] }
 0xc6a   : >> { %v2233_v4 = vsub.f32 %v2215_v28, %v2232_v10  ;;  %vm1891_vm4 = vcmp.lt.f32.partialorder %v1890_v5, %v1592_v18 }
 0xc6b   : >> { %v1892_v37 = vsel %vm1891_vm4, %v1890_v5, %v1592_v18  ;;  %v1895_v21 = vsel %vm1891_vm4, %v4069_v6, %v1595_v54  ;;  %v1896_v57 = vsel %vm1891_vm4, %v4071_v27, %v1596_v59  ;;  %v2237_v6 = vmul.f32 %v4440_v63, %v4166_v58  ;;  %v4743_v5 = vld [vmem:[#allocation34_spill] sm:$0xff] }
 0xc6c   : >> { %v2234_v1 = vmul.f32 %v2233_v4, %v4387_v23  ;;  %vm2173_vm5 = vcmp.lt.f32.partialorder %v2172_v35, %v1892_v37  ;;  %v2873_v54 = vld [vmem:[#allocation2 + $0x48] sm:$0xff] }
 0xc6d   : >> { %v4459_v32 = vsel %vm2173_vm5, %v2172_v35, %v1892_v37  ;;  %v4462_v33 = vsel %vm2173_vm5, %v4220_v41, %v1895_v21  ;;  %v4465_v26 = vsel %vm2173_vm5, %v4222_v51, %v1896_v57  ;;  %v2244_v51 = vmul.f32 %v4440_v63, %v4006_v38  ;;  %v2280_v59 = vld [vmem:[#allocation2 + $0x28] sm:$0xff]  ;;  %v4744_v21 = vld [vmem:[#allocation24_spill] sm:$0xff] }
 0xc6e   : >> { %v2235_v34 = vmul.f32 %v2234_v1, %v4332_v16  ;;  %v2242_v41 = vmul.f32 %v2234_v1, %v4311_v2 }
 0xc70   : >> { %v2236_v28 = vsub.f32 %v4181_v45, %v2235_v34 }
 0xc72   : >> { %v2238_v7 = vsub.f32 %v2236_v28, %v2237_v6 }
 0xc74   : >> { %v2239_v27 = vmul.f32 %v2238_v7, %v4151_v20  ;;  %v2251_v20 = vmul.f32 %v2234_v1, %v4282_v55  ;;  %v4746_v7 = vld [vmem:[#allocation28_spill] sm:$0xff] }
 0xc76   : >> { %v2240_v23 = vmul.f32 %v2239_v27, %v4136_v62  ;;  %v2249_v58 = vmul.f32 %v2239_v27, %v4711_v22 }
 0xc78   : >> { %v2241_v25 = vsub.f32 %v4025_v48, %v2240_v23  ;;  %v2253_v48 = vmul.f32 %v4440_v63, %v3781_v43 }
 0xc7a   : >> { %v2243_v52 = vsub.f32 %v2241_v25, %v2242_v41  ;;  %v4747_v25 = vld [vmem:[#allocation27_spill] sm:$0xff] }
 0xc7c   : >> { %v2245_v11 = vsub.f32 %v2243_v52, %v2244_v51  ;;  %v4748_v51 = vld [vmem:[#allocation5_spill] sm:$0xff] }
 0xc7e   : >> { %v2246_v16 = vmul.f32 %v2245_v11, %v3968_v19 }
 0xc80   : >> { %v2247_v45 = vmul.f32 %v2246_v16, %v3955_v9 }
 0xc82   : >> { %v2248_v29 = vsub.f32 1.0, %v2247_v45 }
 0xc84   : >> { %v2250_v0 = vsub.f32 %v2248_v29, %v2249_v58  ;;  %v4750_v58 = vld [vmem:[#allocation7_spill] sm:$0xff] }
 0xc86   : >> { %v2252_v62 = vsub.f32 %v2250_v0, %v2251_v20 }
 0xc88   : >> { %v2254_v2 = vsub.f32 %v2252_v62, %v2253_v48 }
 0xc8a   : >> { %v2255_v56 = vmul.f32 %v2254_v2, %v4741_v44  ;;  %v4751_v44 = vld [vmem:[#allocation32_spill] sm:$0xff] }
 0xc8c   : >> { %v2256_v60 = vadd.f32 %v2255_v56, %v2246_v16 }
 0xc8e   : >> { %v2257_v38 = vadd.f32 %v2256_v60, %v2239_v27 }
 0xc90   : >> { %v2258_v12 = vadd.f32 %v2257_v38, %v2234_v1 }
 0xc92   : >> { %v2259_v19 = vadd.f32 %v2258_v12, %v4440_v63  ;;  %v4752_v12 = vld [vmem:[#allocation37_spill] sm:$0xff] }
 0xc94   : >> { %2863 = vrcp.f32 %v2259_v19 }
 0xc9a   : >> { %v2864_v46 = vpop.eup %2863 }
 0xc9b   : >> { %v2261_v13 = vmul.f32 %v2864_v46, %v2259_v19 }
 0xc9d   : >> { %v2262_v15 = vsub.f32 2.0, %v2261_v13 }
 0xc9f   : >> { %v2263_v49 = vmul.f32 %v2864_v46, %v2262_v15 }
 0xca1   : >> { %v2264_v40 = vmul.f32 %v2263_v49, %v2255_v56  ;;  %v2265_v30 = vmul.f32 %v2263_v49, %v2246_v16  ;;  %v2266_v17 = vmul.f32 %v2263_v49, %v2239_v27  ;;  %v2267_v14 = vmul.f32 %v2263_v49, %v2234_v1  ;;  %v4745_v1 = vld [vmem:[#allocation29_spill] sm:$0xff]  ;;  %v4749_v16 = vld [vmem:[#allocation6_spill] sm:$0xff] }
 0xca2   : >> { %v2268_v18 = vmul.f32 %v2263_v49, %v4440_v63  ;;  %v2365_v49 = vld [vmem:[#allocation3 + $0x10] sm:$0xff] }
 0xca3   : >> { %v2271_v43 = vmul.f32 %v2264_v40, %v4742_v24  ;;  %v2275_v31 = vmul.f32 %v2273_v50, %v2265_v30  ;;  %v2272_v10 = vmul.f32 %v2264_v40, %v4743_v5  ;;  %v2276_v36 = vmul.f32 %v2274_v39, %v2265_v30  ;;  %v2366_v40 = vld [vmem:[#allocation3 + $0x40] sm:$0xff]  ;;  %v2378_v50 = vld [vmem:[#allocation3 + $0x38] sm:$0xff] }
 0xca4   : >> { %v2281_v3 = vmul.f32 %v2873_v54, %v2266_v17  ;;  %v2282_v4 = vmul.f32 %v2280_v59, %v2266_v17  ;;  %v2287_v57 = vmul.f32 %v2267_v14, %v4744_v21  ;;  %v2288_v28 = vmul.f32 %v2267_v14, %v4745_v1  ;;  %v2379_v14 = vld [vmem:[#allocation3 + $0x8] sm:$0xff]  ;;  %v4753_v24 = vld [vmem:[#allocation30_spill] sm:$0xff] }
 0xca5   : >> { %v2277_v42 = vadd.f32 %v2275_v31, %v2271_v43  ;;  %v2278_v35 = vadd.f32 %v2276_v36, %v2272_v10  ;;  %v2293_v27 = vmul.f32 %v2268_v18, %v4746_v7  ;;  %v2294_v41 = vmul.f32 %v2268_v18, %v4747_v25  ;;  %v4754_v31 = vld [vmem:[#allocation31_spill] sm:$0xff] }
 0xca7   : >> { %v2283_v37 = vadd.f32 %v2281_v3, %v2277_v42  ;;  %v2284_v34 = vadd.f32 %v2282_v4, %v2278_v35 }
 0xca9   : >> { %v2289_v6 = vadd.f32 %v2287_v57, %v2283_v37  ;;  %v2290_v23 = vadd.f32 %v2288_v28, %v2284_v34 }
 0xcab   : >> { %v4492_v52 = vadd.f32 %v2293_v27, %v2289_v6  ;;  %v4494_v63 = vadd.f32 %v2294_v41, %v2290_v23 }
 0xcad   : >> { %2312 = vmatpush.msra.mxu0 %v4492_v52  ;;  %2332 = vmatpush.msra.mxu1 %v4494_v63 }
 0xcae   : >> { %2595 = vmatmul.msk.f32.vlgmr.msra.gmra.mxu0 %vm179_vm0, %v4748_v51  ;;  %2596 = vmatmul.msk.f32.vlgmr.msra.gmra.mxu1 %vm179_vm0, %v4748_v51 }
 0xd2b   : >> { %v2314_v11 = vpop.f32.mrf.mxu0  ;;  %v2334_v29 = vpop.f32.mrf.mxu1 }
 0xd2c   : >> { %v2337_v45 = vadd.f32 %v2314_v11, %v4749_v16  ;;  %v2338_v0 = vadd.f32 %v2334_v29, %v4750_v58 }
 0xd2e   : >> { %v2339_v20 = vsub.f32 %v2337_v45, %v4492_v52  ;;  %2404 = vst [vmem:[#allocation2 + $0x40] sm:$0xff] %v2337_v45  ;;  %v2408_v62 = vmul.f32 %v2337_v45, %v2337_v45  ;;  %v2340_v48 = vsub.f32 %v2338_v0, %v4494_v63  ;;  %v2409_v2 = vmul.f32 %v2338_v0, %v2338_v0 }
 0xd2f   : >> { %2405 = vst [vmem:[#allocation2 + $0x38] sm:$0xff] %v2338_v0 }
 0xd30   : >> { %2406 = vst [vmem:[#allocation3 + $0x28] sm:$0xff] %v2339_v20  ;;  %v2354_v56 = vmul.f32 %v2339_v20, %v4751_v44  ;;  %v2341_v60 = vmul.f32 %v2339_v20, %v2339_v20  ;;  %v2410_v38 = vadd.f32 %v2409_v2, %v2408_v62  ;;  %v2355_v19 = vmul.f32 %v2340_v48, %v4752_v12 }
 0xd31   : >> { %2407 = vst [vmem:[#allocation3 + $0x20] sm:$0xff] %v2340_v48  ;;  %v2342_v46 = vmul.f32 %v2340_v48, %v2340_v48  ;;  %v2367_v30 = vmul.f32 %v2365_v49, %v2339_v20  ;;  %v2368_v17 = vmul.f32 %v2366_v40, %v2340_v48  ;;  %v2393_v43 = vmul.f32 %v2339_v20, %v4753_v24 }
 0xd32   : >> { %2411 = vadd.xlane.f32.xlu0 %v2410_v38  ;;  %v2356_v13 = vadd.f32 %v2355_v19, %v2354_v56  ;;  %v2394_v39 = vmul.f32 %v2340_v48, %v4754_v31  ;;  %v2380_v5 = vmul.f32 %v2378_v50, %v2339_v20  ;;  %v2381_v10 = vmul.f32 %v2379_v14, %v2340_v48 }
 0xd33   : >> { %v2343_v15 = vadd.f32 %v2342_v46, %v2341_v60  ;;  %v2369_v36 = vadd.f32 %v2368_v17, %v2367_v30 }
 0xd34   : >> { %2357 = vadd.xlane.f32.xlu2 %v2356_v13  ;;  %v2395_v18 = vadd.f32 %v2394_v39, %v2393_v43  ;;  %v2382_v42 = vadd.f32 %v2381_v10, %v2380_v5 }
 0xd35   : >> { %2344 = vadd.xlane.f32.xlu1 %v2343_v15 }
 0xd3a   : >> { %2370 = vadd.xlane.f32.xlu0 %v2369_v36 }
 0xd3c   : >> { %2396 = vadd.xlane.f32.xlu2 %v2395_v18 }
 0xd3d   : >> { %2383 = vadd.xlane.f32.xlu1 %v2382_v42 }
 0xda5   : >> { %v2412_v54 = vpop.xlane.xlu0 %2411 }
 0xda6   : >> { %v2413_v3 = vrot.slane %v2412_v54, 4 }
 0xda7   : >> { %v2358_v59 = vpop.xlane.xlu2 %2357 }
 0xda8   : >> { %v2345_v35 = vpop.xlane.xlu1 %2344  ;;  %v2414_v4 = vadd.f32 %v2413_v3, %v2412_v54  ;;  %v2359_v37 = vrot.slane %v2358_v59, 4 }
 0xda9   : >> { %v2346_v21 = vrot.slane %v2345_v35, 4 }
 0xdaa   : >> { %v2415_v57 = vrot.slane %v2414_v4, 2  ;;  %v2360_v34 = vadd.f32 %v2359_v37, %v2358_v59 }
 0xdab   : >> { %v2347_v1 = vadd.f32 %v2346_v21, %v2345_v35 }
 0xdac   : >> { %v2416_v28 = vadd.f32 %v2415_v57, %v2414_v4  ;;  %v2361_v6 = vrot.slane %v2360_v34, 2 }
 0xdad   : >> { %v2348_v7 = vrot.slane %v2347_v1, 2  ;;  %v2371_v27 = vpop.xlane.xlu0 %2370 }
 0xdae   : >> { %v2417_v23 = vrot.slane %v2416_v28, 1  ;;  %v2362_v25 = vadd.f32 %v2361_v6, %v2360_v34  ;;  %v2372_v51 = vrot.slane %v2371_v27, 4 }
 0xdaf   : >> { %v2349_v41 = vadd.f32 %v2348_v7, %v2347_v1  ;;  %v2397_v11 = vpop.xlane.xlu2 %2396 }
 0xdb0   : >> { %v2384_v16 = vpop.xlane.xlu1 %2383  ;;  %v2418_v45 = vadd.f32 %v2417_v23, %v2416_v28  ;;  %v2363_v29 = vrot.slane %v2362_v25, 1  ;;  %v2373_v0 = vadd.f32 %v2372_v51, %v2371_v27  ;;  %v2398_v20 = vrot.slane %v2397_v11, 4 }
 0xdb1   : >> { %v2350_v58 = vrot.slane %v2349_v41, 1  ;;  %v2385_v62 = vrot.slane %v2384_v16, 4  ;;  %v4760_v23 = vmov %v4125_v61 }
 0xdb2   : >> { %2865 = vrsqrt.f32 %v2418_v45  ;;  %v4510_v31 = vadd.f32 %v2363_v29, %v2362_v25   ;;  %v2374_v48 = vrot.slane %v2373_v0, 2  ;;  %v2399_v2 = vadd.f32 %v2398_v20, %v2397_v11 }
 0xdb3   : >> { %v2351_v42 = vadd.f32 %v2350_v58, %v2349_v41   ;;  %v2386_v44 = vadd.f32 %v2385_v62, %v2384_v16  ;;  %vm2438_vm6 = vcmp.eq.f32.partialorder %v2418_v45, inf  ;;  %v2441_v18 = vand.u32 2147483648, %v2418_v45 }
 0xdb4   : >> { %v2375_v56 = vadd.f32 %v2374_v48, %v2373_v0  ;;  %v2400_v60 = vrot.slane %v2399_v2, 2  ;;  %vm2440_vm7 = vcmp.eq.f32.partialorder %v2418_v45, 0.0  ;;  %v4759_v48 = vld [vmem:[#allocation15_spill] sm:$0xff] }
 0xdb5   : >> { %2867 = vrsqrt.f32 %v2351_v42  ;;  %v2387_v38 = vrot.slane %v2386_v44, 2  ;;  %vm2426_vm8 = vcmp.eq.f32.partialorder %v2351_v42, inf  ;;  %v2429_v21 = vand.u32 2147483648, %v2351_v42 }
 0xdb6   : >> { %v2376_v19 = vrot.slane %v2375_v56, 1  ;;  %v2401_v46 = vadd.f32 %v2400_v60, %v2399_v2  ;;  %vm2428_vm9 = vcmp.eq.f32.partialorder %v2351_v42, 0.0 }
 0xdb7   : >> { %v2388_v13 = vadd.f32 %v2387_v38, %v2386_v44  ;;  %v4761_v44 = vld [vmem:[#allocation14_spill] sm:$0xff] }
 0xdb8   : >> { %v2866_v12 = vpop.eup %2865  ;;  %v2377_v20 = vadd.f32 %v2376_v19, %v2375_v56   ;;  %v2402_v49 = vrot.slane %v2401_v46, 1 }
 0xdb9   : >> { %v2432_v15 = vmul.f32 %v2866_v12, %v2418_v45  ;;  %v2389_v40 = vrot.slane %v2388_v13, 1 }
 0xdba   : >> { %v2403_v27 = vadd.f32 %v2402_v49, %v2401_v46  }
 0xdbb   : >> { %v2868_v30 = vpop.eup %2867  ;;  %v2433_v17 = vmul.f32 %v2866_v12, %v2432_v15  ;;  %v2390_v60 = vadd.f32 %v2389_v40, %v2388_v13  }
 0xdbc   : >> { %v2420_v50 = vmul.f32 %v2868_v30, %v2351_v42 }
 0xdbd   : >> { %v2434_v14 = vmul.f32 0.5, %v2433_v17 }
 0xdbe   : >> { %v2421_v24 = vmul.f32 %v2868_v30, %v2420_v50 }
 0xdbf   : >> { %v2435_v43 = vsub.f32 1.5, %v2434_v14 }
 0xdc0   : >> { %v2422_v39 = vmul.f32 0.5, %v2421_v24 }
 0xdc1   : >> { %v2436_v5 = vmul.f32 %v2866_v12, %v2435_v43 }
 0xdc2   : >> { %v2423_v10 = vsub.f32 1.5, %v2422_v39 }
 0xdc3   : >> { %v2437_v36 = vmul.f32 %v2436_v5, %v2418_v45 }
 0xdc4   : >> { %v2424_v54 = vmul.f32 %v2868_v30, %v2423_v10 }
 0xdc5   : >> { %v2439_v3 = vsel %vm2438_vm6, %v2418_v45, %v2437_v36 }
 0xdc6   : >> { %v2442_v59 = vsel %vm2440_vm7, %v2441_v18, %v2439_v3  ;;  %v2425_v4 = vmul.f32 %v2424_v54, %v2351_v42  ;;  %v4764_v3 = vmov %v4711_v22 }
 0xdc7   : >> { %v2443_v35 = vadd.f32 1e-05, %v2442_v59 }
 0xdc8   : >> { %v2427_v37 = vsel %vm2426_vm8, %v2351_v42, %v2425_v4 }
 0xdc9   : >> { %2869 = vrcp.f32 %v2443_v35  ;;  %v2430_v34 = vsel %vm2428_vm9, %v2429_v21, %v2427_v37  ;;  %v4763_v35 = vmov %v4282_v55 }
 0xdcf   : >> { %v2870_v57 = vpop.eup %2869 }
 0xdd0   : >> { %v2445_v1 = vmul.f32 %v2870_v57, %v2430_v34  ;;  %917 = sbr.rel (!%p4519_p4) target bundleno = 1448 (0x5a8), region = 77 }
 0xdd2   : >> { %vm2446_vm10 = vcmp.lt.f32.partialorder %v2445_v1, %v4459_v32 }
 0xdd3   : >> { %v2447_v51 = vsel %vm2446_vm10, %v2445_v1, %v4459_v32   ;;  %v2450_v28 = vsel %vm2446_vm10, %v4492_v52, %v4462_v33   ;;  %v2451_v6 = vsel %vm2446_vm10, %v4494_v63, %v4465_v26   ;;  %v4758_v33 = vmov %v4318_v47  ;;  %v4762_v47 = vld [vmem:[#allocation8_spill] sm:$0xff] }
 0xdd4   : >> { %v4756_v7 = vmov %v2451_v6  ;;  %v4757_v29 = vmov %v2450_v28  ;;  %v4765_v52 = vmov %v3955_v9  ;;  %2452 = vst [vmem:[%s3071_s21] sm:$0xff] (%p4519_p4), %v2450_v28 }
 0xdd5   : > { %2453 = vst [vmem:[%s3071_s21 + $0x8] sm:$0xff] %v2451_v6 }
 0xdd6 PF: > { %s14_s14 = sadd.s32 1, %s2956_s14  }
 0xdd7   : > { %p11_p5 = scmp.ge.s32.totalorder %s14_s14, 4  }
 0xdd9   :  { %13 = sbr.rel (!%p11_p5) target bundleno = 2 (0x2), region = 88 }

</bundles_post_ra>
